<compile_context>
chip_gen: v7x
topology: tpu7x:2x2x1
jax: 0.10.0
libtpu: 0.0.40
codegen_flags: <defaults>
</compile_context>

<pallas_src>
import numpy as np
import jax
import jax.numpy as jnp
from jax import lax
from jax.experimental import pallas as pl
from jax.experimental.pallas import tpu as pltpu

POOL = 5          # MaxPool1d(5)
LEAKY = 0.01      # nn.LeakyReLU default negative_slope
IN_EPS = 1e-5     # nn.InstanceNorm1d default eps


def _make_sel(w_in, w_out):
    """0/1 tap-gather matrix S (w_in, 4*w_out).

    For y of shape (C, w_in):  (y @ S)[:, k*w_out + j] == ypad[:, 2*j + k],
    where ypad is y zero-padded by 1 on each side (Conv1d k=4, s=2, p=1 taps).
    Columns that address the zero padding are all-zero columns.
    """
    t = np.arange(w_in)[:, None]                       # (w_in, 1)
    j = np.arange(w_out)[None, :]                      # (1, w_out)
    blocks = [(t == (2 * j + k - 1)).astype(np.float32) for k in range(4)]
    return jnp.asarray(np.concatenate(blocks, axis=1))  # (w_in, 4*w_out)


# ----------------------------- fused kernel -----------------------------
def _disc_kernel(x_ref,
                 s0_ref, w0_ref, b0_ref,
                 s1_ref, w1_ref, b1_ref,
                 s2_ref, w2_ref, b2_ref,
                 s3_ref, w3_ref, b3_ref,
                 wq_ref, bq_ref, wk_ref, bk_ref, wv_ref, bv_ref, gamma_ref,
                 fc1_ref, fb1_ref, fc2_ref, fb2_ref,
                 o_ref):
    def down(y, s_ref, w_ref, b_ref):
        # y: (C_in, W_in); s: (W_in, 4*W_out); w: (4, C_out, C_in); b: (C_out, 1)
        wo = s_ref.shape[1] // 4
        # Build the 4 shifted / zero-padded conv taps with one MXU matmul.
        taps = jnp.dot(y, s_ref[...], preferred_element_type=jnp.float32)   # (C_in, 4*wo)
        acc = jnp.dot(w_ref[0], taps[:, 0 * wo:1 * wo], preferred_element_type=jnp.float32)
        acc = acc + jnp.dot(w_ref[1], taps[:, 1 * wo:2 * wo], preferred_element_type=jnp.float32)
        acc = acc + jnp.dot(w_ref[2], taps[:, 2 * wo:3 * wo], preferred_element_type=jnp.float32)
        acc = acc + jnp.dot(w_ref[3], taps[:, 3 * wo:4 * wo], preferred_element_type=jnp.float32)
        acc = acc + b_ref[...]
        # InstanceNorm1d (affine=False, biased variance) + LeakyReLU
        mean = jnp.mean(acc, axis=1, keepdims=True)
        var = jnp.mean(jnp.square(acc - mean), axis=1, keepdims=True)
        yn = (acc - mean) * lax.rsqrt(var + IN_EPS)
        return jnp.where(yn >= 0, yn, LEAKY * yn)

    h = x_ref[...]                                   # (19, 240)
    h = down(h, s0_ref, w0_ref, b0_ref)              # (32, 120)
    h = down(h, s1_ref, w1_ref, b1_ref)              # (64, 60)
    h = down(h, s2_ref, w2_ref, b2_ref)              # (64, 30)
    h = down(h, s3_ref, w3_ref, b3_ref)              # (128, 15)

    # ---- Self_Attn(128) ----
    q = jnp.dot(wq_ref[...], h, preferred_element_type=jnp.float32) + bq_ref[...]   # (16, 15)
    k = jnp.dot(wk_ref[...], h, preferred_element_type=jnp.float32) + bk_ref[...]   # (16, 15)
    v = jnp.dot(wv_ref[...], h, preferred_element_type=jnp.float32) + bv_ref[...]   # (128, 15)
    # energy[i, j] = sum_d q[d, i] * k[d, j]
    energy = lax.dot_general(q, k, (((0,), (0,)), ((), ())),
                             preferred_element_type=jnp.float32)                    # (15, 15)
    energy = energy - jnp.max(energy, axis=-1, keepdims=True)
    p = jnp.exp(energy)
    attn = p * pl.reciprocal(jnp.sum(p, axis=-1, keepdims=True), approx=True)
    # out[c, i] = sum_j v[c, j] * attn[i, j]
    att = lax.dot_general(v, attn, (((1,), (1,)), ((), ())),
                          preferred_element_type=jnp.float32)                       # (128, 15)
    att = gamma_ref[...] * att + h

    # ---- MaxPool1d(5) + Flatten + Linear(384, 64) fused ----
    acc = fb1_ref[...]                                # (64, 1)
    n_pool = fc1_ref.shape[0]                         # 3
    for wdx in range(n_pool):
        col = jnp.max(att[:, POOL * wdx:POOL * (wdx + 1)], axis=1, keepdims=True)   # (128, 1)
        acc = acc + jnp.dot(fc1_ref[wdx], col, preferred_element_type=jnp.float32)
    acc = jnp.where(acc >= 0, acc, LEAKY * acc)       # LeakyReLU
    # Linear(64, 1) + Sigmoid
    z = jnp.dot(fc2_ref[...], acc, preferred_element_type=jnp.float32) + fb2_ref[...]  # (1, 1)
    o_ref[...] = 1.0 / (1.0 + jnp.exp(-z))


# ----------------------------- wrapper -----------------------------
def _const_spec(a):
    zeros = (0,) * a.ndim
    return pl.BlockSpec(tuple(a.shape), lambda i: zeros)


def discriminator_forward(x, p):
    B, C0, W = x.shape
    widths = [W]
    for _ in range(4):
        widths.append(widths[-1] // 2)     # Conv1d(k=4, s=2, p=1) on even widths
    Wf = widths[-1]                        # 15
    n_pool = Wf // POOL                    # 3
    C = p["wv"].shape[0]                   # 128
    Cq = C // 8

    # Kernel-ready parameter layouts (tiny one-time reshapes/transposes).
    sels, wks, bks = [], [], []
    for i in range(4):
        sels.append(_make_sel(widths[i], widths[i + 1]))               # constant 0/1 matrix
        wks.append(jnp.transpose(p[f"conv{i}_w"], (2, 0, 1)))          # (4, C_out, C_in)
        bks.append(p[f"conv{i}_b"].reshape(-1, 1))                     # (C_out, 1)

    wq = p["wq"].reshape(Cq, C); bq = p["bq"].reshape(Cq, 1)
    wk = p["wk"].reshape(Cq, C); bk = p["bk"].reshape(Cq, 1)
    wv = p["wv"].reshape(C, C);  bv = p["bv"].reshape(C, 1)
    gamma = p["gamma"].reshape(1, 1)

    # fc1: (64, 384) with flat index c*n_pool + w  ->  (n_pool, 64, C)
    fc1 = jnp.transpose(p["fc1_w"].reshape(64, C, n_pool), (2, 0, 1))
    fb1 = p["fc1_b"].reshape(64, 1)
    fc2 = p["fc2_w"]                       # (1, 64)
    fb2 = p["fc2_b"].reshape(1, 1)

    args = [x]
    in_specs = [pl.BlockSpec((None, C0, W), lambda i: (i, 0, 0))]
    for i in range(4):
        args += [sels[i], wks[i], bks[i]]
        in_specs += [_const_spec(sels[i]), _const_spec(wks[i]), _const_spec(bks[i])]
    for a in (wq, bq, wk, bk, wv, bv, gamma, fc1, fb1, fc2, fb2):
        args.append(a)
        in_specs.append(_const_spec(a))

    out = pl.pallas_call(
        _disc_kernel,
        out_shape=jax.ShapeDtypeStruct((B, 1, 1), jnp.float32),
        grid=(B,),
        in_specs=in_specs,
        out_specs=pl.BlockSpec((None, 1, 1), lambda i: (i, 0, 0)),
        compiler_params=pltpu.CompilerParams(dimension_semantics=("parallel",)),
    )(*args)
    return out.reshape(B, 1)


# ----------------------------- pure-JAX reference -----------------------------
def _ref_forward(x, p):
    HI = lax.Precision.HIGHEST
    h = x
    for i in range(4):
        w = p[f"conv{i}_w"]
        b = p[f"conv{i}_b"]
        h = lax.conv_general_dilated(h, w, window_strides=(2,), padding=[(1, 1)],
                                     dimension_numbers=("NCH", "OIH", "NCH"),
                                     precision=HI)
        h = h + b[None, :, None]
        mean = jnp.mean(h, axis=2, keepdims=True)
        var = jnp.mean(jnp.square(h - mean), axis=2, keepdims=True)
        h = (h - mean) / jnp.sqrt(var + IN_EPS)
        h = jnp.where(h >= 0, h, LEAKY * h)
    B, C, W = h.shape
    q = jnp.einsum("oc,bcw->bow", p["wq"].reshape(C // 8, C), h, precision=HI) + p["bq"][None, :, None]
    k = jnp.einsum("oc,bcw->bow", p["wk"].reshape(C // 8, C), h, precision=HI) + p["bk"][None, :, None]
    v = jnp.einsum("oc,bcw->bow", p["wv"].reshape(C, C), h, precision=HI) + p["bv"][None, :, None]
    energy = jnp.einsum("bdi,bdj->bij", q, k, precision=HI)
    attn = jax.nn.softmax(energy, axis=-1)
    out = jnp.einsum("bcj,bij->bci", v, attn, precision=HI)
    out = p["gamma"].reshape(()) * out + h
    pooled = jnp.max(out.reshape(B, C, W // POOL, POOL), axis=-1)
    flat = pooled.reshape(B, -1)
    h1 = jnp.einsum("bi,oi->bo", flat, p["fc1_w"], precision=HI) + p["fc1_b"]
    h1 = jnp.where(h1 >= 0, h1, LEAKY * h1)
    z = jnp.einsum("bi,oi->bo", h1, p["fc2_w"], precision=HI) + p["fc2_b"]
    return jax.nn.sigmoid(z)


# ----------------------------- params -----------------------------
def init_params(key):
    ks = jax.random.split(key, 20)

    def n(k, shape, scale=0.1):
        return scale * jax.random.normal(k, shape, dtype=jnp.float32)

    p = {}
    chans = [(19, 32), (32, 64), (64, 64), (64, 128)]
    for i, (ci, co) in enumerate(chans):
        p[f"conv{i}_w"] = n(ks[2 * i], (co, ci, 4))
        p[f"conv{i}_b"] = n(ks[2 * i + 1], (co,))
    C = 128
    p["wq"] = n(ks[8], (C // 8, C, 1))
    p["bq"] = n(ks[9], (C // 8,))
    p["wk"] = n(ks[10], (C // 8, C, 1))
    p["bk"] = n(ks[11], (C // 8,))
    p["wv"] = n(ks[12], (C, C, 1))
    p["bv"] = n(ks[13], (C,))
    p["gamma"] = jnp.zeros((1,), jnp.float32)   # nn.Parameter(torch.zeros(1))
    p["fc1_w"] = n(ks[14], (64, 384))
    p["fc1_b"] = n(ks[15], (64,))
    p["fc2_w"] = n(ks[16], (1, 64))
    p["fc2_b"] = n(ks[17], (1,))
    return p


if __name__ == "__main__":
    key = jax.random.PRNGKey(0)
    kx, kp = jax.random.split(key)
    # Width 240 is forced by Linear(384,64): 240->120->60->30->15 ->pool(5)-> 3; 128*3 = 384
    x = jax.random.normal(kx, (2, 19, 240), dtype=jnp.float32)
    params = init_params(kp)

    fwd = jax.jit(discriminator_forward)
    out = fwd(x, params)
    jax.block_until_ready(out)

    assert out.shape == (2, 1), out.shape
    assert bool(jnp.all(jnp.isfinite(out)))
    assert bool(jnp.all((out >= 0.0) & (out <= 1.0)))

    ref = _ref_forward(x, params)
    assert bool(jnp.allclose(out, ref, rtol=2e-3, atol=2e-4)), (out, ref)

    print("KERNEL_OK")
</pallas_src>

<mosaic_0001>
module attributes {stable_mosaic.version = 11 : i64} {
  func.func @_disc_kernel(%arg0: i32, %arg1: memref<1x19x240xf32, #tpu.memory_space<vmem>>, %arg2: memref<240x480xf32, #tpu.memory_space<vmem>>, %arg3: memref<4x32x19xf32, #tpu.memory_space<vmem>>, %arg4: memref<32x1xf32, #tpu.memory_space<vmem>>, %arg5: memref<120x240xf32, #tpu.memory_space<vmem>>, %arg6: memref<4x64x32xf32, #tpu.memory_space<vmem>>, %arg7: memref<64x1xf32, #tpu.memory_space<vmem>>, %arg8: memref<60x120xf32, #tpu.memory_space<vmem>>, %arg9: memref<4x64x64xf32, #tpu.memory_space<vmem>>, %arg10: memref<64x1xf32, #tpu.memory_space<vmem>>, %arg11: memref<30x60xf32, #tpu.memory_space<vmem>>, %arg12: memref<4x128x64xf32, #tpu.memory_space<vmem>>, %arg13: memref<128x1xf32, #tpu.memory_space<vmem>>, %arg14: memref<16x128xf32, #tpu.memory_space<vmem>>, %arg15: memref<16x1xf32, #tpu.memory_space<vmem>>, %arg16: memref<16x128xf32, #tpu.memory_space<vmem>>, %arg17: memref<16x1xf32, #tpu.memory_space<vmem>>, %arg18: memref<128x128xf32, #tpu.memory_space<vmem>>, %arg19: memref<128x1xf32, #tpu.memory_space<vmem>>, %arg20: memref<1x1xf32, #tpu.memory_space<vmem>>, %arg21: memref<3x64x128xf32, #tpu.memory_space<vmem>>, %arg22: memref<64x1xf32, #tpu.memory_space<vmem>>, %arg23: memref<1x64xf32, #tpu.memory_space<vmem>>, %arg24: memref<1x1xf32, #tpu.memory_space<vmem>>, %arg25: memref<1x1x1xf32, #tpu.memory_space<vmem>>) attributes {dimension_semantics = [#tpu.dimension_semantics<parallel>], iteration_bounds = array<i64: 2>, scalar_prefetch = 0 : i64, scratch_operands = 0 : i64, tpu.core_type = #tpu.core_type<tc>, window_params = [{transform_indices = @transform_0, window_bounds = array<i64: 1, 19, 240>}, {pipeline_mode = #tpu.pipeline_mode<synchronous>, transform_indices = @transform_1, window_bounds = array<i64: 240, 480>}, {pipeline_mode = #tpu.pipeline_mode<synchronous>, transform_indices = @transform_2, window_bounds = array<i64: 4, 32, 19>}, {pipeline_mode = #tpu.pipeline_mode<synchronous>, transform_indices = @transform_3, window_bounds = array<i64: 32, 1>}, {pipeline_mode = #tpu.pipeline_mode<synchronous>, transform_indices = @transform_4, window_bounds = array<i64: 120, 240>}, {pipeline_mode = #tpu.pipeline_mode<synchronous>, transform_indices = @transform_5, window_bounds = array<i64: 4, 64, 32>}, {pipeline_mode = #tpu.pipeline_mode<synchronous>, transform_indices = @transform_6, window_bounds = array<i64: 64, 1>}, {pipeline_mode = #tpu.pipeline_mode<synchronous>, transform_indices = @transform_7, window_bounds = array<i64: 60, 120>}, {pipeline_mode = #tpu.pipeline_mode<synchronous>, transform_indices = @transform_8, window_bounds = array<i64: 4, 64, 64>}, {pipeline_mode = #tpu.pipeline_mode<synchronous>, transform_indices = @transform_9, window_bounds = array<i64: 64, 1>}, {pipeline_mode = #tpu.pipeline_mode<synchronous>, transform_indices = @transform_10, window_bounds = array<i64: 30, 60>}, {pipeline_mode = #tpu.pipeline_mode<synchronous>, transform_indices = @transform_11, window_bounds = array<i64: 4, 128, 64>}, {pipeline_mode = #tpu.pipeline_mode<synchronous>, transform_indices = @transform_12, window_bounds = array<i64: 128, 1>}, {pipeline_mode = #tpu.pipeline_mode<synchronous>, transform_indices = @transform_13, window_bounds = array<i64: 16, 128>}, {pipeline_mode = #tpu.pipeline_mode<synchronous>, transform_indices = @transform_14, window_bounds = array<i64: 16, 1>}, {pipeline_mode = #tpu.pipeline_mode<synchronous>, transform_indices = @transform_15, window_bounds = array<i64: 16, 128>}, {pipeline_mode = #tpu.pipeline_mode<synchronous>, transform_indices = @transform_16, window_bounds = array<i64: 16, 1>}, {pipeline_mode = #tpu.pipeline_mode<synchronous>, transform_indices = @transform_17, window_bounds = array<i64: 128, 128>}, {pipeline_mode = #tpu.pipeline_mode<synchronous>, transform_indices = @transform_18, window_bounds = array<i64: 128, 1>}, {pipeline_mode = #tpu.pipeline_mode<synchronous>, transform_indices = @transform_19, window_bounds = array<i64: 1, 1>}, {pipeline_mode = #tpu.pipeline_mode<synchronous>, transform_indices = @transform_20, window_bounds = array<i64: 3, 64, 128>}, {pipeline_mode = #tpu.pipeline_mode<synchronous>, transform_indices = @transform_21, window_bounds = array<i64: 64, 1>}, {pipeline_mode = #tpu.pipeline_mode<synchronous>, transform_indices = @transform_22, window_bounds = array<i64: 1, 64>}, {pipeline_mode = #tpu.pipeline_mode<synchronous>, transform_indices = @transform_23, window_bounds = array<i64: 1, 1>}, {transform_indices = @transform_24, window_bounds = array<i64: 1, 1, 1>}]} {
    %c0 = arith.constant 0 : index
    %c0_0 = arith.constant 0 : index
    %c0_1 = arith.constant 0 : index
    %0 = vector.load %arg1[%c0, %c0_0, %c0_1] : memref<1x19x240xf32, #tpu.memory_space<vmem>>, vector<1x19x240xf32>
    %1 = vector.shape_cast %0 : vector<1x19x240xf32> to vector<19x240xf32>
    %c0_2 = arith.constant 0 : index
    %c0_3 = arith.constant 0 : index
    %2 = vector.load %arg2[%c0_2, %c0_3] : memref<240x480xf32, #tpu.memory_space<vmem>>, vector<240x480xf32>
    %cst = arith.constant dense<0.000000e+00> : vector<19x480xf32>
    %3 = tpu.matmul %1, %2, %cst {dimension_numbers = #tpu.dot_dimension_numbers<[1], [0], [0], [1], [0, 0, 1, 1], [], []>} : vector<19x240xf32>, vector<240x480xf32>, vector<19x480xf32> -> vector<19x480xf32>
    %c0_4 = arith.constant 0 : index
    %c0_5 = arith.constant 0 : index
    %c0_6 = arith.constant 0 : index
    %4 = vector.load %arg3[%c0_4, %c0_5, %c0_6] : memref<4x32x19xf32, #tpu.memory_space<vmem>>, vector<1x32x19xf32>
    %5 = vector.shape_cast %4 : vector<1x32x19xf32> to vector<32x19xf32>
    %6 = vector.extract_strided_slice %3 {offsets = [0, 0], sizes = [19, 120], strides = [1, 1]} : vector<19x480xf32> to vector<19x120xf32>
    %cst_7 = arith.constant dense<0.000000e+00> : vector<32x120xf32>
    %7 = tpu.matmul %5, %6, %cst_7 {dimension_numbers = #tpu.dot_dimension_numbers<[1], [0], [0], [1], [0, 0, 1, 1], [], []>} : vector<32x19xf32>, vector<19x120xf32>, vector<32x120xf32> -> vector<32x120xf32>
    %c1 = arith.constant 1 : index
    %c0_8 = arith.constant 0 : index
    %c0_9 = arith.constant 0 : index
    %8 = vector.load %arg3[%c1, %c0_8, %c0_9] : memref<4x32x19xf32, #tpu.memory_space<vmem>>, vector<1x32x19xf32>
    %9 = vector.shape_cast %8 : vector<1x32x19xf32> to vector<32x19xf32>
    %10 = vector.extract_strided_slice %3 {offsets = [0, 120], sizes = [19, 120], strides = [1, 1]} : vector<19x480xf32> to vector<19x120xf32>
    %cst_10 = arith.constant dense<0.000000e+00> : vector<32x120xf32>
    %11 = tpu.matmul %9, %10, %cst_10 {dimension_numbers = #tpu.dot_dimension_numbers<[1], [0], [0], [1], [0, 0, 1, 1], [], []>} : vector<32x19xf32>, vector<19x120xf32>, vector<32x120xf32> -> vector<32x120xf32>
    %12 = arith.addf %7, %11 : vector<32x120xf32>
    %c2 = arith.constant 2 : index
    %c0_11 = arith.constant 0 : index
    %c0_12 = arith.constant 0 : index
    %13 = vector.load %arg3[%c2, %c0_11, %c0_12] : memref<4x32x19xf32, #tpu.memory_space<vmem>>, vector<1x32x19xf32>
    %14 = vector.shape_cast %13 : vector<1x32x19xf32> to vector<32x19xf32>
    %15 = vector.extract_strided_slice %3 {offsets = [0, 240], sizes = [19, 120], strides = [1, 1]} : vector<19x480xf32> to vector<19x120xf32>
    %cst_13 = arith.constant dense<0.000000e+00> : vector<32x120xf32>
    %16 = tpu.matmul %14, %15, %cst_13 {dimension_numbers = #tpu.dot_dimension_numbers<[1], [0], [0], [1], [0, 0, 1, 1], [], []>} : vector<32x19xf32>, vector<19x120xf32>, vector<32x120xf32> -> vector<32x120xf32>
    %17 = arith.addf %12, %16 : vector<32x120xf32>
    %c3 = arith.constant 3 : index
    %c0_14 = arith.constant 0 : index
    %c0_15 = arith.constant 0 : index
    %18 = vector.load %arg3[%c3, %c0_14, %c0_15] : memref<4x32x19xf32, #tpu.memory_space<vmem>>, vector<1x32x19xf32>
    %19 = vector.shape_cast %18 : vector<1x32x19xf32> to vector<32x19xf32>
    %20 = vector.extract_strided_slice %3 {offsets = [0, 360], sizes = [19, 120], strides = [1, 1]} : vector<19x480xf32> to vector<19x120xf32>
    %cst_16 = arith.constant dense<0.000000e+00> : vector<32x120xf32>
    %21 = tpu.matmul %19, %20, %cst_16 {dimension_numbers = #tpu.dot_dimension_numbers<[1], [0], [0], [1], [0, 0, 1, 1], [], []>} : vector<32x19xf32>, vector<19x120xf32>, vector<32x120xf32> -> vector<32x120xf32>
    %22 = arith.addf %17, %21 : vector<32x120xf32>
    %c0_17 = arith.constant 0 : index
    %c0_18 = arith.constant 0 : index
    %23 = vector.load %arg4[%c0_17, %c0_18] : memref<32x1xf32, #tpu.memory_space<vmem>>, vector<32x1xf32>
    %24 = vector.broadcast %23 : vector<32x1xf32> to vector<32x120xf32>
    %25 = arith.addf %22, %24 : vector<32x120xf32>
    %cst_19 = arith.constant dense<0.000000e+00> : vector<32xf32>
    %26 = vector.multi_reduction <add>, %25, %cst_19 [1] : vector<32x120xf32> to vector<32xf32>
    %27 = vector.shape_cast %26 : vector<32xf32> to vector<32x1xf32>
    %cst_20 = arith.constant 1.200000e+02 : f32
    %28 = vector.broadcast %cst_20 : f32 to vector<32x1xf32>
    %29 = arith.divf %27, %28 : vector<32x1xf32>
    %30 = vector.broadcast %29 : vector<32x1xf32> to vector<32x120xf32>
    %31 = arith.subf %25, %30 : vector<32x120xf32>
    %32 = arith.mulf %31, %31 : vector<32x120xf32>
    %cst_21 = arith.constant dense<0.000000e+00> : vector<32xf32>
    %33 = vector.multi_reduction <add>, %32, %cst_21 [1] : vector<32x120xf32> to vector<32xf32>
    %34 = vector.shape_cast %33 : vector<32xf32> to vector<32x1xf32>
    %cst_22 = arith.constant 1.200000e+02 : f32
    %35 = vector.broadcast %cst_22 : f32 to vector<32x1xf32>
    %36 = arith.divf %34, %35 : vector<32x1xf32>
    %37 = vector.broadcast %29 : vector<32x1xf32> to vector<32x120xf32>
    %38 = arith.subf %25, %37 : vector<32x120xf32>
    %cst_23 = arith.constant 9.99999974E-6 : f32
    %39 = vector.broadcast %cst_23 : f32 to vector<32x1xf32>
    %40 = arith.addf %36, %39 : vector<32x1xf32>
    %41 = math.rsqrt %40 : vector<32x1xf32>
    %42 = vector.broadcast %41 : vector<32x1xf32> to vector<32x120xf32>
    %43 = arith.mulf %38, %42 : vector<32x120xf32>
    %cst_24 = arith.constant 0.000000e+00 : f32
    %44 = vector.broadcast %cst_24 : f32 to vector<32x120xf32>
    %45 = arith.cmpf oge, %43, %44 : vector<32x120xf32>
    %cst_25 = arith.constant 0.00999999977 : f32
    %46 = vector.broadcast %cst_25 : f32 to vector<32x120xf32>
    %47 = arith.mulf %46, %43 : vector<32x120xf32>
    %48 = arith.select %45, %43, %47 : vector<32x120xi1>, vector<32x120xf32>
    %c0_26 = arith.constant 0 : index
    %c0_27 = arith.constant 0 : index
    %49 = vector.load %arg5[%c0_26, %c0_27] : memref<120x240xf32, #tpu.memory_space<vmem>>, vector<120x240xf32>
    %cst_28 = arith.constant dense<0.000000e+00> : vector<32x240xf32>
    %50 = tpu.matmul %48, %49, %cst_28 {dimension_numbers = #tpu.dot_dimension_numbers<[1], [0], [0], [1], [0, 0, 1, 1], [], []>} : vector<32x120xf32>, vector<120x240xf32>, vector<32x240xf32> -> vector<32x240xf32>
    %c0_29 = arith.constant 0 : index
    %c0_30 = arith.constant 0 : index
    %c0_31 = arith.constant 0 : index
    %51 = vector.load %arg6[%c0_29, %c0_30, %c0_31] : memref<4x64x32xf32, #tpu.memory_space<vmem>>, vector<1x64x32xf32>
    %52 = vector.shape_cast %51 : vector<1x64x32xf32> to vector<64x32xf32>
    %53 = vector.extract_strided_slice %50 {offsets = [0, 0], sizes = [32, 60], strides = [1, 1]} : vector<32x240xf32> to vector<32x60xf32>
    %cst_32 = arith.constant dense<0.000000e+00> : vector<64x60xf32>
    %54 = tpu.matmul %52, %53, %cst_32 {dimension_numbers = #tpu.dot_dimension_numbers<[1], [0], [0], [1], [0, 0, 1, 1], [], []>} : vector<64x32xf32>, vector<32x60xf32>, vector<64x60xf32> -> vector<64x60xf32>
    %c1_33 = arith.constant 1 : index
    %c0_34 = arith.constant 0 : index
    %c0_35 = arith.constant 0 : index
    %55 = vector.load %arg6[%c1_33, %c0_34, %c0_35] : memref<4x64x32xf32, #tpu.memory_space<vmem>>, vector<1x64x32xf32>
    %56 = vector.shape_cast %55 : vector<1x64x32xf32> to vector<64x32xf32>
    %57 = vector.extract_strided_slice %50 {offsets = [0, 60], sizes = [32, 60], strides = [1, 1]} : vector<32x240xf32> to vector<32x60xf32>
    %cst_36 = arith.constant dense<0.000000e+00> : vector<64x60xf32>
    %58 = tpu.matmul %56, %57, %cst_36 {dimension_numbers = #tpu.dot_dimension_numbers<[1], [0], [0], [1], [0, 0, 1, 1], [], []>} : vector<64x32xf32>, vector<32x60xf32>, vector<64x60xf32> -> vector<64x60xf32>
    %59 = arith.addf %54, %58 : vector<64x60xf32>
    %c2_37 = arith.constant 2 : index
    %c0_38 = arith.constant 0 : index
    %c0_39 = arith.constant 0 : index
    %60 = vector.load %arg6[%c2_37, %c0_38, %c0_39] : memref<4x64x32xf32, #tpu.memory_space<vmem>>, vector<1x64x32xf32>
    %61 = vector.shape_cast %60 : vector<1x64x32xf32> to vector<64x32xf32>
    %62 = vector.extract_strided_slice %50 {offsets = [0, 120], sizes = [32, 60], strides = [1, 1]} : vector<32x240xf32> to vector<32x60xf32>
    %cst_40 = arith.constant dense<0.000000e+00> : vector<64x60xf32>
    %63 = tpu.matmul %61, %62, %cst_40 {dimension_numbers = #tpu.dot_dimension_numbers<[1], [0], [0], [1], [0, 0, 1, 1], [], []>} : vector<64x32xf32>, vector<32x60xf32>, vector<64x60xf32> -> vector<64x60xf32>
    %64 = arith.addf %59, %63 : vector<64x60xf32>
    %c3_41 = arith.constant 3 : index
    %c0_42 = arith.constant 0 : index
    %c0_43 = arith.constant 0 : index
    %65 = vector.load %arg6[%c3_41, %c0_42, %c0_43] : memref<4x64x32xf32, #tpu.memory_space<vmem>>, vector<1x64x32xf32>
    %66 = vector.shape_cast %65 : vector<1x64x32xf32> to vector<64x32xf32>
    %67 = vector.extract_strided_slice %50 {offsets = [0, 180], sizes = [32, 60], strides = [1, 1]} : vector<32x240xf32> to vector<32x60xf32>
    %cst_44 = arith.constant dense<0.000000e+00> : vector<64x60xf32>
    %68 = tpu.matmul %66, %67, %cst_44 {dimension_numbers = #tpu.dot_dimension_numbers<[1], [0], [0], [1], [0, 0, 1, 1], [], []>} : vector<64x32xf32>, vector<32x60xf32>, vector<64x60xf32> -> vector<64x60xf32>
    %69 = arith.addf %64, %68 : vector<64x60xf32>
    %c0_45 = arith.constant 0 : index
    %c0_46 = arith.constant 0 : index
    %70 = vector.load %arg7[%c0_45, %c0_46] : memref<64x1xf32, #tpu.memory_space<vmem>>, vector<64x1xf32>
    %71 = vector.broadcast %70 : vector<64x1xf32> to vector<64x60xf32>
    %72 = arith.addf %69, %71 : vector<64x60xf32>
    %cst_47 = arith.constant dense<0.000000e+00> : vector<64xf32>
    %73 = vector.multi_reduction <add>, %72, %cst_47 [1] : vector<64x60xf32> to vector<64xf32>
    %74 = vector.shape_cast %73 : vector<64xf32> to vector<64x1xf32>
    %cst_48 = arith.constant 6.000000e+01 : f32
    %75 = vector.broadcast %cst_48 : f32 to vector<64x1xf32>
    %76 = arith.divf %74, %75 : vector<64x1xf32>
    %77 = vector.broadcast %76 : vector<64x1xf32> to vector<64x60xf32>
    %78 = arith.subf %72, %77 : vector<64x60xf32>
    %79 = arith.mulf %78, %78 : vector<64x60xf32>
    %cst_49 = arith.constant dense<0.000000e+00> : vector<64xf32>
    %80 = vector.multi_reduction <add>, %79, %cst_49 [1] : vector<64x60xf32> to vector<64xf32>
    %81 = vector.shape_cast %80 : vector<64xf32> to vector<64x1xf32>
    %cst_50 = arith.constant 6.000000e+01 : f32
    %82 = vector.broadcast %cst_50 : f32 to vector<64x1xf32>
    %83 = arith.divf %81, %82 : vector<64x1xf32>
    %84 = vector.broadcast %76 : vector<64x1xf32> to vector<64x60xf32>
    %85 = arith.subf %72, %84 : vector<64x60xf32>
    %cst_51 = arith.constant 9.99999974E-6 : f32
    %86 = vector.broadcast %cst_51 : f32 to vector<64x1xf32>
    %87 = arith.addf %83, %86 : vector<64x1xf32>
    %88 = math.rsqrt %87 : vector<64x1xf32>
    %89 = vector.broadcast %88 : vector<64x1xf32> to vector<64x60xf32>
    %90 = arith.mulf %85, %89 : vector<64x60xf32>
    %cst_52 = arith.constant 0.000000e+00 : f32
    %91 = vector.broadcast %cst_52 : f32 to vector<64x60xf32>
    %92 = arith.cmpf oge, %90, %91 : vector<64x60xf32>
    %cst_53 = arith.constant 0.00999999977 : f32
    %93 = vector.broadcast %cst_53 : f32 to vector<64x60xf32>
    %94 = arith.mulf %93, %90 : vector<64x60xf32>
    %95 = arith.select %92, %90, %94 : vector<64x60xi1>, vector<64x60xf32>
    %c0_54 = arith.constant 0 : index
    %c0_55 = arith.constant 0 : index
    %96 = vector.load %arg8[%c0_54, %c0_55] : memref<60x120xf32, #tpu.memory_space<vmem>>, vector<60x120xf32>
    %cst_56 = arith.constant dense<0.000000e+00> : vector<64x120xf32>
    %97 = tpu.matmul %95, %96, %cst_56 {dimension_numbers = #tpu.dot_dimension_numbers<[1], [0], [0], [1], [0, 0, 1, 1], [], []>} : vector<64x60xf32>, vector<60x120xf32>, vector<64x120xf32> -> vector<64x120xf32>
    %c0_57 = arith.constant 0 : index
    %c0_58 = arith.constant 0 : index
    %c0_59 = arith.constant 0 : index
    %98 = vector.load %arg9[%c0_57, %c0_58, %c0_59] : memref<4x64x64xf32, #tpu.memory_space<vmem>>, vector<1x64x64xf32>
    %99 = vector.shape_cast %98 : vector<1x64x64xf32> to vector<64x64xf32>
    %100 = vector.extract_strided_slice %97 {offsets = [0, 0], sizes = [64, 30], strides = [1, 1]} : vector<64x120xf32> to vector<64x30xf32>
    %cst_60 = arith.constant dense<0.000000e+00> : vector<64x30xf32>
    %101 = tpu.matmul %99, %100, %cst_60 {dimension_numbers = #tpu.dot_dimension_numbers<[1], [0], [0], [1], [0, 0, 1, 1], [], []>} : vector<64x64xf32>, vector<64x30xf32>, vector<64x30xf32> -> vector<64x30xf32>
    %c1_61 = arith.constant 1 : index
    %c0_62 = arith.constant 0 : index
    %c0_63 = arith.constant 0 : index
    %102 = vector.load %arg9[%c1_61, %c0_62, %c0_63] : memref<4x64x64xf32, #tpu.memory_space<vmem>>, vector<1x64x64xf32>
    %103 = vector.shape_cast %102 : vector<1x64x64xf32> to vector<64x64xf32>
    %104 = vector.extract_strided_slice %97 {offsets = [0, 30], sizes = [64, 30], strides = [1, 1]} : vector<64x120xf32> to vector<64x30xf32>
    %cst_64 = arith.constant dense<0.000000e+00> : vector<64x30xf32>
    %105 = tpu.matmul %103, %104, %cst_64 {dimension_numbers = #tpu.dot_dimension_numbers<[1], [0], [0], [1], [0, 0, 1, 1], [], []>} : vector<64x64xf32>, vector<64x30xf32>, vector<64x30xf32> -> vector<64x30xf32>
    %106 = arith.addf %101, %105 : vector<64x30xf32>
    %c2_65 = arith.constant 2 : index
    %c0_66 = arith.constant 0 : index
    %c0_67 = arith.constant 0 : index
    %107 = vector.load %arg9[%c2_65, %c0_66, %c0_67] : memref<4x64x64xf32, #tpu.memory_space<vmem>>, vector<1x64x64xf32>
    %108 = vector.shape_cast %107 : vector<1x64x64xf32> to vector<64x64xf32>
    %109 = vector.extract_strided_slice %97 {offsets = [0, 60], sizes = [64, 30], strides = [1, 1]} : vector<64x120xf32> to vector<64x30xf32>
    %cst_68 = arith.constant dense<0.000000e+00> : vector<64x30xf32>
    %110 = tpu.matmul %108, %109, %cst_68 {dimension_numbers = #tpu.dot_dimension_numbers<[1], [0], [0], [1], [0, 0, 1, 1], [], []>} : vector<64x64xf32>, vector<64x30xf32>, vector<64x30xf32> -> vector<64x30xf32>
    %111 = arith.addf %106, %110 : vector<64x30xf32>
    %c3_69 = arith.constant 3 : index
    %c0_70 = arith.constant 0 : index
    %c0_71 = arith.constant 0 : index
    %112 = vector.load %arg9[%c3_69, %c0_70, %c0_71] : memref<4x64x64xf32, #tpu.memory_space<vmem>>, vector<1x64x64xf32>
    %113 = vector.shape_cast %112 : vector<1x64x64xf32> to vector<64x64xf32>
    %114 = vector.extract_strided_slice %97 {offsets = [0, 90], sizes = [64, 30], strides = [1, 1]} : vector<64x120xf32> to vector<64x30xf32>
    %cst_72 = arith.constant dense<0.000000e+00> : vector<64x30xf32>
    %115 = tpu.matmul %113, %114, %cst_72 {dimension_numbers = #tpu.dot_dimension_numbers<[1], [0], [0], [1], [0, 0, 1, 1], [], []>} : vector<64x64xf32>, vector<64x30xf32>, vector<64x30xf32> -> vector<64x30xf32>
    %116 = arith.addf %111, %115 : vector<64x30xf32>
    %c0_73 = arith.constant 0 : index
    %c0_74 = arith.constant 0 : index
    %117 = vector.load %arg10[%c0_73, %c0_74] : memref<64x1xf32, #tpu.memory_space<vmem>>, vector<64x1xf32>
    %118 = vector.broadcast %117 : vector<64x1xf32> to vector<64x30xf32>
    %119 = arith.addf %116, %118 : vector<64x30xf32>
    %cst_75 = arith.constant dense<0.000000e+00> : vector<64xf32>
    %120 = vector.multi_reduction <add>, %119, %cst_75 [1] : vector<64x30xf32> to vector<64xf32>
    %121 = vector.shape_cast %120 : vector<64xf32> to vector<64x1xf32>
    %cst_76 = arith.constant 3.000000e+01 : f32
    %122 = vector.broadcast %cst_76 : f32 to vector<64x1xf32>
    %123 = arith.divf %121, %122 : vector<64x1xf32>
    %124 = vector.broadcast %123 : vector<64x1xf32> to vector<64x30xf32>
    %125 = arith.subf %119, %124 : vector<64x30xf32>
    %126 = arith.mulf %125, %125 : vector<64x30xf32>
    %cst_77 = arith.constant dense<0.000000e+00> : vector<64xf32>
    %127 = vector.multi_reduction <add>, %126, %cst_77 [1] : vector<64x30xf32> to vector<64xf32>
    %128 = vector.shape_cast %127 : vector<64xf32> to vector<64x1xf32>
    %cst_78 = arith.constant 3.000000e+01 : f32
    %129 = vector.broadcast %cst_78 : f32 to vector<64x1xf32>
    %130 = arith.divf %128, %129 : vector<64x1xf32>
    %131 = vector.broadcast %123 : vector<64x1xf32> to vector<64x30xf32>
    %132 = arith.subf %119, %131 : vector<64x30xf32>
    %cst_79 = arith.constant 9.99999974E-6 : f32
    %133 = vector.broadcast %cst_79 : f32 to vector<64x1xf32>
    %134 = arith.addf %130, %133 : vector<64x1xf32>
    %135 = math.rsqrt %134 : vector<64x1xf32>
    %136 = vector.broadcast %135 : vector<64x1xf32> to vector<64x30xf32>
    %137 = arith.mulf %132, %136 : vector<64x30xf32>
    %cst_80 = arith.constant 0.000000e+00 : f32
    %138 = vector.broadcast %cst_80 : f32 to vector<64x30xf32>
    %139 = arith.cmpf oge, %137, %138 : vector<64x30xf32>
    %cst_81 = arith.constant 0.00999999977 : f32
    %140 = vector.broadcast %cst_81 : f32 to vector<64x30xf32>
    %141 = arith.mulf %140, %137 : vector<64x30xf32>
    %142 = arith.select %139, %137, %141 : vector<64x30xi1>, vector<64x30xf32>
    %c0_82 = arith.constant 0 : index
    %c0_83 = arith.constant 0 : index
    %143 = vector.load %arg11[%c0_82, %c0_83] : memref<30x60xf32, #tpu.memory_space<vmem>>, vector<30x60xf32>
    %cst_84 = arith.constant dense<0.000000e+00> : vector<64x60xf32>
    %144 = tpu.matmul %142, %143, %cst_84 {dimension_numbers = #tpu.dot_dimension_numbers<[1], [0], [0], [1], [0, 0, 1, 1], [], []>} : vector<64x30xf32>, vector<30x60xf32>, vector<64x60xf32> -> vector<64x60xf32>
    %c0_85 = arith.constant 0 : index
    %c0_86 = arith.constant 0 : index
    %c0_87 = arith.constant 0 : index
    %145 = vector.load %arg12[%c0_85, %c0_86, %c0_87] : memref<4x128x64xf32, #tpu.memory_space<vmem>>, vector<1x128x64xf32>
    %146 = vector.shape_cast %145 : vector<1x128x64xf32> to vector<128x64xf32>
    %147 = vector.extract_strided_slice %144 {offsets = [0, 0], sizes = [64, 15], strides = [1, 1]} : vector<64x60xf32> to vector<64x15xf32>
    %cst_88 = arith.constant dense<0.000000e+00> : vector<128x15xf32>
    %148 = tpu.matmul %146, %147, %cst_88 {dimension_numbers = #tpu.dot_dimension_numbers<[1], [0], [0], [1], [0, 0, 1, 1], [], []>} : vector<128x64xf32>, vector<64x15xf32>, vector<128x15xf32> -> vector<128x15xf32>
    %c1_89 = arith.constant 1 : index
    %c0_90 = arith.constant 0 : index
    %c0_91 = arith.constant 0 : index
    %149 = vector.load %arg12[%c1_89, %c0_90, %c0_91] : memref<4x128x64xf32, #tpu.memory_space<vmem>>, vector<1x128x64xf32>
    %150 = vector.shape_cast %149 : vector<1x128x64xf32> to vector<128x64xf32>
    %151 = vector.extract_strided_slice %144 {offsets = [0, 15], sizes = [64, 15], strides = [1, 1]} : vector<64x60xf32> to vector<64x15xf32>
    %cst_92 = arith.constant dense<0.000000e+00> : vector<128x15xf32>
    %152 = tpu.matmul %150, %151, %cst_92 {dimension_numbers = #tpu.dot_dimension_numbers<[1], [0], [0], [1], [0, 0, 1, 1], [], []>} : vector<128x64xf32>, vector<64x15xf32>, vector<128x15xf32> -> vector<128x15xf32>
    %153 = arith.addf %148, %152 : vector<128x15xf32>
    %c2_93 = arith.constant 2 : index
    %c0_94 = arith.constant 0 : index
    %c0_95 = arith.constant 0 : index
    %154 = vector.load %arg12[%c2_93, %c0_94, %c0_95] : memref<4x128x64xf32, #tpu.memory_space<vmem>>, vector<1x128x64xf32>
    %155 = vector.shape_cast %154 : vector<1x128x64xf32> to vector<128x64xf32>
    %156 = vector.extract_strided_slice %144 {offsets = [0, 30], sizes = [64, 15], strides = [1, 1]} : vector<64x60xf32> to vector<64x15xf32>
    %cst_96 = arith.constant dense<0.000000e+00> : vector<128x15xf32>
    %157 = tpu.matmul %155, %156, %cst_96 {dimension_numbers = #tpu.dot_dimension_numbers<[1], [0], [0], [1], [0, 0, 1, 1], [], []>} : vector<128x64xf32>, vector<64x15xf32>, vector<128x15xf32> -> vector<128x15xf32>
    %158 = arith.addf %153, %157 : vector<128x15xf32>
    %c3_97 = arith.constant 3 : index
    %c0_98 = arith.constant 0 : index
    %c0_99 = arith.constant 0 : index
    %159 = vector.load %arg12[%c3_97, %c0_98, %c0_99] : memref<4x128x64xf32, #tpu.memory_space<vmem>>, vector<1x128x64xf32>
    %160 = vector.shape_cast %159 : vector<1x128x64xf32> to vector<128x64xf32>
    %161 = vector.extract_strided_slice %144 {offsets = [0, 45], sizes = [64, 15], strides = [1, 1]} : vector<64x60xf32> to vector<64x15xf32>
    %cst_100 = arith.constant dense<0.000000e+00> : vector<128x15xf32>
    %162 = tpu.matmul %160, %161, %cst_100 {dimension_numbers = #tpu.dot_dimension_numbers<[1], [0], [0], [1], [0, 0, 1, 1], [], []>} : vector<128x64xf32>, vector<64x15xf32>, vector<128x15xf32> -> vector<128x15xf32>
    %163 = arith.addf %158, %162 : vector<128x15xf32>
    %c0_101 = arith.constant 0 : index
    %c0_102 = arith.constant 0 : index
    %164 = vector.load %arg13[%c0_101, %c0_102] : memref<128x1xf32, #tpu.memory_space<vmem>>, vector<128x1xf32>
    %165 = vector.broadcast %164 : vector<128x1xf32> to vector<128x15xf32>
    %166 = arith.addf %163, %165 : vector<128x15xf32>
    %cst_103 = arith.constant dense<0.000000e+00> : vector<128xf32>
    %167 = vector.multi_reduction <add>, %166, %cst_103 [1] : vector<128x15xf32> to vector<128xf32>
    %168 = vector.shape_cast %167 : vector<128xf32> to vector<128x1xf32>
    %cst_104 = arith.constant 1.500000e+01 : f32
    %169 = vector.broadcast %cst_104 : f32 to vector<128x1xf32>
    %170 = arith.divf %168, %169 : vector<128x1xf32>
    %171 = vector.broadcast %170 : vector<128x1xf32> to vector<128x15xf32>
    %172 = arith.subf %166, %171 : vector<128x15xf32>
    %173 = arith.mulf %172, %172 : vector<128x15xf32>
    %cst_105 = arith.constant dense<0.000000e+00> : vector<128xf32>
    %174 = vector.multi_reduction <add>, %173, %cst_105 [1] : vector<128x15xf32> to vector<128xf32>
    %175 = vector.shape_cast %174 : vector<128xf32> to vector<128x1xf32>
    %cst_106 = arith.constant 1.500000e+01 : f32
    %176 = vector.broadcast %cst_106 : f32 to vector<128x1xf32>
    %177 = arith.divf %175, %176 : vector<128x1xf32>
    %178 = vector.broadcast %170 : vector<128x1xf32> to vector<128x15xf32>
    %179 = arith.subf %166, %178 : vector<128x15xf32>
    %cst_107 = arith.constant 9.99999974E-6 : f32
    %180 = vector.broadcast %cst_107 : f32 to vector<128x1xf32>
    %181 = arith.addf %177, %180 : vector<128x1xf32>
    %182 = math.rsqrt %181 : vector<128x1xf32>
    %183 = vector.broadcast %182 : vector<128x1xf32> to vector<128x15xf32>
    %184 = arith.mulf %179, %183 : vector<128x15xf32>
    %cst_108 = arith.constant 0.000000e+00 : f32
    %185 = vector.broadcast %cst_108 : f32 to vector<128x15xf32>
    %186 = arith.cmpf oge, %184, %185 : vector<128x15xf32>
    %cst_109 = arith.constant 0.00999999977 : f32
    %187 = vector.broadcast %cst_109 : f32 to vector<128x15xf32>
    %188 = arith.mulf %187, %184 : vector<128x15xf32>
    %189 = arith.select %186, %184, %188 : vector<128x15xi1>, vector<128x15xf32>
    %c0_110 = arith.constant 0 : index
    %c0_111 = arith.constant 0 : index
    %190 = vector.load %arg14[%c0_110, %c0_111] : memref<16x128xf32, #tpu.memory_space<vmem>>, vector<16x128xf32>
    %cst_112 = arith.constant dense<0.000000e+00> : vector<16x15xf32>
    %191 = tpu.matmul %190, %189, %cst_112 {dimension_numbers = #tpu.dot_dimension_numbers<[1], [0], [0], [1], [0, 0, 1, 1], [], []>} : vector<16x128xf32>, vector<128x15xf32>, vector<16x15xf32> -> vector<16x15xf32>
    %c0_113 = arith.constant 0 : index
    %c0_114 = arith.constant 0 : index
    %192 = vector.load %arg15[%c0_113, %c0_114] : memref<16x1xf32, #tpu.memory_space<vmem>>, vector<16x1xf32>
    %193 = vector.broadcast %192 : vector<16x1xf32> to vector<16x15xf32>
    %194 = arith.addf %191, %193 : vector<16x15xf32>
    %c0_115 = arith.constant 0 : index
    %c0_116 = arith.constant 0 : index
    %195 = vector.load %arg16[%c0_115, %c0_116] : memref<16x128xf32, #tpu.memory_space<vmem>>, vector<16x128xf32>
    %cst_117 = arith.constant dense<0.000000e+00> : vector<16x15xf32>
    %196 = tpu.matmul %195, %189, %cst_117 {dimension_numbers = #tpu.dot_dimension_numbers<[1], [0], [0], [1], [0, 0, 1, 1], [], []>} : vector<16x128xf32>, vector<128x15xf32>, vector<16x15xf32> -> vector<16x15xf32>
    %c0_118 = arith.constant 0 : index
    %c0_119 = arith.constant 0 : index
    %197 = vector.load %arg17[%c0_118, %c0_119] : memref<16x1xf32, #tpu.memory_space<vmem>>, vector<16x1xf32>
    %198 = vector.broadcast %197 : vector<16x1xf32> to vector<16x15xf32>
    %199 = arith.addf %196, %198 : vector<16x15xf32>
    %c0_120 = arith.constant 0 : index
    %c0_121 = arith.constant 0 : index
    %200 = vector.load %arg18[%c0_120, %c0_121] : memref<128x128xf32, #tpu.memory_space<vmem>>, vector<128x128xf32>
    %cst_122 = arith.constant dense<0.000000e+00> : vector<128x15xf32>
    %201 = tpu.matmul %200, %189, %cst_122 {dimension_numbers = #tpu.dot_dimension_numbers<[1], [0], [0], [1], [0, 0, 1, 1], [], []>} : vector<128x128xf32>, vector<128x15xf32>, vector<128x15xf32> -> vector<128x15xf32>
    %c0_123 = arith.constant 0 : index
    %c0_124 = arith.constant 0 : index
    %202 = vector.load %arg19[%c0_123, %c0_124] : memref<128x1xf32, #tpu.memory_space<vmem>>, vector<128x1xf32>
    %203 = vector.broadcast %202 : vector<128x1xf32> to vector<128x15xf32>
    %204 = arith.addf %201, %203 : vector<128x15xf32>
    %cst_125 = arith.constant dense<0.000000e+00> : vector<15x15xf32>
    %205 = tpu.matmul %194, %199, %cst_125 {dimension_numbers = #tpu.dot_dimension_numbers<[0], [0], [1], [1], [0, 1, 1, 1], [], []>} : vector<16x15xf32>, vector<16x15xf32>, vector<15x15xf32> -> vector<15x15xf32>
    %cst_126 = arith.constant dense<0xFF800000> : vector<15xf32>
    %206 = vector.multi_reduction <maximumf>, %205, %cst_126 [1] : vector<15x15xf32> to vector<15xf32>
    %207 = vector.shape_cast %206 : vector<15xf32> to vector<15x1xf32>
    %208 = vector.broadcast %207 : vector<15x1xf32> to vector<15x15xf32>
    %209 = arith.subf %205, %208 : vector<15x15xf32>
    %210 = math.exp %209 : vector<15x15xf32>
    %cst_127 = arith.constant dense<0.000000e+00> : vector<15xf32>
    %211 = vector.multi_reduction <add>, %210, %cst_127 [1] : vector<15x15xf32> to vector<15xf32>
    %212 = vector.shape_cast %211 : vector<15xf32> to vector<15x1xf32>
    %213 = tpu.reciprocal %212 {approx = true} : vector<15x1xf32> -> vector<15x1xf32>
    %214 = vector.broadcast %213 : vector<15x1xf32> to vector<15x15xf32>
    %215 = arith.mulf %210, %214 : vector<15x15xf32>
    %cst_128 = arith.constant dense<0.000000e+00> : vector<128x15xf32>
    %216 = tpu.matmul %204, %215, %cst_128 {dimension_numbers = #tpu.dot_dimension_numbers<[1], [1], [0], [0], [0, 0, 1, 0], [], []>} : vector<128x15xf32>, vector<15x15xf32>, vector<128x15xf32> -> vector<128x15xf32>
    %c0_129 = arith.constant 0 : index
    %c0_130 = arith.constant 0 : index
    %217 = vector.load %arg20[%c0_129, %c0_130] : memref<1x1xf32, #tpu.memory_space<vmem>>, vector<1x1xf32>
    %218 = vector.broadcast %217 : vector<1x1xf32> to vector<128x15xf32>
    %219 = arith.mulf %218, %216 : vector<128x15xf32>
    %220 = arith.addf %219, %189 : vector<128x15xf32>
    %c0_131 = arith.constant 0 : index
    %c0_132 = arith.constant 0 : index
    %221 = vector.load %arg22[%c0_131, %c0_132] : memref<64x1xf32, #tpu.memory_space<vmem>>, vector<64x1xf32>
    %222 = vector.extract_strided_slice %220 {offsets = [0, 0], sizes = [128, 5], strides = [1, 1]} : vector<128x15xf32> to vector<128x5xf32>
    %cst_133 = arith.constant dense<0xFF800000> : vector<128xf32>
    %223 = vector.multi_reduction <maximumf>, %222, %cst_133 [1] : vector<128x5xf32> to vector<128xf32>
    %224 = vector.shape_cast %223 : vector<128xf32> to vector<128x1xf32>
    %c0_134 = arith.constant 0 : index
    %c0_135 = arith.constant 0 : index
    %c0_136 = arith.constant 0 : index
    %225 = vector.load %arg21[%c0_134, %c0_135, %c0_136] : memref<3x64x128xf32, #tpu.memory_space<vmem>>, vector<1x64x128xf32>
    %226 = vector.shape_cast %225 : vector<1x64x128xf32> to vector<64x128xf32>
    %cst_137 = arith.constant dense<0.000000e+00> : vector<64x1xf32>
    %227 = tpu.matmul %226, %224, %cst_137 {dimension_numbers = #tpu.dot_dimension_numbers<[1], [0], [0], [1], [0, 0, 1, 1], [], []>} : vector<64x128xf32>, vector<128x1xf32>, vector<64x1xf32> -> vector<64x1xf32>
    %228 = arith.addf %221, %227 : vector<64x1xf32>
    %229 = vector.extract_strided_slice %220 {offsets = [0, 5], sizes = [128, 5], strides = [1, 1]} : vector<128x15xf32> to vector<128x5xf32>
    %cst_138 = arith.constant dense<0xFF800000> : vector<128xf32>
    %230 = vector.multi_reduction <maximumf>, %229, %cst_138 [1] : vector<128x5xf32> to vector<128xf32>
    %231 = vector.shape_cast %230 : vector<128xf32> to vector<128x1xf32>
    %c1_139 = arith.constant 1 : index
    %c0_140 = arith.constant 0 : index
    %c0_141 = arith.constant 0 : index
    %232 = vector.load %arg21[%c1_139, %c0_140, %c0_141] : memref<3x64x128xf32, #tpu.memory_space<vmem>>, vector<1x64x128xf32>
    %233 = vector.shape_cast %232 : vector<1x64x128xf32> to vector<64x128xf32>
    %cst_142 = arith.constant dense<0.000000e+00> : vector<64x1xf32>
    %234 = tpu.matmul %233, %231, %cst_142 {dimension_numbers = #tpu.dot_dimension_numbers<[1], [0], [0], [1], [0, 0, 1, 1], [], []>} : vector<64x128xf32>, vector<128x1xf32>, vector<64x1xf32> -> vector<64x1xf32>
    %235 = arith.addf %228, %234 : vector<64x1xf32>
    %236 = vector.extract_strided_slice %220 {offsets = [0, 10], sizes = [128, 5], strides = [1, 1]} : vector<128x15xf32> to vector<128x5xf32>
    %cst_143 = arith.constant dense<0xFF800000> : vector<128xf32>
    %237 = vector.multi_reduction <maximumf>, %236, %cst_143 [1] : vector<128x5xf32> to vector<128xf32>
    %238 = vector.shape_cast %237 : vector<128xf32> to vector<128x1xf32>
    %c2_144 = arith.constant 2 : index
    %c0_145 = arith.constant 0 : index
    %c0_146 = arith.constant 0 : index
    %239 = vector.load %arg21[%c2_144, %c0_145, %c0_146] : memref<3x64x128xf32, #tpu.memory_space<vmem>>, vector<1x64x128xf32>
    %240 = vector.shape_cast %239 : vector<1x64x128xf32> to vector<64x128xf32>
    %cst_147 = arith.constant dense<0.000000e+00> : vector<64x1xf32>
    %241 = tpu.matmul %240, %238, %cst_147 {dimension_numbers = #tpu.dot_dimension_numbers<[1], [0], [0], [1], [0, 0, 1, 1], [], []>} : vector<64x128xf32>, vector<128x1xf32>, vector<64x1xf32> -> vector<64x1xf32>
    %242 = arith.addf %235, %241 : vector<64x1xf32>
    %cst_148 = arith.constant 0.000000e+00 : f32
    %243 = vector.broadcast %cst_148 : f32 to vector<64x1xf32>
    %244 = arith.cmpf oge, %242, %243 : vector<64x1xf32>
    %cst_149 = arith.constant 0.00999999977 : f32
    %245 = vector.broadcast %cst_149 : f32 to vector<64x1xf32>
    %246 = arith.mulf %245, %242 : vector<64x1xf32>
    %247 = arith.select %244, %242, %246 : vector<64x1xi1>, vector<64x1xf32>
    %c0_150 = arith.constant 0 : index
    %c0_151 = arith.constant 0 : index
    %248 = vector.load %arg23[%c0_150, %c0_151] : memref<1x64xf32, #tpu.memory_space<vmem>>, vector<1x64xf32>
    %cst_152 = arith.constant dense<0.000000e+00> : vector<1x1xf32>
    %249 = tpu.matmul %248, %247, %cst_152 {dimension_numbers = #tpu.dot_dimension_numbers<[1], [0], [0], [1], [0, 0, 1, 1], [], []>} : vector<1x64xf32>, vector<64x1xf32>, vector<1x1xf32> -> vector<1x1xf32>
    %c0_153 = arith.constant 0 : index
    %c0_154 = arith.constant 0 : index
    %250 = vector.load %arg24[%c0_153, %c0_154] : memref<1x1xf32, #tpu.memory_space<vmem>>, vector<1x1xf32>
    %251 = arith.addf %249, %250 : vector<1x1xf32>
    %cst_155 = arith.constant 0.000000e+00 : f32
    %252 = vector.broadcast %cst_155 : f32 to vector<1x1xf32>
    %253 = arith.subf %252, %251 : vector<1x1xf32>
    %254 = math.exp %253 : vector<1x1xf32>
    %cst_156 = arith.constant 1.000000e+00 : f32
    %255 = vector.broadcast %cst_156 : f32 to vector<1x1xf32>
    %256 = arith.addf %255, %254 : vector<1x1xf32>
    %cst_157 = arith.constant 1.000000e+00 : f32
    %257 = vector.broadcast %cst_157 : f32 to vector<1x1xf32>
    %258 = arith.divf %257, %256 : vector<1x1xf32>
    %c0_158 = arith.constant 0 : index
    %c0_159 = arith.constant 0 : index
    %c0_160 = arith.constant 0 : index
    %259 = vector.load %arg25[%c0_158, %c0_159, %c0_160] : memref<1x1x1xf32, #tpu.memory_space<vmem>>, vector<1x1x1xf32>
    %260 = vector.shape_cast %259 : vector<1x1x1xf32> to vector<1x1xf32>
    %261 = vector.shape_cast %258 : vector<1x1xf32> to vector<1x1x1xf32>
    tpu.vector_store %arg25[%c0_158, %c0_159, %c0_160], %261 {strides = array<i32>} : memref<1x1x1xf32, #tpu.memory_space<vmem>>, vector<1x1x1xf32>,
    return
  }
  func.func @transform_0(%arg0: i32) -> (i32, i32, i32) {
    %c0_i32 = arith.constant 0 : i32
    %c0_i32_0 = arith.constant 0 : i32
    %c0_i32_1 = arith.constant 0 : i32
    return %arg0, %c0_i32, %c0_i32_0 : i32, i32, i32
  }
  func.func @transform_1(%arg0: i32) -> (i32, i32) {
    %c0_i32 = arith.constant 0 : i32
    %c0_i32_0 = arith.constant 0 : i32
    %c0_i32_1 = arith.constant 0 : i32
    return %c0_i32, %c0_i32_0 : i32, i32
  }
  func.func @transform_2(%arg0: i32) -> (i32, i32, i32) {
    %c0_i32 = arith.constant 0 : i32
    %c0_i32_0 = arith.constant 0 : i32
    %c0_i32_1 = arith.constant 0 : i32
    %c0_i32_2 = arith.constant 0 : i32
    return %c0_i32, %c0_i32_0, %c0_i32_1 : i32, i32, i32
  }
  func.func @transform_3(%arg0: i32) -> (i32, i32) {
    %c0_i32 = arith.constant 0 : i32
    %c0_i32_0 = arith.constant 0 : i32
    %c0_i32_1 = arith.constant 0 : i32
    return %c0_i32, %c0_i32_0 : i32, i32
  }
  func.func @transform_4(%arg0: i32) -> (i32, i32) {
    %c0_i32 = arith.constant 0 : i32
    %c0_i32_0 = arith.constant 0 : i32
    %c0_i32_1 = arith.constant 0 : i32
    return %c0_i32, %c0_i32_0 : i32, i32
  }
  func.func @transform_5(%arg0: i32) -> (i32, i32, i32) {
    %c0_i32 = arith.constant 0 : i32
    %c0_i32_0 = arith.constant 0 : i32
    %c0_i32_1 = arith.constant 0 : i32
    %c0_i32_2 = arith.constant 0 : i32
    return %c0_i32, %c0_i32_0, %c0_i32_1 : i32, i32, i32
  }
  func.func @transform_6(%arg0: i32) -> (i32, i32) {
    %c0_i32 = arith.constant 0 : i32
    %c0_i32_0 = arith.constant 0 : i32
    %c0_i32_1 = arith.constant 0 : i32
    return %c0_i32, %c0_i32_0 : i32, i32
  }
  func.func @transform_7(%arg0: i32) -> (i32, i32) {
    %c0_i32 = arith.constant 0 : i32
    %c0_i32_0 = arith.constant 0 : i32
    %c0_i32_1 = arith.constant 0 : i32
    return %c0_i32, %c0_i32_0 : i32, i32
  }
  func.func @transform_8(%arg0: i32) -> (i32, i32, i32) {
    %c0_i32 = arith.constant 0 : i32
    %c0_i32_0 = arith.constant 0 : i32
    %c0_i32_1 = arith.constant 0 : i32
    %c0_i32_2 = arith.constant 0 : i32
    return %c0_i32, %c0_i32_0, %c0_i32_1 : i32, i32, i32
  }
  func.func @transform_9(%arg0: i32) -> (i32, i32) {
    %c0_i32 = arith.constant 0 : i32
    %c0_i32_0 = arith.constant 0 : i32
    %c0_i32_1 = arith.constant 0 : i32
    return %c0_i32, %c0_i32_0 : i32, i32
  }
  func.func @transform_10(%arg0: i32) -> (i32, i32) {
    %c0_i32 = arith.constant 0 : i32
    %c0_i32_0 = arith.constant 0 : i32
    %c0_i32_1 = arith.constant 0 : i32
    return %c0_i32, %c0_i32_0 : i32, i32
  }
  func.func @transform_11(%arg0: i32) -> (i32, i32, i32) {
    %c0_i32 = arith.constant 0 : i32
    %c0_i32_0 = arith.constant 0 : i32
    %c0_i32_1 = arith.constant 0 : i32
    %c0_i32_2 = arith.constant 0 : i32
    return %c0_i32, %c0_i32_0, %c0_i32_1 : i32, i32, i32
  }
  func.func @transform_12(%arg0: i32) -> (i32, i32) {
    %c0_i32 = arith.constant 0 : i32
    %c0_i32_0 = arith.constant 0 : i32
    %c0_i32_1 = arith.constant 0 : i32
    return %c0_i32, %c0_i32_0 : i32, i32
  }
  func.func @transform_13(%arg0: i32) -> (i32, i32) {
    %c0_i32 = arith.constant 0 : i32
    %c0_i32_0 = arith.constant 0 : i32
    %c0_i32_1 = arith.constant 0 : i32
    return %c0_i32, %c0_i32_0 : i32, i32
  }
  func.func @transform_14(%arg0: i32) -> (i32, i32) {
    %c0_i32 = arith.constant 0 : i32
    %c0_i32_0 = arith.constant 0 : i32
    %c0_i32_1 = arith.constant 0 : i32
    return %c0_i32, %c0_i32_0 : i32, i32
  }
  func.func @transform_15(%arg0: i32) -> (i32, i32) {
    %c0_i32 = arith.constant 0 : i32
    %c0_i32_0 = arith.constant 0 : i32
    %c0_i32_1 = arith.constant 0 : i32
    return %c0_i32, %c0_i32_0 : i32, i32
  }
  func.func @transform_16(%arg0: i32) -> (i32, i32) {
    %c0_i32 = arith.constant 0 : i32
    %c0_i32_0 = arith.constant 0 : i32
    %c0_i32_1 = arith.constant 0 : i32
    return %c0_i32, %c0_i32_0 : i32, i32
  }
  func.func @transform_17(%arg0: i32) -> (i32, i32) {
    %c0_i32 = arith.constant 0 : i32
    %c0_i32_0 = arith.constant 0 : i32
    %c0_i32_1 = arith.constant 0 : i32
    return %c0_i32, %c0_i32_0 : i32, i32
  }
  func.func @transform_18(%arg0: i32) -> (i32, i32) {
    %c0_i32 = arith.constant 0 : i32
    %c0_i32_0 = arith.constant 0 : i32
    %c0_i32_1 = arith.constant 0 : i32
    return %c0_i32, %c0_i32_0 : i32, i32
  }
  func.func @transform_19(%arg0: i32) -> (i32, i32) {
    %c0_i32 = arith.constant 0 : i32
    %c0_i32_0 = arith.constant 0 : i32
    %c0_i32_1 = arith.constant 0 : i32
    return %c0_i32, %c0_i32_0 : i32, i32
  }
  func.func @transform_20(%arg0: i32) -> (i32, i32, i32) {
    %c0_i32 = arith.constant 0 : i32
    %c0_i32_0 = arith.constant 0 : i32
    %c0_i32_1 = arith.constant 0 : i32
    %c0_i32_2 = arith.constant 0 : i32
    return %c0_i32, %c0_i32_0, %c0_i32_1 : i32, i32, i32
  }
  func.func @transform_21(%arg0: i32) -> (i32, i32) {
    %c0_i32 = arith.constant 0 : i32
    %c0_i32_0 = arith.constant 0 : i32
    %c0_i32_1 = arith.constant 0 : i32
    return %c0_i32, %c0_i32_0 : i32, i32
  }
  func.func @transform_22(%arg0: i32) -> (i32, i32) {
    %c0_i32 = arith.constant 0 : i32
    %c0_i32_0 = arith.constant 0 : i32
    %c0_i32_1 = arith.constant 0 : i32
    return %c0_i32, %c0_i32_0 : i32, i32
  }
  func.func @transform_23(%arg0: i32) -> (i32, i32) {
    %c0_i32 = arith.constant 0 : i32
    %c0_i32_0 = arith.constant 0 : i32
    %c0_i32_1 = arith.constant 0 : i32
    return %c0_i32, %c0_i32_0 : i32, i32
  }
  func.func @transform_24(%arg0: i32) -> (i32, i32, i32) {
    %c0_i32 = arith.constant 0 : i32
    %c0_i32_0 = arith.constant 0 : i32
    %c0_i32_1 = arith.constant 0 : i32
    return %arg0, %c0_i32, %c0_i32_0 : i32, i32, i32
  }
}

</mosaic_0001>

<bundles_post_ra>
// kernel: discriminator_forward.1
= control target key start
LH: loop header
LB: loop body
LE: loop exit
PB: predicated region body
PF: predicated region fallthrough
CT: control target
= control target key end

     0   :  { %s11327_s0 = inlined_call_operand.vmem [shape: f32[2,19,240], index: 0, kind: input, shape index: {}]   ;;  %s11328_s1 = inlined_call_operand.vmem [shape: f32[240,480], index: 1, kind: input, shape index: {}]   ;;  %s11329_s2 = inlined_call_operand.vmem [shape: f32[4,32,19], index: 2, kind: input, shape index: {}]   ;;  %s11330_s3 = inlined_call_operand.vmem [shape: f32[32,1], index: 3, kind: input, shape index: {}]   ;;  %s11331_s4 = inlined_call_operand.vmem [shape: f32[120,240], index: 4, kind: input, shape index: {}]   ;;  %s11332_s5 = inlined_call_operand.vmem [shape: f32[4,64,32], index: 5, kind: input, shape index: {}]   ;;  %s11333_s6 = inlined_call_operand.vmem [shape: f32[64,1], index: 6, kind: input, shape index: {}]   ;;  %s11334_s7 = inlined_call_operand.vmem [shape: f32[60,120], index: 7, kind: input, shape index: {}]   ;;  %s11335_s8 = inlined_call_operand.vmem [shape: f32[4,64,64], index: 8, kind: input, shape index: {}]   ;;  %s11336_s9 = inlined_call_operand.vmem [shape: f32[64,1], index: 9, kind: input, shape index: {}]   ;;  %s11337_s10 = inlined_call_operand.vmem [shape: f32[30,60], index: 10, kind: input, shape index: {}]   ;;  %s11338_s11 = inlined_call_operand.vmem [shape: f32[4,128,64], index: 11, kind: input, shape index: {}]   ;;  %s11339_s12 = inlined_call_operand.vmem [shape: f32[128,1], index: 12, kind: input, shape index: {}]   ;;  %s11340_s13 = inlined_call_operand.vmem [shape: f32[16,128], index: 13, kind: input, shape index: {}]   ;;  %s11341_s14 = inlined_call_operand.vmem [shape: f32[16,1], index: 14, kind: input, shape index: {}]   ;;  %s11342_s15 = inlined_call_operand.vmem [shape: f32[16,128], index: 15, kind: input, shape index: {}]   ;;  %s11343_s16 = inlined_call_operand.vmem [shape: f32[16,1], index: 16, kind: input, shape index: {}]   ;;  %s11344_s17 = inlined_call_operand.vmem [shape: f32[128,128], index: 17, kind: input, shape index: {}]   ;;  %s11345_s18 = inlined_call_operand.vmem [shape: f32[128,1], index: 18, kind: input, shape index: {}]   ;;  %s11346_s19 = inlined_call_operand.<no memory space> [shape: f32[1,1], index: 19, kind: input, shape index: {}]   ;;  %s11347_s20 = inlined_call_operand.vmem [shape: f32[3,64,128], index: 20, kind: input, shape index: {}]   ;;  %s11348_s21 = inlined_call_operand.vmem [shape: f32[64,1], index: 21, kind: input, shape index: {}]   ;;  %s11349_s22 = inlined_call_operand.vmem [shape: f32[1,64], index: 22, kind: input, shape index: {}]   ;;  %s11350_s24 = inlined_call_operand.vmem [shape: f32[2,1,1], index: 24, kind: output, shape index: {}]   ;;  %s11351_s23 = inlined_call_operand.<no memory space> [shape: f32[1,1], index: 23, kind: input, shape index: {}]  }
   0x1   :  { %11370 = sst [smem:[#allocation4_spill]] %s11327_s0  ;;  %v29_v0 = vstv %s11346_s19  ;;  %v31_v1 = vstv %s11351_s23 }
   0x2   :  { %11371 = sst [smem:[#allocation5_spill]] %s11328_s1  ;;  %30 = vst [vmem:[#allocation2] sm:$0x1] %v29_v0  ;;  %32 = vst [vmem:[#allocation3] sm:$0x1] %v31_v1 }
   0x3   :  { %11372 = sst [smem:[#allocation6_spill]] %s11329_s2 }
   0x4   :  { %11373 = sst [smem:[#allocation7_spill]] %s11330_s3 }
   0x5   :  { %11374 = sst [smem:[#allocation8_spill]] %s11331_s4 }
   0x6   :  { %11375 = sst [smem:[#allocation9_spill]] %s11332_s5 }
   0x7   :  { %11376 = sst [smem:[#allocation10_spill]] %s11333_s6  ;;  %s9160_s6 = smov 0  }
   0x8   :  { %11377 = sst [smem:[#allocation11_spill]] %s11334_s7 }
   0x9   :  { %11378 = sst [smem:[#allocation12_spill]] %s11335_s8 }
   0xa LB: > { %s6485_s2 = sadd.s32 4294967295, %s9013_s6   ;;  %p6489_p0 = scmp.ge.s32.totalorder %s9013_s6, 1  ;;  %s9013_s6 = sphi %s9160_s6, %s38_s6  }
   0xb   : > { %p666_p1 = scmp.lt.s32.totalorder %s9013_s6, 3 }
   0xd   : > { %p667_p2 = pnand %p6489_p0, %p666_p1 }
   0xe   : > { %s11379_s23 = sld [smem:[#allocation5_spill]] (!%p667_p2)  ;;  %p9359_p3 = scmp.lt.s32.totalorder (!%p667_p2), %s6485_s2, 1  ;;  %vm864_vm0 = vcmask (!%p667_p2), 916480   ;;  %vm1073_vm1 = vcmask (!%p667_p2), 154624   ;;  %vm1067_vm2 = vcmask (!%p667_p2), 64512   ;;  %vm1086_vm3 = vcmask (!%p667_p2), 1042432  }
   0xf   : > { %670 = sbr.rel (%p667_p2) target bundleno = 5613 (0x15ed), region = 116  ;;  %s11381_s19 = sld [smem:[#allocation4_spill]] (!%p667_p2)  ;;  %vm1293_vm4 = vcmask (!%p667_p2), 130048   ;;  %vm1422_vm5 = vcmask (!%p667_p2), 195584   ;;  %vm1559_vm6 = vcmask (!%p667_p2), 982016   ;;  %vm1789_vm11 = vcmask (!%p667_p2), 261120  }
  0x10   : > { %s11360_s29 = smov (!%p667_p2), 8   ;;  %s11382_s30 = sld [smem:[#allocation6_spill]] (!%p667_p2)  ;;  %vm2436_vm12 = vcmask (!%p667_p2), 490496   ;;  %vm2598_vm13 = vcmask (!%p667_p2), 1043456   ;;  %vm9022_vm14 = vmmov (!%p667_p2), 1  }
  0x11   : > { %s9017_s3 = smov (!%p667_p2), 24   ;;  %s11384_s0 = sld [smem:[#allocation8_spill]] (!%p667_p2)  ;;  %vm8219_vm15 = vmpackc.low (!%p667_p2), %vm2598_vm13, %vm9022_vm14 }
  0x12   : > { %s11362_s8 = smov (!%p667_p2), 68   ;;  %s11385_s5 = sld [smem:[#allocation9_spill]] (!%p667_p2) }
  0x13   : > { %s9021_s26 = smov (!%p667_p2), 76   ;;  %s11387_s7 = sld [smem:[#allocation10_spill]] (!%p667_p2) }
  0x14   : > { %v745_v2 = vld [vmem:[%s11379_s23 + $0x8] sm:$0xff] (!%p667_p2)  ;;  %v744_v4 = vld [vmem:[%s11379_s23] sm:$0xff] (!%p667_p2)  ;;  %v747_v7 = vld [vmem:[%s11379_s23 + $0x18] sm:$0xff] (!%p667_p2)  ;;  %s11366_s1 = smov (!%p667_p2), 98  }
  0x15   : > { %v749_v3 = vld [vmem:[%s11379_s23 + $0x28] sm:$0xff] (!%p667_p2)  ;;  %v748_v6 = vld [vmem:[%s11379_s23 + $0x20] sm:$0xff] (!%p667_p2)  ;;  %v751_v8 = vld [vmem:[%s11379_s23 + $0x38] sm:$0xff] (!%p667_p2) }
  0x16   : > { %v8010_v5 = vpack.c.bf16 %v749_v3, %v745_v2  ;;  %v8012_v9 = vpack.c.bf16 %v748_v6, %v744_v4  ;;  %v8070_v10 = vpack.c.bf16 %v751_v8, %v747_v7  ;;  %v746_v11 = vld [vmem:[%s11379_s23 + $0x10] sm:$0xff]  ;;  %v753_v13 = vld [vmem:[%s11379_s23 + $0x48] sm:$0xff]  ;;  %v752_v16 = vld [vmem:[%s11379_s23 + $0x40] sm:$0xff]  ;;  %s11393_s2 = smov (!%p9359_p3, %s6485_s2), 1 }
  0x17   : > { %v750_v12 = vld [vmem:[%s11379_s23 + $0x30] sm:$0xff]  ;;  %v757_v15 = vld [vmem:[%s11379_s23 + $0x68] sm:$0xff]  ;;  %v756_v17 = vld [vmem:[%s11379_s23 + $0x60] sm:$0xff]  ;;  %s8708_s25 = smul.u32 48, %s11393_s2  ;;  %s737_s4 = scalar_lea.vmem %s11350_s24, %s11393_s2 }
  0x18   : > { %8011 = vmatprep.subr.bf16.mxu0 %v8010_v5  ;;  %v8072_v14 = vpack.c.bf16 %v750_v12, %v746_v11  ;;  %8071 = vmatprep.subr.bf16.mxu1 %v8070_v10  ;;  %v8014_v18 = vpack.c.bf16 %v757_v15, %v753_v13  ;;  %v8016_v19 = vpack.c.bf16 %v756_v17, %v752_v16  ;;  %v755_v20 = vld [vmem:[%s11379_s23 + $0x58] sm:$0xff]  ;;  %v754_v22 = vld [vmem:[%s11379_s23 + $0x50] sm:$0xff]  ;;  %v761_v25 = vld [vmem:[%s11379_s23 + $0x88] sm:$0xff] }
  0x19   : > { %8013 = vmatpush1.bf16.msra.mxu0 %v8012_v9  ;;  %v759_v21 = vld [vmem:[%s11379_s23 + $0x78] sm:$0xff]  ;;  %v758_v24 = vld [vmem:[%s11379_s23 + $0x70] sm:$0xff]  ;;  %v765_v26 = vld [vmem:[%s11379_s23 + $0xa8] sm:$0xff]  ;;  %s9445_s27 = scalar_lea.vmem %s11381_s19, %s8708_s25  ;;  %s11383_s25 = sld [smem:[#allocation7_spill]] }
  0x1a   : > { %8073 = vmatpush1.bf16.msra.mxu1 %v8072_v14  ;;  %v8074_v23 = vpack.c.bf16 %v759_v21, %v755_v20  ;;  %8015 = vmatprep.subr.bf16.mxu0 %v8014_v18  ;;  %v8076_v27 = vpack.c.bf16 %v758_v24, %v754_v22  ;;  %v8018_v28 = vpack.c.bf16 %v765_v26, %v761_v25  ;;  %v760_v29 = vld [vmem:[%s11379_s23 + $0x80] sm:$0xff]  ;;  %v763_v31 = vld [vmem:[%s11379_s23 + $0x98] sm:$0xff]  ;;  %v762_v33 = vld [vmem:[%s11379_s23 + $0x90] sm:$0xff] }
  0x1b   : > { %v764_v30 = vld [vmem:[%s11379_s23 + $0xa0] sm:$0xff]  ;;  %v767_v32 = vld [vmem:[%s11379_s23 + $0xb8] sm:$0xff]  ;;  %v766_v34 = vld [vmem:[%s11379_s23 + $0xb0] sm:$0xff] }
  0x1c   : > { %8075 = vmatprep.subr.bf16.mxu1 %v8074_v23  ;;  %v8020_v35 = vpack.c.bf16 %v764_v30, %v760_v29  ;;  %v8078_v36 = vpack.c.bf16 %v767_v32, %v763_v31  ;;  %v769_v37 = vld [vmem:[%s11379_s23 + $0xc8] sm:$0xff]  ;;  %v768_v39 = vld [vmem:[%s11379_s23 + $0xc0] sm:$0xff]  ;;  %v8080_v40 = vpack.c.bf16 %v766_v34, %v762_v33  ;;  %v771_v43 = vld [vmem:[%s11379_s23 + $0xd8] sm:$0xff] }
  0x1d   : > { %8017 = vmatpush1.bf16.msra.mxu0 %v8016_v19  ;;  %v773_v38 = vld [vmem:[%s11379_s23 + $0xe8] sm:$0xff]  ;;  %v772_v42 = vld [vmem:[%s11379_s23 + $0xe0] sm:$0xff]  ;;  %v775_v44 = vld [vmem:[%s11379_s23 + $0xf8] sm:$0xff] }
  0x1e   : > { %8077 = vmatpush1.bf16.msra.mxu1 %v8076_v27  ;;  %8019 = vmatprep.subr.bf16.mxu0 %v8018_v28  ;;  %v8022_v41 = vpack.c.bf16 %v773_v38, %v769_v37  ;;  %v8082_v45 = vpack.c.bf16 %v775_v44, %v771_v43  ;;  %v770_v46 = vld [vmem:[%s11379_s23 + $0xd0] sm:$0xff]  ;;  %v777_v48 = vld [vmem:[%s11379_s23 + $0x108] sm:$0xff]  ;;  %v8024_v50 = vpack.c.bf16 %v772_v42, %v768_v39  ;;  %v779_v51 = vld [vmem:[%s11379_s23 + $0x118] sm:$0xff] }
  0x1f   : > { %8079 = vmatprep.subr.bf16.mxu1 %v8078_v36  ;;  %v774_v47 = vld [vmem:[%s11379_s23 + $0xf0] sm:$0xff]  ;;  %v781_v49 = vld [vmem:[%s11379_s23 + $0x128] sm:$0xff]  ;;  %v783_v52 = vld [vmem:[%s11379_s23 + $0x138] sm:$0xff] }
  0x20   : > { %v8084_v53 = vpack.c.bf16 %v774_v47, %v770_v46  ;;  %v8026_v54 = vpack.c.bf16 %v781_v49, %v777_v48  ;;  %v776_v55 = vld [vmem:[%s11379_s23 + $0x100] sm:$0xff]  ;;  %v778_v57 = vld [vmem:[%s11379_s23 + $0x110] sm:$0xff]  ;;  %v8086_v58 = vpack.c.bf16 %v783_v52, %v779_v51  ;;  %v785_v60 = vld [vmem:[%s11379_s23 + $0x148] sm:$0xff] }
  0x21   : > { %8021 = vmatpush1.bf16.msra.mxu0 %v8020_v35  ;;  %v780_v56 = vld [vmem:[%s11379_s23 + $0x120] sm:$0xff]  ;;  %v782_v59 = vld [vmem:[%s11379_s23 + $0x130] sm:$0xff]  ;;  %v789_v61 = vld [vmem:[%s11379_s23 + $0x168] sm:$0xff] }
  0x22   : > { %8081 = vmatpush1.bf16.msra.mxu1 %v8080_v40  ;;  %8023 = vmatprep.subr.bf16.mxu0 %v8022_v41  ;;  %v787_v62 = vld [vmem:[%s11379_s23 + $0x158] sm:$0xff]  ;;  %v8028_v0 = vpack.c.bf16 %v780_v56, %v776_v55  ;;  %v8088_v1 = vpack.c.bf16 %v782_v59, %v778_v57  ;;  %v8030_v2 = vpack.c.bf16 %v789_v61, %v785_v60  ;;  %v784_v3 = vld [vmem:[%s11379_s23 + $0x140] sm:$0xff]  ;;  %v786_v5 = vld [vmem:[%s11379_s23 + $0x150] sm:$0xff] }
  0x23   : > { %8083 = vmatprep.subr.bf16.mxu1 %v8082_v45  ;;  %v791_v63 = vld [vmem:[%s11379_s23 + $0x178] sm:$0xff]  ;;  %v788_v4 = vld [vmem:[%s11379_s23 + $0x160] sm:$0xff]  ;;  %v790_v7 = vld [vmem:[%s11379_s23 + $0x170] sm:$0xff] }
  0x24   : > { %v8090_v6 = vpack.c.bf16 %v791_v63, %v787_v62  ;;  %v793_v8 = vld [vmem:[%s11379_s23 + $0x188] sm:$0xff]  ;;  %v795_v10 = vld [vmem:[%s11379_s23 + $0x198] sm:$0xff]  ;;  %v8032_v12 = vpack.c.bf16 %v788_v4, %v784_v3  ;;  %v8092_v13 = vpack.c.bf16 %v790_v7, %v786_v5  ;;  %v792_v15 = vld [vmem:[%s11379_s23 + $0x180] sm:$0xff] }
  0x25   : > { %8025 = vmatpush1.bf16.msra.mxu0 %v8024_v50  ;;  %v797_v9 = vld [vmem:[%s11379_s23 + $0x1a8] sm:$0xff]  ;;  %v799_v11 = vld [vmem:[%s11379_s23 + $0x1b8] sm:$0xff]  ;;  %v796_v16 = vld [vmem:[%s11379_s23 + $0x1a0] sm:$0xff] }
  0x26   : > { %8085 = vmatpush1.bf16.msra.mxu1 %v8084_v53  ;;  %8027 = vmatprep.subr.bf16.mxu0 %v8026_v54  ;;  %v8034_v14 = vpack.c.bf16 %v797_v9, %v793_v8  ;;  %v794_v17 = vld [vmem:[%s11379_s23 + $0x190] sm:$0xff]  ;;  %v8094_v18 = vpack.c.bf16 %v799_v11, %v795_v10  ;;  %v801_v20 = vld [vmem:[%s11379_s23 + $0x1c8] sm:$0xff]  ;;  %v803_v22 = vld [vmem:[%s11379_s23 + $0x1d8] sm:$0xff]  ;;  %v8036_v24 = vpack.c.bf16 %v796_v16, %v792_v15 }
  0x27   : > { %8087 = vmatprep.subr.bf16.mxu1 %v8086_v58  ;;  %v798_v19 = vld [vmem:[%s11379_s23 + $0x1b0] sm:$0xff]  ;;  %v805_v21 = vld [vmem:[%s11379_s23 + $0x1e8] sm:$0xff]  ;;  %v807_v23 = vld [vmem:[%s11379_s23 + $0x1f8] sm:$0xff] }
  0x28   : > { %v8096_v25 = vpack.c.bf16 %v798_v19, %v794_v17  ;;  %v8038_v26 = vpack.c.bf16 %v805_v21, %v801_v20  ;;  %v800_v27 = vld [vmem:[%s11379_s23 + $0x1c0] sm:$0xff]  ;;  %v802_v29 = vld [vmem:[%s11379_s23 + $0x1d0] sm:$0xff]  ;;  %v8098_v30 = vpack.c.bf16 %v807_v23, %v803_v22  ;;  %v809_v32 = vld [vmem:[%s11379_s23 + $0x208] sm:$0xff] }
  0x29   : > { %8029 = vmatpush1.bf16.msra.mxu0 %v8028_v0  ;;  %v804_v28 = vld [vmem:[%s11379_s23 + $0x1e0] sm:$0xff]  ;;  %v806_v31 = vld [vmem:[%s11379_s23 + $0x1f0] sm:$0xff]  ;;  %v813_v33 = vld [vmem:[%s11379_s23 + $0x228] sm:$0xff] }
  0x2a   : > { %8089 = vmatpush1.bf16.msra.mxu1 %v8088_v1  ;;  %8031 = vmatprep.subr.bf16.mxu0 %v8030_v2  ;;  %v811_v34 = vld [vmem:[%s11379_s23 + $0x218] sm:$0xff]  ;;  %v8040_v36 = vpack.c.bf16 %v804_v28, %v800_v27  ;;  %v8100_v37 = vpack.c.bf16 %v806_v31, %v802_v29  ;;  %v8042_v38 = vpack.c.bf16 %v813_v33, %v809_v32  ;;  %v808_v39 = vld [vmem:[%s11379_s23 + $0x200] sm:$0xff]  ;;  %v810_v41 = vld [vmem:[%s11379_s23 + $0x210] sm:$0xff] }
  0x2b   : > { %8091 = vmatprep.subr.bf16.mxu1 %v8090_v6  ;;  %v815_v35 = vld [vmem:[%s11379_s23 + $0x238] sm:$0xff]  ;;  %v812_v40 = vld [vmem:[%s11379_s23 + $0x220] sm:$0xff]  ;;  %v814_v43 = vld [vmem:[%s11379_s23 + $0x230] sm:$0xff] }
  0x2c   : > { %v8102_v42 = vpack.c.bf16 %v815_v35, %v811_v34  ;;  %v817_v44 = vld [vmem:[%s11379_s23 + $0x248] sm:$0xff]  ;;  %v819_v46 = vld [vmem:[%s11379_s23 + $0x258] sm:$0xff]  ;;  %v8044_v48 = vpack.c.bf16 %v812_v40, %v808_v39  ;;  %v8104_v49 = vpack.c.bf16 %v814_v43, %v810_v41  ;;  %v816_v51 = vld [vmem:[%s11379_s23 + $0x240] sm:$0xff] }
  0x2d   : > { %8033 = vmatpush1.bf16.msra.mxu0 %v8032_v12  ;;  %v821_v45 = vld [vmem:[%s11379_s23 + $0x268] sm:$0xff]  ;;  %v823_v47 = vld [vmem:[%s11379_s23 + $0x278] sm:$0xff]  ;;  %v820_v52 = vld [vmem:[%s11379_s23 + $0x260] sm:$0xff] }
  0x2e   : > { %8093 = vmatpush1.bf16.msra.mxu1 %v8092_v13  ;;  %8035 = vmatprep.subr.bf16.mxu0 %v8034_v14  ;;  %v8046_v50 = vpack.c.bf16 %v821_v45, %v817_v44  ;;  %v818_v53 = vld [vmem:[%s11379_s23 + $0x250] sm:$0xff]  ;;  %v8106_v54 = vpack.c.bf16 %v823_v47, %v819_v46  ;;  %v825_v56 = vld [vmem:[%s11379_s23 + $0x288] sm:$0xff]  ;;  %v827_v58 = vld [vmem:[%s11379_s23 + $0x298] sm:$0xff]  ;;  %v8048_v60 = vpack.c.bf16 %v820_v52, %v816_v51 }
  0x2f   : > { %8095 = vmatprep.subr.bf16.mxu1 %v8094_v18  ;;  %v822_v55 = vld [vmem:[%s11379_s23 + $0x270] sm:$0xff]  ;;  %v829_v57 = vld [vmem:[%s11379_s23 + $0x2a8] sm:$0xff]  ;;  %v831_v59 = vld [vmem:[%s11379_s23 + $0x2b8] sm:$0xff] }
  0x30   : > { %v8108_v61 = vpack.c.bf16 %v822_v55, %v818_v53  ;;  %v8050_v62 = vpack.c.bf16 %v829_v57, %v825_v56  ;;  %v824_v63 = vld [vmem:[%s11379_s23 + $0x280] sm:$0xff]  ;;  %v826_v1 = vld [vmem:[%s11379_s23 + $0x290] sm:$0xff]  ;;  %v8110_v2 = vpack.c.bf16 %v831_v59, %v827_v58  ;;  %v833_v4 = vld [vmem:[%s11379_s23 + $0x2c8] sm:$0xff] }
  0x31   : > { %8037 = vmatpush1.bf16.msra.mxu0 %v8036_v24  ;;  %v828_v0 = vld [vmem:[%s11379_s23 + $0x2a0] sm:$0xff]  ;;  %v830_v3 = vld [vmem:[%s11379_s23 + $0x2b0] sm:$0xff]  ;;  %v837_v5 = vld [vmem:[%s11379_s23 + $0x2e8] sm:$0xff] }
  0x32   : > { %8097 = vmatpush1.bf16.msra.mxu1 %v8096_v25  ;;  %8039 = vmatprep.subr.bf16.mxu0 %v8038_v26  ;;  %v835_v6 = vld [vmem:[%s11379_s23 + $0x2d8] sm:$0xff]  ;;  %v8052_v8 = vpack.c.bf16 %v828_v0, %v824_v63  ;;  %v739_v9 = vld [vmem:[%s9445_s27 + $0x8] sm:$0xff]  ;;  %v8112_v10 = vpack.c.bf16 %v830_v3, %v826_v1  ;;  %v8054_v11 = vpack.c.bf16 %v837_v5, %v833_v4  ;;  %v832_v12 = vld [vmem:[%s11379_s23 + $0x2c0] sm:$0xff] }
  0x33   : > { %8099 = vmatprep.subr.bf16.mxu1 %v8098_v30  ;;  %v839_v7 = vld [vmem:[%s11379_s23 + $0x2f8] sm:$0xff]  ;;  %v836_v13 = vld [vmem:[%s11379_s23 + $0x2e0] sm:$0xff]  ;;  %v834_v14 = vld [vmem:[%s11379_s23 + $0x2d0] sm:$0xff]  ;;  %6491 = vmatprep.mubr.msk.f32.mxu0 %vm864_vm0, %v739_v9 }
  0x34   : > { %v8114_v15 = vpack.c.bf16 %v839_v7, %v835_v6  ;;  %v838_v16 = vld [vmem:[%s11379_s23 + $0x2f0] sm:$0xff]  ;;  %v841_v17 = vld [vmem:[%s11379_s23 + $0x308] sm:$0xff]  ;;  %v843_v19 = vld [vmem:[%s11379_s23 + $0x318] sm:$0xff]  ;;  %6494 = vmatprep.mubr.msk.f32.mxu1 %vm864_vm0, %v739_v9  ;;  %v8056_v21 = vpack.c.bf16 %v836_v13, %v832_v12 }
  0x35   : > { %8041 = vmatpush1.bf16.msra.mxu0 %v8040_v36  ;;  %v845_v18 = vld [vmem:[%s11379_s23 + $0x328] sm:$0xff]  ;;  %v847_v20 = vld [vmem:[%s11379_s23 + $0x338] sm:$0xff]  ;;  %v8116_v22 = vpack.c.bf16 %v838_v16, %v834_v14  ;;  %v840_v24 = vld [vmem:[%s11379_s23 + $0x300] sm:$0xff] }
  0x36   : > { %8101 = vmatpush1.bf16.msra.mxu1 %v8100_v37  ;;  %8043 = vmatprep.subr.bf16.mxu0 %v8042_v38  ;;  %v8058_v23 = vpack.c.bf16 %v845_v18, %v841_v17  ;;  %v844_v25 = vld [vmem:[%s11379_s23 + $0x320] sm:$0xff]  ;;  %v842_v26 = vld [vmem:[%s11379_s23 + $0x310] sm:$0xff]  ;;  %v8118_v27 = vpack.c.bf16 %v847_v20, %v843_v19  ;;  %v849_v29 = vld [vmem:[%s11379_s23 + $0x348] sm:$0xff]  ;;  %v9018_v18 = vmov 0  }
  0x37   : > { %8103 = vmatprep.subr.bf16.mxu1 %v8102_v42  ;;  %v846_v28 = vld [vmem:[%s11379_s23 + $0x330] sm:$0xff]  ;;  %v853_v30 = vld [vmem:[%s11379_s23 + $0x368] sm:$0xff]  ;;  %v851_v31 = vld [vmem:[%s11379_s23 + $0x358] sm:$0xff]  ;;  %v8060_v33 = vpack.c.bf16 %v844_v25, %v840_v24  ;;  %8761 = vset.pattern.permute.xlu0 %v9018_v18 }
  0x38   : > { %v855_v32 = vld [vmem:[%s11379_s23 + $0x378] sm:$0xff]  ;;  %v8120_v34 = vpack.c.bf16 %v846_v28, %v842_v26  ;;  %v8062_v35 = vpack.c.bf16 %v853_v30, %v849_v29  ;;  %v848_v36 = vld [vmem:[%s11379_s23 + $0x340] sm:$0xff]  ;;  %v850_v38 = vld [vmem:[%s11379_s23 + $0x350] sm:$0xff]  ;;  %8762 = vset.pattern.permute.xlu1 %v9018_v18 }
  0x39   : > { %8045 = vmatpush1.bf16.msra.mxu0 %v8044_v48  ;;  %v852_v37 = vld [vmem:[%s11379_s23 + $0x360] sm:$0xff]  ;;  %v8122_v39 = vpack.c.bf16 %v855_v32, %v851_v31  ;;  %v854_v40 = vld [vmem:[%s11379_s23 + $0x370] sm:$0xff]  ;;  %v857_v41 = vld [vmem:[%s11379_s23 + $0x388] sm:$0xff] }
  0x3a   : > { %8105 = vmatpush1.bf16.msra.mxu1 %v8104_v49  ;;  %8047 = vmatprep.subr.bf16.mxu0 %v8046_v50  ;;  %v861_v42 = vld [vmem:[%s11379_s23 + $0x3a8] sm:$0xff]  ;;  %v859_v43 = vld [vmem:[%s11379_s23 + $0x398] sm:$0xff]  ;;  %v8064_v45 = vpack.c.bf16 %v852_v37, %v848_v36  ;;  %v8124_v46 = vpack.c.bf16 %v854_v40, %v850_v38  ;;  %v856_v48 = vld [vmem:[%s11379_s23 + $0x380] sm:$0xff] }
  0x3b   : > { %8107 = vmatprep.subr.bf16.mxu1 %v8106_v54  ;;  %v863_v44 = vld [vmem:[%s11379_s23 + $0x3b8] sm:$0xff]  ;;  %v8066_v47 = vpack.c.bf16 %v861_v42, %v857_v41  ;;  %v860_v49 = vld [vmem:[%s11379_s23 + $0x3a0] sm:$0xff]  ;;  %v858_v51 = vld [vmem:[%s11379_s23 + $0x390] sm:$0xff] }
  0x3c   : > { %v8126_v50 = vpack.c.bf16 %v863_v44, %v859_v43  ;;  %v862_v52 = vld [vmem:[%s11379_s23 + $0x3b0] sm:$0xff]  ;;  %v8068_v53 = vpack.c.bf16 %v860_v49, %v856_v48  ;;  %v738_v55 = vld [vmem:[%s9445_s27] sm:$0xff]  ;;  %v741_v56 = vld [vmem:[%s9445_s27 + $0x18] sm:$0xff]  ;;  %s9025_s23 = smov 113  }
  0x3d   : > { %8049 = vmatpush1.bf16.msra.mxu0 %v8048_v60  ;;  %v8128_v54 = vpack.c.bf16 %v862_v52, %v858_v51  ;;  %v740_v57 = vld [vmem:[%s9445_s27 + $0x10] sm:$0xff]  ;;  %v743_v58 = vld [vmem:[%s9445_s27 + $0x28] sm:$0x7]  ;;  %v742_v59 = vld [vmem:[%s9445_s27 + $0x20] sm:$0x7]  ;;  %s9016_s27 = smov 16  }
  0x3e   : > { %8109 = vmatpush1.bf16.msra.mxu1 %v8108_v61  ;;  %8051 = vmatprep.subr.bf16.mxu0 %v8050_v62  ;;  %v6497_v4 = vld [vmem:[%s11382_s30 + $0x20] sm:$0xff]  ;;  %v1532_v17 = vld [vmem:[%s11383_s25 + $0x8] sm:$0xff]  ;;  %v1534_v19 = vld [vmem:[%s11383_s25 + $0x18] sm:$0xff] }
  0x3f   : > { %8111 = vmatprep.subr.bf16.mxu1 %v8110_v2  ;;  %v1531_v16 = vld [vmem:[%s11383_s25] sm:$0xff]  ;;  %v1533_v20 = vld [vmem:[%s11383_s25 + $0x10] sm:$0xff]  ;;  %v6500_v43 = vld [vmem:[%s11382_s30 + $0x38] sm:$0xff] }
  0x41   : > { %8053 = vmatpush1.bf16.msra.mxu0 %v8052_v8 }
  0x42   : > { %8113 = vmatpush1.bf16.msra.mxu1 %v8112_v10  ;;  %8055 = vmatprep.subr.bf16.mxu0 %v8054_v11 }
  0x43   : > { %8115 = vmatprep.subr.bf16.mxu1 %v8114_v15 }
  0x45   : > { %8057 = vmatpush1.bf16.msra.mxu0 %v8056_v21 }
  0x46   : > { %8117 = vmatpush1.bf16.msra.mxu1 %v8116_v22  ;;  %8059 = vmatprep.subr.bf16.mxu0 %v8058_v23 }
  0x47   : > { %8119 = vmatprep.subr.bf16.mxu1 %v8118_v27 }
  0x49   : > { %8061 = vmatpush1.bf16.msra.mxu0 %v8060_v33 }
  0x4a   : > { %8121 = vmatpush1.bf16.msra.mxu1 %v8120_v34  ;;  %8063 = vmatprep.subr.bf16.mxu0 %v8062_v35  ;;  %v6498_v35 = vld [vmem:[%s11382_s30 + $0x28] sm:$0xff] }
  0x4b   : > { %8123 = vmatprep.subr.bf16.mxu1 %v8122_v39  ;;  %v6499_v39 = vld [vmem:[%s11382_s30 + $0x30] sm:$0xff] }
  0x4d   : > { %8065 = vmatpush1.bf16.msra.mxu0 %v8064_v45  ;;  %v1040_v45 = vld [vmem:[%s11382_s30] sm:$0xff] }
  0x4e   : > { %8125 = vmatpush1.bf16.msra.mxu1 %v8124_v46  ;;  %8067 = vmatprep.subr.bf16.mxu0 %v8066_v47 }
  0x4f   : > { %8127 = vmatprep.subr.bf16.mxu1 %v8126_v50  ;;  %v1041_v50 = vld [vmem:[%s11382_s30 + $0x8] sm:$0xff] }
  0x51   : > { %8069 = vmatpush1.bf16.msra.mxu0 %v8068_v53  ;;  %v1042_v53 = vld [vmem:[%s11382_s30 + $0x10] sm:$0xff] }
  0x52   : > { %8129 = vmatpush1.bf16.msra.mxu1 %v8128_v54 }
  0x54   : > { %939 = vmatmul.mubr.f32.vlgmr.msra.gmra.mrb[0].mxu0 %v738_v55 }
  0x55   : > { %1022 = vmatmul.mubr.f32.vlgmr.msra.gmra.mrb[0].mxu1 %v738_v55  ;;  %6492 = vmatprep.mubr.msk.f32.mxu0 %vm864_vm0, %v741_v56 }
  0x56   : > { %6495 = vmatprep.mubr.msk.f32.mxu1 %vm864_vm0, %v741_v56 }
  0x58   : > { %945 = vmatmul.mubr.f32.gmra.mrb[2].mxu0 %v740_v57 }
  0x59   : > { %1028 = vmatmul.mubr.f32.gmra.mrb[2].mxu1 %v740_v57  ;;  %6493 = vmatprep.mubr.msk.f32.mxu0 %vm864_vm0, %v743_v58  ;;  %v1043_v57 = vld [vmem:[%s11382_s30 + $0x18] sm:$0xff] }
  0x5a   : > { %6496 = vmatprep.mubr.msk.f32.mxu1 %vm864_vm0, %v743_v58 }
  0x5c   : > { %951 = vmatmul.mubr.f32.gmra.mrb[4].mxu0 %v742_v59 }
  0x5d   : > { %1034 = vmatmul.mubr.f32.gmra.mrb[4].mxu1 %v742_v59  ;;  %7256 = vmatprep.mubr.msk.f32.mxu0 %vm1073_vm1, %v6497_v4  ;;  %v6511_v59 = vld [vmem:[%s11382_s30 + $0x40] sm:$0xff] }
  0x5e   : > { %v6520_v4 = vld [vmem:[%s11382_s30 + $0x60] sm:$0xff] }
 0x127   : > { %v940_v60 = vpop.f32.mrb[0].mxu0 }
 0x128   : > { %v942_v61 = vpop.f32.mrb[1].mxu0  ;;  %v1023_v62 = vpop.f32.mrb[0].mxu1 }
 0x129   : > { %v8741_v63 = vpack.i.bf16 %v1023_v62, %v942_v61  ;;  %v1025_v0 = vpop.f32.mrb[1].mxu1  ;;  %v8731_v1 = vpack.i.bf16 %v942_v61, %v940_v60 }
 0x12a   : > { %v8751_v2 = vpack.i.bf16 %v1025_v0, %v1023_v62  ;;  %v6512_v62 = vld [vmem:[%s11382_s30 + $0x48] sm:$0xff] }
 0x12b   : > { %8732 = vrot.lane.b32.xlu0 %v8731_v1, %s11360_s29  ;;  %v946_v3 = vpop.f32.mrb[2].mxu0  ;;  %v6513_v1 = vld [vmem:[%s11382_s30 + $0x50] sm:$0xff] }
 0x12c   : > { %v9562_v5 = vpack.c.bf16 %v946_v3, %v940_v60  ;;  %v948_v6 = vpop.f32.mrb[3].mxu0  ;;  %v1029_v7 = vpop.f32.mrb[2].mxu1 }
 0x12d   : > { %v8736_v8 = vpack.i.bf16 %v948_v6, %v946_v3  ;;  %v8746_v9 = vpack.i.bf16 %v1029_v7, %v948_v6  ;;  %v1031_v10 = vpop.f32.mrb[3].mxu1  ;;  %v6514_v3 = vld [vmem:[%s11382_s30 + $0x58] sm:$0xff]  ;;  %v6522_v6 = vld [vmem:[%s11382_s30 + $0x70] sm:$0xff] }
 0x12e   : > { %v8756_v11 = vpack.i.bf16 %v1031_v10, %v1029_v7  ;;  %v6523_v7 = vld [vmem:[%s11382_s30 + $0x78] sm:$0xff] }
 0x12f   : > { %8737 = vrot.lane.b32.xlu0 %v8736_v8, %s11360_s29  ;;  %v9566_v12 = vpop.f32.mrb[4].mxu0 }
 0x130   : > { %1063 = vrot.lane.b32.xlu1 %v9566_v12, %s11360_s29  ;;  %v954_v13 = vpop.f32.mrb[5].mxu0  ;;  %v1035_v14 = vpop.f32.mrb[4].mxu1 }
 0x131   : > { %v1037_v15 = vpop.f32.mrb[5].mxu1 }
 0x133   : > { %8742 = vrot.lane.b32.xlu0 %v8741_v63, %s9016_s27 }
 0x134   : > { %1065 = vrot.lane.b32.xlu1 %v954_v13, %s11360_s29  ;;  %s11386_s29 = smov 8  }
 0x137   : > { %1289 = vrot.lane.b32.xlu0 %v954_v13, %s9016_s27 }
 0x138   : > { %8747 = vrot.lane.b32.xlu1 %v8746_v9, %s9016_s27 }
 0x13b   : > { %8752 = vrot.lane.b32.xlu0 %v8751_v2, %s9017_s3 }
 0x13c   : > { %1291 = vrot.lane.b32.xlu1 %v1035_v14, %s9016_s27  ;;  %s9024_s27 = smov 38  }
 0x13f   : > { %1418 = vrot.lane.b32.xlu0 %v1035_v14, %s9017_s3 }
 0x140   : > { %8757 = vrot.lane.b32.xlu1 %v8756_v11, %s9017_s3 }
 0x143   : > { %1537 = vperm.xlu0 %8761, %v1531_v16  }
 0x144   : > { %1420 = vrot.lane.b32.xlu1 %v1037_v15, %s9017_s3  ;;  %s11388_s3 = sld [smem:[#allocation11_spill]] }
 0x147   : > { %1552 = vperm.xlu0 %8761, %v1534_v19  }
 0x148   : > { %1542 = vperm.xlu1 %8762, %v1532_v17  }
 0x14c   : > { %1547 = vperm.xlu1 %8762, %v1533_v20  }
 0x19d   : > { %v8733_v21 = vpop.permute.xlu0 %8732 }
 0x19e   : > { %v8735_v22 = vunpack.i.h.bf16 %v8733_v21  ;;  %v8734_v23 = vunpack.i.l.bf16 %v8733_v21 }
 0x1a0   : > { %v1068_v28 = vsel %vm1067_vm2, %v8734_v23, %v8735_v22 }
 0x1a1   : > { %v8738_v24 = vpop.permute.xlu0 %8737 }
 0x1a2   : > { %v8740_v25 = vunpack.i.h.bf16 %v8738_v24  ;;  %v8739_v26 = vunpack.i.l.bf16 %v8738_v24  ;;  %v1064_v27 = vpop.permute.xlu1 %1063  ;;  %v1626_v24 = vld [vmem:[%s11384_s0 + $0x8] sm:$0xff] }
 0x1a4   : > { %v1069_v29 = vsel %vm1067_vm2, %v8739_v26, %v8740_v25  ;;  %v1628_v25 = vld [vmem:[%s11384_s0 + $0x18] sm:$0xff]  ;;  %v1625_v26 = vld [vmem:[%s11384_s0] sm:$0xff] }
 0x1a5   : > { %v8743_v30 = vpop.permute.xlu0 %8742  ;;  %v8130_v31 = vpack.c.bf16 %v1069_v29, %v1068_v28  ;;  %v1627_v28 = vld [vmem:[%s11384_s0 + $0x10] sm:$0xff]  ;;  %v1630_v29 = vld [vmem:[%s11384_s0 + $0x28] sm:$0xff] }
 0x1a6   : > { %v1066_v32 = vpop.permute.xlu1 %1065  ;;  %v8745_v40 = vunpack.i.h.bf16 %v8743_v30  ;;  %v8744_v41 = vunpack.i.l.bf16 %v8743_v30  ;;  %v1632_v30 = vld [vmem:[%s11384_s0 + $0x38] sm:$0xff] }
 0x1a7   : > { %v1070_v33 = vsel %vm1067_vm2, %v1064_v27, %v1066_v32  ;;  %8131 = vmatprep.subr.bf16.mxu0 %v8130_v31  ;;  %v8146_v27 = vpack.c.bf16 %v1628_v25, %v1626_v24  ;;  %v8150_v32 = vpack.c.bf16 %v1632_v30, %v1630_v29  ;;  %v1653_v24 = vld [vmem:[%s11384_s0 + $0xe0] sm:$0xff] }
 0x1a8   : > { %8133 = vmatpush3.bf16.msra.mxu0 %v8130_v31  ;;  %v1294_v46 = vsel %vm1293_vm4, %v8744_v41, %v8745_v40  ;;  %v8148_v31 = vpack.c.bf16 %v1627_v28, %v1625_v26 }
 0x1a9   : > { %7254 = vmatprep.subr.msk.mxu0 %vm1086_vm3, %v1070_v33  ;;  %v1290_v36 = vpop.permute.xlu0 %1289  ;;  %8147 = vmatprep.subr.bf16.mxu1 %v8146_v27 }
 0x1aa   : > { %v8748_v34 = vpop.permute.xlu1 %8747  ;;  %8149 = vmatpush1.bf16.msra.mxu1 %v8148_v31 }
 0x1ab   : > { %v8750_v37 = vunpack.i.h.bf16 %v8748_v34  ;;  %v8749_v38 = vunpack.i.l.bf16 %v8748_v34  ;;  %v1631_v34 = vld [vmem:[%s11384_s0 + $0x30] sm:$0xff]  ;;  %8151 = vmatprep.subr.bf16.mxu1 %v8150_v32 }
 0x1ac   : > { %7255 = vmatpush3.msk.msra.mxu0 %vm1086_vm3, %v1070_v33  ;;  %v1629_v33 = vld [vmem:[%s11384_s0 + $0x20] sm:$0xff] }
 0x1ad   : > { %7257 = vmatmul.mubr.msk.f32.vlgmr.msra.gmra.mrb[6].mxu0 %vm1073_vm1, %v6498_v35  ;;  %8135 = vmatprep.subr.bf16.mxu0 %v9562_v5  ;;  %v1295_v44 = vsel %vm1293_vm4, %v8749_v38, %v8750_v37  ;;  %v8753_v47 = vpop.permute.xlu0 %8752  ;;  %v1634_v35 = vld [vmem:[%s11384_s0 + $0x48] sm:$0xff]  ;;  %v8152_v37 = vpack.c.bf16 %v1631_v34, %v1629_v33 }
 0x1ae   : > { %8137 = vmatpush3.bf16.msra.mxu0 %v9562_v5  ;;  %v1292_v42 = vpop.permute.xlu1 %1291  ;;  %7259 = vmatprep.mubr.msk.f32.mxu0 %vm1073_vm1, %v6499_v39  ;;  %v8138_v48 = vpack.c.bf16 %v1295_v44, %v1294_v46  ;;  %v8755_v54 = vunpack.i.h.bf16 %v8753_v47  ;;  %v8754_v55 = vunpack.i.l.bf16 %v8753_v47  ;;  %v6521_v5 = vld [vmem:[%s11382_s30 + $0x68] sm:$0xff] }
 0x1af   : > { %7266 = vmatprep.subr.msk.mxu0 %vm1086_vm3, %v9566_v12  ;;  %v1296_v56 = vsel %vm1293_vm4, %v1290_v36, %v1292_v42  ;;  %v1636_v36 = vld [vmem:[%s11384_s0 + $0x58] sm:$0xff]  ;;  %8153 = vmatpush1.bf16.msra.mxu1 %v8152_v37 }
 0x1b0   : > { %v1423_v60 = vsel %vm1422_vm5, %v8754_v55, %v8755_v54  ;;  %v8154_v38 = vpack.c.bf16 %v1636_v36, %v1634_v35 }
 0x1b1   : > { %7260 = vmatmul.mubr.msk.f32.gmra.mrb[8].mxu0 %vm1073_vm1, %v6500_v43  ;;  %v1419_v63 = vpop.permute.xlu0 %1418 }
 0x1b2   : > { %7267 = vmatpush3.msk.msra.mxu0 %vm1086_vm3, %v9566_v12  ;;  %v8758_v49 = vpop.permute.xlu1 %8757  ;;  %7268 = vmatprep.mubr.msk.f32.mxu0 %vm1073_vm1, %v1040_v45 }
 0x1b3   : > { %v8760_v51 = vunpack.i.h.bf16 %v8758_v49  ;;  %v8759_v52 = vunpack.i.l.bf16 %v8758_v49  ;;  %8139 = vmatprep.subr.bf16.mxu0 %v8138_v48  ;;  %8155 = vmatprep.subr.bf16.mxu1 %v8154_v38 }
 0x1b5   : > { %7269 = vmatmul.mubr.msk.f32.vlgmr.msra.gmra.mrb[6].mxu0 %vm1073_vm1, %v1041_v50  ;;  %v1424_v58 = vsel %vm1422_vm5, %v8759_v52, %v8760_v51 }
 0x1b6   : > { %8141 = vmatpush3.bf16.msra.mxu0 %v8138_v48  ;;  %7271 = vmatprep.mubr.msk.f32.mxu0 %vm1073_vm1, %v1042_v53  ;;  %v8142_v61 = vpack.c.bf16 %v1424_v58, %v1423_v60  ;;  %v1421_v0 = vpop.permute.xlu1 %1420  ;;  %v1635_v60 = vld [vmem:[%s11384_s0 + $0x50] sm:$0xff] }
 0x1b7   : > { %7278 = vmatprep.subr.msk.mxu0 %vm1086_vm3, %v1296_v56  ;;  %v1425_v2 = vsel %vm1422_vm5, %v1419_v63, %v1421_v0  ;;  %v1640_v63 = vld [vmem:[%s11384_s0 + $0x78] sm:$0xff] }
 0x1b9   : > { %7272 = vmatmul.mubr.msk.f32.gmra.mrb[8].mxu0 %vm1073_vm1, %v1043_v57 }
 0x1ba   : > { %7279 = vmatpush3.msk.msra.mxu0 %vm1086_vm3, %v1296_v56  ;;  %7280 = vmatprep.mubr.msk.f32.mxu0 %vm1073_vm1, %v6511_v59  ;;  %v1633_v59 = vld [vmem:[%s11384_s0 + $0x40] sm:$0xff] }
 0x1bb   : > { %8143 = vmatprep.subr.bf16.mxu0 %v8142_v61 }
 0x1bd   : > { %7281 = vmatmul.mubr.msk.f32.vlgmr.msra.gmra.mrb[6].mxu0 %vm1073_vm1, %v6512_v62  ;;  %v1638_v62 = vld [vmem:[%s11384_s0 + $0x68] sm:$0xff] }
 0x1be   : > { %8145 = vmatpush3.bf16.msra.mxu0 %v8142_v61  ;;  %7283 = vmatprep.mubr.msk.f32.mxu0 %vm1073_vm1, %v6513_v1  ;;  %v8156_v61 = vpack.c.bf16 %v1635_v60, %v1633_v59  ;;  %v8158_v0 = vpack.c.bf16 %v1640_v63, %v1638_v62  ;;  %v1637_v1 = vld [vmem:[%s11384_s0 + $0x60] sm:$0xff] }
 0x1bf   : > { %7290 = vmatprep.subr.msk.mxu0 %vm1086_vm3, %v1425_v2  ;;  %v6533_v63 = vld [vmem:[%s11385_s5 + $0x40] sm:$0xff] }
 0x1c0   : > { %8157 = vmatpush1.bf16.msra.mxu1 %v8156_v61 }
 0x1c1   : > { %7284 = vmatmul.mubr.msk.f32.gmra.mrb[8].mxu0 %vm1073_vm1, %v6514_v3  ;;  %8159 = vmatprep.subr.bf16.mxu1 %v8158_v0 }
 0x1c2   : > { %7291 = vmatpush3.msk.msra.mxu0 %vm1086_vm3, %v1425_v2  ;;  %7292 = vmatprep.mubr.msk.f32.mxu0 %vm1073_vm1, %v6520_v4  ;;  %v1538_v9 = vpop.permute.xlu0 %1537  ;;  %v1639_v2 = vld [vmem:[%s11384_s0 + $0x70] sm:$0xff]  ;;  %v1642_v4 = vld [vmem:[%s11384_s0 + $0x88] sm:$0xff] }
 0x1c3   : > { %v8160_v3 = vpack.c.bf16 %v1639_v2, %v1637_v1 }
 0x1c5   : > { %7293 = vmatmul.mubr.msk.f32.vlgmr.msra.gmra.mrb[6].mxu0 %vm1073_vm1, %v6521_v5  ;;  %8161 = vmatpush1.bf16.msra.mxu1 %v8160_v3  ;;  %v1644_v5 = vld [vmem:[%s11384_s0 + $0x98] sm:$0xff] }
 0x1c6   : > { %7295 = vmatprep.mubr.msk.f32.mxu0 %vm1073_vm1, %v6522_v6  ;;  %v1553_v16 = vpop.permute.xlu0 %1552  ;;  %v8162_v6 = vpack.c.bf16 %v1644_v5, %v1642_v4 }
 0x1c7   : > { %v1543_v8 = vpop.permute.xlu1 %1542 }
 0x1c8   : > { %8163 = vmatprep.subr.bf16.mxu1 %v8162_v6 }
 0x1c9   : > { %7296 = vmatmul.mubr.msk.f32.gmra.mrb[8].mxu0 %vm1073_vm1, %v6523_v7  ;;  %v1641_v7 = vld [vmem:[%s11384_s0 + $0x80] sm:$0xff] }
 0x1ca   : > { %7306 = vmatprep.mubr.msk.f32.mxu0 %vm1789_vm11, %v6533_v63  ;;  %v6557_v63 = vld [vmem:[%s11385_s5 + $0x80] sm:$0xff] }
 0x1cb   : > { %v1548_v15 = vpop.permute.xlu1 %1547 }
 0x298   : > { %v7294_v10 = vpop.f32.mrb[6].mxu0 }
 0x299   : > { %v1556_v11 = vadd.f32 %v7294_v10, %v1543_v8  ;;  %v1508_v12 = vpop.f32.mrb[7].mxu0  ;;  %v1643_v8 = vld [vmem:[%s11384_s0 + $0x90] sm:$0xff]  ;;  %v1646_v10 = vld [vmem:[%s11384_s0 + $0xa8] sm:$0xff] }
 0x29a   : > { %v1555_v13 = vadd.f32 %v1538_v9, %v1508_v12  ;;  %v8164_v9 = vpack.c.bf16 %v1643_v8, %v1641_v7  ;;  %v2381_v8 = vld [vmem:[%s11387_s7 + $0x8] sm:$0xff] }
 0x29b   : > { %v1563_v14 = vsel %vm1559_vm6, %v1556_v11, 0.0 }
 0x29c   : > { %1564 = vadd.xlane.f32.xlu0 %v1563_v14  ;;  %v7297_v17 = vpop.f32.mrb[8].mxu0  ;;  %v1560_v18 = vsel %vm1559_vm6, %v1555_v13, 0.0  ;;  %8165 = vmatpush1.bf16.msra.mxu1 %v8164_v9  ;;  %v1647_v14 = vld [vmem:[%s11384_s0 + $0xb0] sm:$0xff]  ;;  %v2383_v9 = vld [vmem:[%s11387_s7 + $0x18] sm:$0xff] }
 0x29d   : > { %v1558_v19 = vadd.f32 %v7297_v17, %v1553_v16  ;;  %1561 = vadd.xlane.f32.xlu1 %v1560_v18  ;;  %v1518_v20 = vpop.f32.mrb[9].mxu0  ;;  %v1652_v17 = vld [vmem:[%s11384_s0 + $0xd8] sm:$0xff]  ;;  %v1649_v18 = vld [vmem:[%s11384_s0 + $0xc0] sm:$0xff] }
 0x29e   : > { %v1557_v21 = vadd.f32 %v1548_v15, %v1518_v20  ;;  %v1650_v15 = vld [vmem:[%s11384_s0 + $0xc8] sm:$0xff]  ;;  %v9019_v20 = vmov 0.0  }
 0x29f   : > { %v1569_v22 = vsel %vm1559_vm6, %v1558_v19, 0.0  ;;  %1731 = vmatprep.mubr.f32.mxu1 %v9019_v20 }
 0x2a0   : > { %v1566_v23 = vsel %vm1559_vm6, %v1557_v21, 0.0 }
 0x2a1   : > { %1570 = vadd.xlane.f32.xlu1 %v1569_v22  ;;  %1567 = vadd.xlane.f32.xlu0 %v1566_v23  ;;  %v1654_v23 = vld [vmem:[%s11384_s0 + $0xe8] sm:$0xff] }
 0x329   : > { %v1565_v39 = vpop.xlane.xlu0 %1564 }
 0x32a   : > { %v1574_v40 = vmul.f32 0.008333334, %v1565_v39  ;;  %v1562_v41 = vpop.xlane.xlu1 %1561 }
 0x32b   : > { %v1573_v42 = vmul.f32 0.008333334, %v1562_v41 }
 0x32c   : > { %v9698_v43 = vsub.f32 %v1556_v11, %v1574_v40  ;;  %v1648_v11 = vld [vmem:[%s11384_s0 + $0xb8] sm:$0xff] }
 0x32d   : > { %v9700_v44 = vsub.f32 %v1555_v13, %v1573_v42  ;;  %v8166_v12 = vpack.c.bf16 %v1648_v11, %v1646_v10  ;;  %v1645_v13 = vld [vmem:[%s11384_s0 + $0xa0] sm:$0xff]  ;;  %v2385_v11 = vld [vmem:[%s11387_s7 + $0x28] sm:$0xff] }
 0x32e   : > { %v1571_v45 = vpop.xlane.xlu1 %1570  ;;  %v1568_v46 = vpop.xlane.xlu0 %1567  ;;  %v1582_v47 = vmul.f32 %v9698_v43, %v9698_v43  ;;  %v8168_v16 = vpack.c.bf16 %v1647_v14, %v1645_v13  ;;  %v2380_v10 = vld [vmem:[%s11387_s7] sm:$0xff]  ;;  %v2387_v13 = vld [vmem:[%s11387_s7 + $0x38] sm:$0xff] }
 0x32f   : > { %v1576_v48 = vmul.f32 0.008333334, %v1571_v45  ;;  %v1575_v49 = vmul.f32 0.008333334, %v1568_v46  ;;  %v1581_v50 = vmul.f32 %v9700_v44, %v9700_v44  ;;  %8167 = vmatprep.subr.bf16.mxu1 %v8166_v12  ;;  %v2382_v12 = vld [vmem:[%s11387_s7 + $0x10] sm:$0xff]  ;;  %v2384_v14 = vld [vmem:[%s11387_s7 + $0x20] sm:$0xff] }
 0x330   : > { %v1588_v51 = vsel %vm1559_vm6, %v1582_v47, 0.0  ;;  %8169 = vmatpush1.bf16.msra.mxu1 %v8168_v16 }
 0x331   : > { %v9707_v52 = vsub.f32 %v1558_v19, %v1576_v48  ;;  %v9709_v53 = vsub.f32 %v1557_v21, %v1575_v49  ;;  %1589 = vadd.xlane.f32.xlu1 %v1588_v51  ;;  %v1585_v54 = vsel %vm1559_vm6, %v1581_v50, 0.0  ;;  %v1651_v19 = vld [vmem:[%s11384_s0 + $0xd0] sm:$0xff]  ;;  %v8170_v21 = vpack.c.bf16 %v1652_v17, %v1650_v15  ;;  %s11391_s0 = smov 98  }
 0x332   : > { %1586 = vadd.xlane.f32.xlu0 %v1585_v54  ;;  %v8172_v22 = vpack.c.bf16 %v1651_v19, %v1649_v18  ;;  %v2386_v15 = vld [vmem:[%s11387_s7 + $0x30] sm:$0xff] }
 0x333   : > { %v1584_v55 = vmul.f32 %v9707_v52, %v9707_v52  ;;  %v1583_v56 = vmul.f32 %v9709_v53, %v9709_v53  ;;  %8171 = vmatprep.subr.bf16.mxu1 %v8170_v21 }
 0x334   : > { %8173 = vmatpush1.bf16.msra.mxu1 %v8172_v22 }
 0x335   : > { %v1594_v57 = vsel %vm1559_vm6, %v1584_v55, 0.0  ;;  %v1591_v58 = vsel %vm1559_vm6, %v1583_v56, 0.0  ;;  %1695 = vmatprep.subr.mxu1 %v1654_v23 }
 0x336   : > { %1595 = vadd.xlane.f32.xlu1 %v1594_v57  ;;  %1592 = vadd.xlane.f32.xlu0 %v1591_v58 }
 0x338   : > { %1696 = vmatpush1.msra.mxu1 %v1653_v24 }
 0x3be   : > { %v1590_v25 = vpop.xlane.xlu1 %1589 }
 0x3bf   : > { %v1598_v26 = vmul.f32 0.008333334, %v1590_v25  ;;  %v1587_v27 = vpop.xlane.xlu0 %1586 }
 0x3c0   : > { %v1597_v28 = vmul.f32 0.008333334, %v1587_v27 }
 0x3c1   : > { %v1602_v29 = vadd.f32 1e-05, %v1598_v26 }
 0x3c2   : > { %v1601_v30 = vadd.f32 1e-05, %v1597_v28 }
 0x3c3   : > { %8923 = vrsqrt.f32 %v1602_v29  ;;  %v1596_v31 = vpop.xlane.xlu1 %1595  ;;  %v1593_v32 = vpop.xlane.xlu0 %1592  ;;  %v6534_v29 = vld [vmem:[%s11385_s5 + $0x48] sm:$0xff] }
 0x3c4   : > { %8925 = vrsqrt.f32 %v1601_v30  ;;  %v1600_v33 = vmul.f32 0.008333334, %v1596_v31  ;;  %v1599_v34 = vmul.f32 0.008333334, %v1593_v32  ;;  %v6535_v30 = vld [vmem:[%s11385_s5 + $0x50] sm:$0xff] }
 0x3c6   : > { %v1604_v35 = vadd.f32 1e-05, %v1600_v33  ;;  %v1603_v36 = vadd.f32 1e-05, %v1599_v34  ;;  %v6536_v33 = vld [vmem:[%s11385_s5 + $0x58] sm:$0xff] }
 0x3c8   : > { %8927 = vrsqrt.f32 %v1603_v36 }
 0x3c9   : > { %8929 = vrsqrt.f32 %v1604_v35  ;;  %v6537_v35 = vld [vmem:[%s11385_s5 + $0x60] sm:$0xff] }
 0x3cd   : > { %v8924_v37 = vpop.eup %8923 }
 0x3ce   : > { %v8926_v38 = vpop.eup %8925  ;;  %v1610_v40 = vmul.f32 %v8924_v37, %v9698_v43 }
 0x3cf   : > { %v1609_v39 = vmul.f32 %v8926_v38, %v9700_v44  ;;  %v6538_v38 = vld [vmem:[%s11385_s5 + $0x68] sm:$0xff] }
 0x3d0   : > { %v1618_v46 = vmul.f32 0.01, %v1610_v40  ;;  %vm1614_vm8 = vcmp.ge.f32.partialorder %v1610_v40, 0.0 }
 0x3d1   : > { %vm1613_vm7 = vcmp.ge.f32.partialorder %v1609_v39, 0.0  ;;  %v1617_v41 = vmul.f32 0.01, %v1609_v39 }
 0x3d2   : > { %v8928_v42 = vpop.eup %8927  ;;  %v1622_v49 = vsel %vm1614_vm8, %v1610_v40, %v1618_v46  ;;  %v6539_v40 = vld [vmem:[%s11385_s5 + $0x70] sm:$0xff]  ;;  %v6540_v46 = vld [vmem:[%s11385_s5 + $0x78] sm:$0xff] }
 0x3d3   : > { %v1621_v45 = vsel %vm1613_vm7, %v1609_v39, %v1617_v41  ;;  %v8930_v47 = vpop.eup %8929  ;;  %v1611_v48 = vmul.f32 %v8928_v42, %v9709_v53 }
 0x3d4   : > { %6529 = vmatmul.mubr.msk.f32.vlgmr.msra.gmra.mrb[6].mxu1 %vm1559_vm6, %v1621_v45  ;;  %v1612_v51 = vmul.f32 %v8930_v47, %v9707_v52  ;;  %v1756_v47 = vld [vmem:[%s11385_s5] sm:$0xff] }
 0x3d5   : > { %1737 = vmatprep.mubr.f32.mxu1 %v9019_v20  ;;  %v1619_v50 = vmul.f32 0.01, %v1611_v48  ;;  %vm1615_vm9 = vcmp.ge.f32.partialorder %v1611_v48, 0.0 }
 0x3d6   : > { %v1620_v44 = vmul.f32 0.01, %v1612_v51  ;;  %vm1616_vm10 = vcmp.ge.f32.partialorder %v1612_v51, 0.0 }
 0x3d7   : > { %v1623_v43 = vsel %vm1615_vm9, %v1611_v48, %v1619_v50  ;;  %vm2756_vm9 = vcmask 523264  }
 0x3d8   : > { %6530 = vmatmul.mubr.msk.f32.gmra.mrb[8].mxu1 %vm1559_vm6, %v1622_v49  ;;  %v1624_v54 = vsel %vm1616_vm10, %v1612_v51, %v1620_v44  ;;  %v1757_v51 = vld [vmem:[%s11385_s5 + $0x8] sm:$0xff]  ;;  %v1758_v44 = vld [vmem:[%s11385_s5 + $0x10] sm:$0xff]  ;;  %vm3411_vm10 = vcmask 244736  }
 0x3d9   : > { %1743 = vmatprep.mubr.f32.mxu1 %v9019_v20 }
 0x3dc   : > { %6531 = vmatmul.mubr.msk.f32.gmra.mrb[10].mxu1 %vm1559_vm6, %v1623_v43 }
 0x3dd   : > { %1749 = vmatprep.mubr.f32.mxu1 %v9019_v20 }
 0x3e0   : > { %6532 = vmatmul.mubr.msk.f32.gmra.mrb[12].mxu1 %vm1559_vm6, %v1624_v54 }
 0x4a7   : > { %v1733_v53 = vpop.f32.mrb[6].mxu1 }
 0x4a8   : > { %v1735_v55 = vpop.f32.mrb[7].mxu1 }
 0x4a9   : > { %v8773_v56 = vpack.i.bf16 %v1735_v55, %v1733_v53 }
 0x4ab   : > { %v1739_v57 = vpop.f32.mrb[8].mxu1 }
 0x4ac   : > { %v8763_v52 = vpack.i.bf16 %v1739_v57, %v1733_v53  ;;  %v9790_v58 = vpack.c.bf16 %v1739_v57, %v1733_v53  ;;  %v1741_v59 = vpop.f32.mrb[9].mxu1 }
 0x4ad   : > { %v8793_v60 = vpack.i.bf16 %v1741_v59, %v1735_v55  ;;  %v8778_v61 = vpack.i.bf16 %v1741_v59, %v1739_v57  ;;  %v1759_v57 = vld [vmem:[%s11385_s5 + $0x18] sm:$0xff]  ;;  %v1761_v59 = vld [vmem:[%s11385_s5 + $0x28] sm:$0xff] }
 0x4ae   : > { %8764 = vrot.lane.b32.xlu0 %v8763_v52, %s11362_s8  ;;  %v1760_v52 = vld [vmem:[%s11385_s5 + $0x20] sm:$0xff] }
 0x4af   : > { %v1745_v62 = vpop.f32.mrb[10].mxu1 }
 0x4b0   : > { %v1747_v0 = vpop.f32.mrb[11].mxu1 }
 0x4b1   : > { %v8783_v1 = vpack.i.bf16 %v1747_v0, %v1745_v62 }
 0x4b2   : > { %8779 = vrot.lane.b32.xlu0 %v8778_v61, %s11386_s29 }
 0x4b3   : > { %v1751_v2 = vpop.f32.mrb[12].mxu1 }
 0x4b4   : > { %v8768_v3 = vpack.i.bf16 %v1751_v2, %v1745_v62  ;;  %v8186_v4 = vpack.c.bf16 %v1751_v2, %v1745_v62  ;;  %v1753_v5 = vpop.f32.mrb[13].mxu1  ;;  %v1763_v62 = vld [vmem:[%s11385_s5 + $0x38] sm:$0xff] }
 0x4b5   : > { %v8798_v6 = vpack.i.bf16 %v1753_v5, %v1747_v0  ;;  %v8788_v7 = vpack.i.bf16 %v1753_v5, %v1751_v2  ;;  %v6558_v2 = vld [vmem:[%s11385_s5 + $0x88] sm:$0xff]  ;;  %v6560_v5 = vld [vmem:[%s11385_s5 + $0x98] sm:$0xff] }
 0x4b6   : > { %8769 = vrot.lane.b32.xlu1 %v8768_v3, %s11362_s8  ;;  %v6559_v3 = vld [vmem:[%s11385_s5 + $0x90] sm:$0xff] }
 0x4b7   : > { %8789 = vrot.lane.b32.xlu0 %v8788_v7, %s11386_s29  ;;  %v6562_v7 = vld [vmem:[%s11385_s5 + $0xa8] sm:$0xff] }
 0x4ba   : > { %8774 = vrot.lane.b32.xlu1 %v8773_v56, %s11386_s29 }
 0x4bb   : > { %8799 = vrot.lane.b32.xlu0 %v8798_v6, %s9021_s26  ;;  %v6561_v6 = vld [vmem:[%s11385_s5 + $0xa0] sm:$0xff] }
 0x4be   : > { %8784 = vrot.lane.b32.xlu1 %v8783_v1, %s11386_s29  ;;  %s11389_s29 = sld [smem:[#allocation12_spill]] }
 0x4bf   : > { %2395 = vperm.xlu0 %8761, %v2381_v8   ;;  %v6563_v8 = vld [vmem:[%s11385_s5 + $0xb0] sm:$0xff] }
 0x4c2   : > { %8794 = vrot.lane.b32.xlu1 %v8793_v60, %s9021_s26  ;;  %v1762_v60 = vld [vmem:[%s11385_s5 + $0x30] sm:$0xff]  ;;  %s11390_s26 = smov 68  }
 0x4c3   : > { %2405 = vperm.xlu0 %8761, %v2383_v9   ;;  %v6564_v9 = vld [vmem:[%s11385_s5 + $0xb8] sm:$0xff] }
 0x4c6   : > { %2390 = vperm.xlu1 %8762, %v2380_v10   ;;  %v6573_v10 = vld [vmem:[%s11385_s5 + $0xc0] sm:$0xff] }
 0x4c7   : > { %2415 = vperm.xlu0 %8761, %v2385_v11   ;;  %v6574_v11 = vld [vmem:[%s11385_s5 + $0xc8] sm:$0xff] }
 0x4ca   : > { %2400 = vperm.xlu1 %8762, %v2382_v12   ;;  %v6575_v12 = vld [vmem:[%s11385_s5 + $0xd0] sm:$0xff] }
 0x4cb   : > { %2425 = vperm.xlu0 %8761, %v2387_v13   ;;  %v6576_v13 = vld [vmem:[%s11385_s5 + $0xd8] sm:$0xff] }
 0x4ce   : > { %2410 = vperm.xlu1 %8762, %v2384_v14   ;;  %v6577_v14 = vld [vmem:[%s11385_s5 + $0xe0] sm:$0xff] }
 0x4d2   : > { %2420 = vperm.xlu1 %8762, %v2386_v15   ;;  %v6578_v15 = vld [vmem:[%s11385_s5 + $0xe8] sm:$0xff] }
 0x520   : > { %v8765_v16 = vpop.permute.xlu0 %8764 }
 0x521   : > { %v8767_v17 = vunpack.i.h.bf16 %v8765_v16  ;;  %v8766_v18 = vunpack.i.l.bf16 %v8765_v16  ;;  %v6579_v16 = vld [vmem:[%s11385_s5 + $0xf0] sm:$0xff] }
 0x523   : > { %v8174_v19 = vpack.c.bf16 %v8767_v17, %v8766_v18  ;;  %v6580_v17 = vld [vmem:[%s11385_s5 + $0xf8] sm:$0xff] }
 0x524   : > { %v8780_v26 = vpop.permute.xlu0 %8779 }
 0x525   : > { %8175 = vmatprep.subr.bf16.mxu0 %v8174_v19  ;;  %v8782_v31 = vunpack.i.h.bf16 %v8780_v26  ;;  %v8781_v32 = vunpack.i.l.bf16 %v8780_v26 }
 0x526   : > { %8177 = vmatpush3.bf16.msra.mxu0 %v8174_v19 }
 0x527   : > { %v2078_v36 = vsel %vm1067_vm2, %v8781_v32, %v8782_v31 }
 0x528   : > { %v8770_v21 = vpop.permute.xlu1 %8769 }
 0x529   : > { %v8772_v22 = vunpack.i.h.bf16 %v8770_v21  ;;  %v8771_v23 = vunpack.i.l.bf16 %v8770_v21  ;;  %v8790_v41 = vpop.permute.xlu0 %8789 }
 0x52a   : > { %v8792_v48 = vunpack.i.h.bf16 %v8790_v41  ;;  %v8791_v49 = vunpack.i.l.bf16 %v8790_v41 }
 0x52b   : > { %v8178_v24 = vpack.c.bf16 %v8772_v22, %v8771_v23 }
 0x52c   : > { %v8775_v25 = vpop.permute.xlu1 %8774  ;;  %v2080_v54 = vsel %vm1067_vm2, %v8791_v49, %v8792_v48 }
 0x52d   : > { %8179 = vmatprep.subr.bf16.mxu0 %v8178_v24  ;;  %v8777_v27 = vunpack.i.h.bf16 %v8775_v25  ;;  %v8776_v28 = vunpack.i.l.bf16 %v8775_v25  ;;  %v8800_v61 = vpop.permute.xlu0 %8799 }
 0x52e   : > { %8181 = vmatpush3.bf16.msra.mxu0 %v8178_v24  ;;  %v8802_v0 = vunpack.i.h.bf16 %v8800_v61  ;;  %v8801_v1 = vunpack.i.l.bf16 %v8800_v61 }
 0x52f   : > { %8183 = vmatprep.subr.bf16.mxu0 %v9790_v58  ;;  %v2077_v34 = vsel %vm1067_vm2, %v8776_v28, %v8777_v27 }
 0x530   : > { %v8190_v37 = vpack.c.bf16 %v2078_v36, %v2077_v34  ;;  %v8785_v39 = vpop.permute.xlu1 %8784 }
 0x531   : > { %7307 = vmatmul.mubr.msk.f32.vlgmr.msra.gmra.mrb[10].mxu0 %vm1789_vm11, %v6534_v29  ;;  %v8787_v42 = vunpack.i.h.bf16 %v8785_v39  ;;  %v8786_v45 = vunpack.i.l.bf16 %v8785_v39 }
 0x532   : > { %8185 = vmatpush3.bf16.msra.mxu0 %v9790_v58  ;;  %7309 = vmatprep.mubr.msk.f32.mxu0 %vm1789_vm11, %v6535_v30 }
 0x533   : > { %8187 = vmatprep.subr.bf16.mxu0 %v8186_v4  ;;  %v2079_v43 = vsel %vm1067_vm2, %v8786_v45, %v8787_v42 }
 0x534   : > { %v8795_v50 = vpop.permute.xlu1 %8794  ;;  %v8194_v56 = vpack.c.bf16 %v2080_v54, %v2079_v43 }
 0x535   : > { %7310 = vmatmul.mubr.msk.f32.gmra.mrb[12].mxu0 %vm1789_vm11, %v6536_v33  ;;  %v8797_v53 = vunpack.i.h.bf16 %v8795_v50  ;;  %v8796_v55 = vunpack.i.l.bf16 %v8795_v50 }
 0x536   : > { %8189 = vmatpush3.bf16.msra.mxu0 %v8186_v4  ;;  %7312 = vmatprep.mubr.msk.f32.mxu0 %vm1789_vm11, %v6537_v35  ;;  %v8202_v4 = vpack.c.bf16 %v8802_v0, %v8801_v1 }
 0x537   : > { %8191 = vmatprep.subr.bf16.mxu0 %v8190_v37  ;;  %v8198_v58 = vpack.c.bf16 %v8797_v53, %v8796_v55 }
 0x539   : > { %7313 = vmatmul.mubr.msk.f32.gmra.mrb[14].mxu0 %vm1789_vm11, %v6538_v38 }
 0x53a   : > { %7315 = vmatprep.mubr.msk.f32.mxu0 %vm1789_vm11, %v6539_v40 }
 0x53d   : > { %7316 = vmatmul.mubr.msk.f32.gmra.mrb[16].mxu0 %vm1789_vm11, %v6540_v46 }
 0x53e   : > { %7326 = vmatprep.mubr.msk.f32.mxu0 %vm1789_vm11, %v1756_v47  ;;  %v2396_v18 = vpop.permute.xlu0 %2395 }
 0x541   : > { %7327 = vmatmul.mubr.msk.f32.vlgmr.msra.gmra.mrb[10].mxu0 %vm1789_vm11, %v1757_v51 }
 0x542   : > { %8193 = vmatpush3.bf16.msra.mxu0 %v8190_v37  ;;  %7329 = vmatprep.mubr.msk.f32.mxu0 %vm1789_vm11, %v1758_v44  ;;  %v2406_v21 = vpop.permute.xlu0 %2405 }
 0x543   : > { %8195 = vmatprep.subr.bf16.mxu0 %v8194_v56 }
 0x545   : > { %7330 = vmatmul.mubr.msk.f32.gmra.mrb[12].mxu0 %vm1789_vm11, %v1759_v57  ;;  %v2391_v19 = vpop.permute.xlu1 %2390 }
 0x546   : > { %8197 = vmatpush3.bf16.msra.mxu0 %v8194_v56  ;;  %7332 = vmatprep.mubr.msk.f32.mxu0 %vm1789_vm11, %v1760_v52  ;;  %v2416_v32 = vpop.permute.xlu0 %2415 }
 0x547   : > { %8199 = vmatprep.subr.bf16.mxu0 %v8198_v58 }
 0x549   : > { %7333 = vmatmul.mubr.msk.f32.gmra.mrb[14].mxu0 %vm1789_vm11, %v1761_v59  ;;  %v2401_v23 = vpop.permute.xlu1 %2400 }
 0x54a   : > { %7335 = vmatprep.mubr.msk.f32.mxu0 %vm1789_vm11, %v1762_v60  ;;  %v2426_v42 = vpop.permute.xlu0 %2425 }
 0x54d   : > { %7336 = vmatmul.mubr.msk.f32.gmra.mrb[16].mxu0 %vm1789_vm11, %v1763_v62  ;;  %v2411_v34 = vpop.permute.xlu1 %2410 }
 0x54e   : > { %7346 = vmatprep.mubr.msk.f32.mxu0 %vm1789_vm11, %v6557_v63 }
 0x551   : > { %7347 = vmatmul.mubr.msk.f32.vlgmr.msra.gmra.mrb[10].mxu0 %vm1789_vm11, %v6558_v2  ;;  %v2421_v47 = vpop.permute.xlu1 %2420 }
 0x552   : > { %8201 = vmatpush3.bf16.msra.mxu0 %v8198_v58  ;;  %7349 = vmatprep.mubr.msk.f32.mxu0 %vm1789_vm11, %v6559_v3 }
 0x553   : > { %8203 = vmatprep.subr.bf16.mxu0 %v8202_v4 }
 0x555   : > { %7350 = vmatmul.mubr.msk.f32.gmra.mrb[12].mxu0 %vm1789_vm11, %v6560_v5 }
 0x556   : > { %8205 = vmatpush3.bf16.msra.mxu0 %v8202_v4  ;;  %7352 = vmatprep.mubr.msk.f32.mxu0 %vm1789_vm11, %v6561_v6 }
 0x559   : > { %7353 = vmatmul.mubr.msk.f32.gmra.mrb[14].mxu0 %vm1789_vm11, %v6562_v7 }
 0x55a   : > { %7355 = vmatprep.mubr.msk.f32.mxu0 %vm1789_vm11, %v6563_v8 }
 0x55d   : > { %7356 = vmatmul.mubr.msk.f32.gmra.mrb[16].mxu0 %vm1789_vm11, %v6564_v9 }
 0x55e   : > { %7366 = vmatprep.mubr.msk.f32.mxu0 %vm1789_vm11, %v6573_v10 }
 0x561   : > { %7367 = vmatmul.mubr.msk.f32.vlgmr.msra.gmra.mrb[10].mxu0 %vm1789_vm11, %v6574_v11 }
 0x562   : > { %7369 = vmatprep.mubr.msk.f32.mxu0 %vm1789_vm11, %v6575_v12 }
 0x565   : > { %7370 = vmatmul.mubr.msk.f32.gmra.mrb[12].mxu0 %vm1789_vm11, %v6576_v13 }
 0x566   : > { %7372 = vmatprep.mubr.msk.f32.mxu0 %vm1789_vm11, %v6577_v14 }
 0x569   : > { %7373 = vmatmul.mubr.msk.f32.gmra.mrb[14].mxu0 %vm1789_vm11, %v6578_v15 }
 0x56a   : > { %7375 = vmatprep.mubr.msk.f32.mxu0 %vm1789_vm11, %v6579_v16 }
 0x56d   : > { %7376 = vmatmul.mubr.msk.f32.gmra.mrb[16].mxu0 %vm1789_vm11, %v6580_v17  ;;  %vm3569_vm11 = vcmask 1045504  }
 0x634   : > { %v7368_v22 = vpop.f32.mrb[10].mxu0 }
 0x635   : > { %v2429_v24 = vadd.f32 %v7368_v22, %v2396_v18  ;;  %v2333_v25 = vpop.f32.mrb[11].mxu0 }
 0x636   : > { %v2428_v26 = vadd.f32 %v2391_v19, %v2333_v25 }
 0x637   : > { %v2440_v27 = vsel %vm2436_vm12, %v2429_v24, 0.0 }
 0x638   : > { %2441 = vadd.xlane.f32.xlu0 %v2440_v27  ;;  %v7371_v28 = vpop.f32.mrb[12].mxu0  ;;  %v2437_v29 = vsel %vm2436_vm12, %v2428_v26, 0.0 }
 0x639   : > { %v2431_v30 = vadd.f32 %v7371_v28, %v2406_v21  ;;  %2438 = vadd.xlane.f32.xlu1 %v2437_v29  ;;  %v2343_v31 = vpop.f32.mrb[13].mxu0  ;;  %v2566_v28 = vld [vmem:[%s11388_s3] sm:$0xff]  ;;  %v2567_v29 = vld [vmem:[%s11388_s3 + $0x8] sm:$0xff] }
 0x63a   : > { %v2430_v33 = vadd.f32 %v2401_v23, %v2343_v31  ;;  %v2568_v31 = vld [vmem:[%s11388_s3 + $0x10] sm:$0xff] }
 0x63b   : > { %v2446_v35 = vsel %vm2436_vm12, %v2431_v30, 0.0 }
 0x63c   : > { %v7374_v36 = vpop.f32.mrb[14].mxu0  ;;  %v2443_v37 = vsel %vm2436_vm12, %v2430_v33, 0.0 }
 0x63d   : > { %v2433_v38 = vadd.f32 %v7374_v36, %v2416_v32  ;;  %2447 = vadd.xlane.f32.xlu1 %v2446_v35  ;;  %2444 = vadd.xlane.f32.xlu0 %v2443_v37  ;;  %v2353_v39 = vpop.f32.mrb[15].mxu0  ;;  %v2569_v32 = vld [vmem:[%s11388_s3 + $0x18] sm:$0xff]  ;;  %v2571_v35 = vld [vmem:[%s11388_s3 + $0x28] sm:$0xff]  ;;  %v2572_v37 = vld [vmem:[%s11388_s3 + $0x30] sm:$0xff] }
 0x63e   : > { %v2432_v40 = vadd.f32 %v2411_v34, %v2353_v39  ;;  %v2570_v34 = vld [vmem:[%s11388_s3 + $0x20] sm:$0xff] }
 0x63f   : > { %v2452_v41 = vsel %vm2436_vm12, %v2433_v38, 0.0  ;;  %v8214_v36 = vpack.c.bf16 %v2571_v35, %v2570_v34 }
 0x640   : > { %v7377_v45 = vpop.f32.mrb[16].mxu0  ;;  %v2449_v46 = vsel %vm2436_vm12, %v2432_v40, 0.0 }
 0x641   : > { %v2435_v48 = vadd.f32 %v7377_v45, %v2426_v42  ;;  %2453 = vadd.xlane.f32.xlu1 %v2452_v41  ;;  %2450 = vadd.xlane.f32.xlu0 %v2449_v46  ;;  %v2363_v49 = vpop.f32.mrb[17].mxu0 }
 0x642   : > { %v2434_v50 = vadd.f32 %v2421_v47, %v2363_v49 }
 0x643   : > { %v2458_v51 = vsel %vm2436_vm12, %v2435_v48, 0.0 }
 0x644   : > { %v2455_v43 = vsel %vm2436_vm12, %v2434_v50, 0.0 }
 0x645   : > { %2459 = vadd.xlane.f32.xlu1 %v2458_v51  ;;  %2456 = vadd.xlane.f32.xlu0 %v2455_v43 }
 0x6c5   : > { %v2442_v44 = vpop.xlane.xlu0 %2441 }
 0x6c6   : > { %v2463_v54 = vmul.f32 0.016666668, %v2442_v44  ;;  %v2439_v53 = vpop.xlane.xlu1 %2438 }
 0x6c7   : > { %v2462_v55 = vmul.f32 0.016666668, %v2439_v53 }
 0x6c8   : > { %v9964_v56 = vsub.f32 %v2429_v24, %v2463_v54 }
 0x6c9   : > { %v9966_v57 = vsub.f32 %v2428_v26, %v2462_v55 }
 0x6ca   : > { %v2448_v52 = vpop.xlane.xlu1 %2447  ;;  %v2445_v58 = vpop.xlane.xlu0 %2444  ;;  %v2479_v59 = vmul.f32 %v9964_v56, %v9964_v56 }
 0x6cb   : > { %v2465_v60 = vmul.f32 0.016666668, %v2448_v52  ;;  %v2464_v61 = vmul.f32 0.016666668, %v2445_v58  ;;  %v2478_v62 = vmul.f32 %v9966_v57, %v9966_v57 }
 0x6cc   : > { %v2489_v63 = vsel %vm2436_vm12, %v2479_v59, 0.0 }
 0x6cd   : > { %v9973_v0 = vsub.f32 %v2431_v30, %v2465_v60  ;;  %v9975_v1 = vsub.f32 %v2430_v33, %v2464_v61  ;;  %2490 = vadd.xlane.f32.xlu1 %v2489_v63  ;;  %v2486_v2 = vsel %vm2436_vm12, %v2478_v62, 0.0  ;;  %v8206_v30 = vpack.c.bf16 %v2567_v29, %v2566_v28 }
 0x6ce   : > { %v2454_v3 = vpop.xlane.xlu1 %2453  ;;  %v2451_v4 = vpop.xlane.xlu0 %2450  ;;  %2487 = vadd.xlane.f32.xlu0 %v2486_v2  ;;  %v8210_v33 = vpack.c.bf16 %v2569_v32, %v2568_v31 }
 0x6cf   : > { %v2467_v5 = vmul.f32 0.016666668, %v2454_v3  ;;  %v2466_v6 = vmul.f32 0.016666668, %v2451_v4  ;;  %v2481_v7 = vmul.f32 %v9973_v0, %v9973_v0  ;;  %v2480_v8 = vmul.f32 %v9975_v1, %v9975_v1  ;;  %8207 = vmatprep.subr.bf16.mxu1 %v8206_v30 }
 0x6d0   : > { %8209 = vmatpush3.bf16.msra.mxu1 %v8206_v30 }
 0x6d1   : > { %v9982_v9 = vsub.f32 %v2433_v38, %v2467_v5  ;;  %v9984_v10 = vsub.f32 %v2432_v40, %v2466_v6  ;;  %v2495_v11 = vsel %vm2436_vm12, %v2481_v7, 0.0  ;;  %v2492_v12 = vsel %vm2436_vm12, %v2480_v8, 0.0  ;;  %8211 = vmatprep.subr.bf16.mxu1 %v8210_v33  ;;  %v2573_v38 = vld [vmem:[%s11388_s3 + $0x38] sm:$0xf]  ;;  %s9026_s3 = smov 83  }
 0x6d2   : > { %2496 = vadd.xlane.f32.xlu1 %v2495_v11  ;;  %v2460_v13 = vpop.xlane.xlu1 %2459  ;;  %2493 = vadd.xlane.f32.xlu0 %v2492_v12  ;;  %v2457_v14 = vpop.xlane.xlu0 %2456  ;;  %v8218_v39 = vpack.c.bf16 %v2573_v38, %v2572_v37 }
 0x6d3   : > { %v2469_v15 = vmul.f32 0.016666668, %v2460_v13  ;;  %v2468_v16 = vmul.f32 0.016666668, %v2457_v14  ;;  %v2483_v17 = vmul.f32 %v9982_v9, %v9982_v9  ;;  %v2482_v18 = vmul.f32 %v9984_v10, %v9984_v10 }
 0x6d4   : > { %8213 = vmatpush3.bf16.msra.mxu1 %v8210_v33 }
 0x6d5   : > { %v9992_v19 = vsub.f32 %v2435_v48, %v2469_v15  ;;  %v9994_v21 = vsub.f32 %v2434_v50, %v2468_v16  ;;  %v2501_v22 = vsel %vm2436_vm12, %v2483_v17, 0.0  ;;  %v2498_v23 = vsel %vm2436_vm12, %v2482_v18, 0.0  ;;  %8215 = vmatprep.subr.bf16.mxu1 %v8214_v36 }
 0x6d6   : > { %2502 = vadd.xlane.f32.xlu1 %v2501_v22  ;;  %2499 = vadd.xlane.f32.xlu0 %v2498_v23 }
 0x6d7   : > { %v2485_v24 = vmul.f32 %v9992_v19, %v9992_v19  ;;  %v2484_v25 = vmul.f32 %v9994_v21, %v9994_v21 }
 0x6d8   : > { %8217 = vmatpush3.bf16.msra.mxu1 %v8214_v36 }
 0x6d9   : > { %v2507_v26 = vsel %vm2436_vm12, %v2485_v24, 0.0  ;;  %v2504_v27 = vsel %vm2436_vm12, %v2484_v25, 0.0  ;;  %8220 = vmatprep.subr.msk.bf16.mxu1 %vm8219_vm15, %v8218_v39 }
 0x6da   : > { %2508 = vadd.xlane.f32.xlu1 %v2507_v26  ;;  %2505 = vadd.xlane.f32.xlu0 %v2504_v27 }
 0x6dc   : > { %8223 = vmatpush3.bf16.msk.msra.mxu1 %vm8219_vm15, %v8218_v39 }
 0x75a   : > { %v2491_v40 = vpop.xlane.xlu1 %2490 }
 0x75b   : > { %v2511_v41 = vmul.f32 0.016666668, %v2491_v40  ;;  %v2488_v42 = vpop.xlane.xlu0 %2487 }
 0x75c   : > { %v2510_v45 = vmul.f32 0.016666668, %v2488_v42 }
 0x75d   : > { %v2519_v46 = vadd.f32 1e-05, %v2511_v41 }
 0x75e   : > { %v2518_v47 = vadd.f32 1e-05, %v2510_v45  ;;  %v6598_v45 = vld [vmem:[%s11389_s29 + $0x40] sm:$0xff] }
 0x75f   : > { %8931 = vrsqrt.f32 %v2519_v46  ;;  %v2497_v48 = vpop.xlane.xlu1 %2496  ;;  %v2494_v49 = vpop.xlane.xlu0 %2493 }
 0x760   : > { %8933 = vrsqrt.f32 %v2518_v47  ;;  %v2513_v50 = vmul.f32 0.016666668, %v2497_v48  ;;  %v2512_v51 = vmul.f32 0.016666668, %v2494_v49 }
 0x762   : > { %v2521_v43 = vadd.f32 1e-05, %v2513_v50  ;;  %v2520_v44 = vadd.f32 1e-05, %v2512_v51 }
 0x763   : > { %v2503_v54 = vpop.xlane.xlu1 %2502  ;;  %v2500_v53 = vpop.xlane.xlu0 %2499 }
 0x764   : > { %8935 = vrsqrt.f32 %v2521_v43  ;;  %v2515_v55 = vmul.f32 0.016666668, %v2503_v54  ;;  %v2514_v52 = vmul.f32 0.016666668, %v2500_v53  ;;  %v3355_v43 = vld [vmem:[%s11336_s9] sm:$0xff]  ;;  %v3356_v54 = vld [vmem:[%s11336_s9 + $0x8] sm:$0xff] }
 0x765   : > { %8937 = vrsqrt.f32 %v2520_v44  ;;  %v3357_v44 = vld [vmem:[%s11336_s9 + $0x10] sm:$0xff]  ;;  %v3359_v53 = vld [vmem:[%s11336_s9 + $0x20] sm:$0xff] }
 0x766   : > { %v2523_v58 = vadd.f32 1e-05, %v2515_v55  ;;  %v2522_v59 = vadd.f32 1e-05, %v2514_v52  ;;  %v3358_v55 = vld [vmem:[%s11336_s9 + $0x18] sm:$0xff]  ;;  %v3361_v52 = vld [vmem:[%s11336_s9 + $0x30] sm:$0xff] }
 0x767   : > { %v2509_v60 = vpop.xlane.xlu1 %2508  ;;  %v2506_v61 = vpop.xlane.xlu0 %2505 }
 0x768   : > { %8939 = vrsqrt.f32 %v2523_v58  ;;  %v2517_v62 = vmul.f32 0.016666668, %v2509_v60  ;;  %v2516_v63 = vmul.f32 0.016666668, %v2506_v61  ;;  %v3360_v58 = vld [vmem:[%s11336_s9 + $0x28] sm:$0xff] }
 0x769   : > { %v8932_v2 = vpop.eup %8931  ;;  %8941 = vrsqrt.f32 %v2522_v59  ;;  %v3362_v59 = vld [vmem:[%s11336_s9 + $0x38] sm:$0xff] }
 0x76a   : > { %v8934_v3 = vpop.eup %8933  ;;  %v2525_v4 = vadd.f32 1e-05, %v2517_v62  ;;  %v2524_v5 = vadd.f32 1e-05, %v2516_v63  ;;  %v2535_v6 = vmul.f32 %v8932_v2, %v9964_v56 }
 0x76b   : > { %v2534_v7 = vmul.f32 %v8934_v3, %v9966_v57 }
 0x76c   : > { %8943 = vrsqrt.f32 %v2525_v4  ;;  %v2551_v8 = vmul.f32 0.01, %v2535_v6  ;;  %vm2543_vm1 = vcmp.ge.f32.partialorder %v2535_v6, 0.0 }
 0x76d   : > { %8945 = vrsqrt.f32 %v2524_v5  ;;  %vm2542_vm0 = vcmp.ge.f32.partialorder %v2534_v7, 0.0  ;;  %v2550_v11 = vmul.f32 0.01, %v2534_v7 }
 0x76e   : > { %v8936_v12 = vpop.eup %8935  ;;  %v2559_v16 = vsel %vm2543_vm1, %v2535_v6, %v2551_v8 }
 0x76f   : > { %v8938_v13 = vpop.eup %8937  ;;  %v2558_v14 = vsel %vm2542_vm0, %v2534_v7, %v2550_v11  ;;  %v2537_v15 = vmul.f32 %v8936_v12, %v9973_v0 }
 0x770   : > { %7394 = vmatprep.mubr.msk.f32.mxu1 %vm2436_vm12, %v2558_v14  ;;  %v2536_v17 = vmul.f32 %v8938_v13, %v9975_v1 }
 0x771   : > { %7395 = vmatmul.mubr.msk.f32.vlgmr.msra.gmra.mrb[14].mxu1 %vm2436_vm12, %v2559_v16  ;;  %vm2545_vm2 = vcmp.ge.f32.partialorder %v2537_v15, 0.0  ;;  %v2553_v56 = vmul.f32 0.01, %v2537_v15  ;;  %v6599_v16 = vld [vmem:[%s11389_s29 + $0x48] sm:$0xff] }
 0x772   : > { %v8940_v57 = vpop.eup %8939  ;;  %vm2544_vm3 = vcmp.ge.f32.partialorder %v2536_v17, 0.0  ;;  %v2552_v18 = vmul.f32 0.01, %v2536_v17 }
 0x773   : > { %v8942_v22 = vpop.eup %8941  ;;  %v2561_v23 = vsel %vm2545_vm2, %v2537_v15, %v2553_v56  ;;  %v2539_v24 = vmul.f32 %v8940_v57, %v9982_v9  ;;  %v6601_v56 = vld [vmem:[%s11389_s29 + $0x58] sm:$0xff]  ;;  %v6602_v57 = vld [vmem:[%s11389_s29 + $0x60] sm:$0xff] }
 0x774   : > { %v2560_v25 = vsel %vm2544_vm3, %v2536_v17, %v2552_v18  ;;  %v2538_v26 = vmul.f32 %v8942_v22, %v9984_v10  ;;  %v6600_v17 = vld [vmem:[%s11389_s29 + $0x50] sm:$0xff]  ;;  %v6603_v22 = vld [vmem:[%s11389_s29 + $0x68] sm:$0xff] }
 0x775   : > { %7397 = vmatprep.mubr.msk.f32.mxu1 %vm2436_vm12, %v2560_v25  ;;  %vm2547_vm5 = vcmp.ge.f32.partialorder %v2539_v24, 0.0  ;;  %v2555_v0 = vmul.f32 0.01, %v2539_v24 }
 0x776   : > { %v8944_v27 = vpop.eup %8943  ;;  %7398 = vmatmul.mubr.msk.f32.gmra.mrb[16].mxu1 %vm2436_vm12, %v2561_v23  ;;  %vm2546_vm6 = vcmp.ge.f32.partialorder %v2538_v26, 0.0  ;;  %v2554_v1 = vmul.f32 0.01, %v2538_v26  ;;  %v6604_v23 = vld [vmem:[%s11389_s29 + $0x70] sm:$0xff] }
 0x777   : > { %v8946_v28 = vpop.eup %8945  ;;  %v2563_v29 = vsel %vm2547_vm5, %v2539_v24, %v2555_v0  ;;  %v2541_v30 = vmul.f32 %v8944_v27, %v9992_v19  ;;  %v6605_v0 = vld [vmem:[%s11389_s29 + $0x78] sm:$0xff]  ;;  %v2707_v27 = vld [vmem:[%s11389_s29] sm:$0xff] }
 0x778   : > { %v2562_v31 = vsel %vm2546_vm6, %v2538_v26, %v2554_v1  ;;  %v2540_v32 = vmul.f32 %v8946_v28, %v9994_v21  ;;  %vm4741_vm6 = vcmask 121856  }
 0x779   : > { %7400 = vmatprep.mubr.msk.f32.mxu1 %vm2436_vm12, %v2562_v31  ;;  %vm2549_vm7 = vcmp.ge.f32.partialorder %v2541_v30, 0.0  ;;  %v2557_v9 = vmul.f32 0.01, %v2541_v30  ;;  %v2708_v31 = vld [vmem:[%s11389_s29 + $0x8] sm:$0xff] }
 0x77a   : > { %7401 = vmatmul.mubr.msk.f32.gmra.mrb[18].mxu1 %vm2436_vm12, %v2563_v29  ;;  %vm2548_vm8 = vcmp.ge.f32.partialorder %v2540_v32, 0.0  ;;  %v2556_v10 = vmul.f32 0.01, %v2540_v32 }
 0x77b   : > { %v2565_v33 = vsel %vm2549_vm7, %v2541_v30, %v2557_v9 }
 0x77c   : > { %v2564_v34 = vsel %vm2548_vm8, %v2540_v32, %v2556_v10  ;;  %v2709_v32 = vld [vmem:[%s11389_s29 + $0x10] sm:$0xff] }
 0x77d   : > { %7403 = vmatprep.mubr.msk.f32.mxu1 %vm2436_vm12, %v2564_v34 }
 0x77e   : > { %7404 = vmatmul.mubr.msk.f32.gmra.mrb[20].mxu1 %vm2436_vm12, %v2565_v33  ;;  %vm8293_vm12 = vmpackc.low %vm3569_vm11, %vm9022_vm14 }
 0x77f   : > { %7422 = vmatprep.mubr.msk.f32.mxu1 %vm2756_vm9, %v6598_v45 }
 0x844   : > { %v7396_v35 = vpop.f32.mrb[14].mxu1 }
 0x845   : > { %v2668_v36 = vpop.f32.mrb[15].mxu1 }
 0x846   : > { %v8803_v19 = vpack.i.bf16 %v7396_v35, %v2668_v36  ;;  %v10045_v37 = vpack.c.bf16 %v7396_v35, %v2668_v36  ;;  %v2710_v35 = vld [vmem:[%s11389_s29 + $0x18] sm:$0xff]  ;;  %v2711_v36 = vld [vmem:[%s11389_s29 + $0x20] sm:$0xff] }
 0x848   : > { %8804 = vrot.lane.b32.xlu0 %v8803_v19, %s11366_s1 }
 0x849   : > { %v7399_v21 = vpop.f32.mrb[16].mxu1 }
 0x84a   : > { %v2678_v38 = vpop.f32.mrb[17].mxu1 }
 0x84b   : > { %v8808_v39 = vpack.i.bf16 %v7399_v21, %v2678_v38  ;;  %v10048_v40 = vpack.c.bf16 %v7399_v21, %v2678_v38 }
 0x84d   : > { %8809 = vrot.lane.b32.xlu1 %v8808_v39, %s11366_s1  ;;  %v7402_v41 = vpop.f32.mrb[18].mxu1 }
 0x84e   : > { %v2688_v42 = vpop.f32.mrb[19].mxu1 }
 0x84f   : > { %v8813_v46 = vpack.i.bf16 %v7402_v41, %v2688_v42  ;;  %v10055_v47 = vpack.c.bf16 %v7402_v41, %v2688_v42 }
 0x851   : > { %8814 = vrot.lane.b32.xlu1 %v8813_v46, %s11366_s1  ;;  %v7405_v48 = vpop.f32.mrb[20].mxu1 }
 0x852   : > { %v2698_v49 = vpop.f32.mrb[21].mxu1 }
 0x853   : > { %v8818_v50 = vpack.i.bf16 %v7405_v48, %v2698_v49  ;;  %v10058_v51 = vpack.c.bf16 %v7405_v48, %v2698_v49  ;;  %v6622_v48 = vld [vmem:[%s11389_s29 + $0x80] sm:$0xff] }
 0x855   : > { %8824 = vrot.lane.b32.xlu1 %v8803_v19, %s11390_s26  ;;  %8819 = vrot.lane.b32.xlu0 %v8818_v50, %s11366_s1 }
 0x859   : > { %8834 = vrot.lane.b32.xlu1 %v8813_v46, %s11390_s26  ;;  %8829 = vrot.lane.b32.xlu0 %v8808_v39, %s11390_s26 }
 0x85d   : > { %8844 = vrot.lane.b32.xlu1 %v8803_v19, %s9024_s27  ;;  %8839 = vrot.lane.b32.xlu0 %v8818_v50, %s11390_s26 }
 0x861   : > { %8854 = vrot.lane.b32.xlu1 %v8813_v46, %s9024_s27  ;;  %8849 = vrot.lane.b32.xlu0 %v8808_v39, %s9024_s27  ;;  %v2712_v39 = vld [vmem:[%s11389_s29 + $0x28] sm:$0xff] }
 0x865   : > { %3365 = vperm.xlu1 %8762, %v3355_v43   ;;  %8859 = vrot.lane.b32.xlu0 %v8818_v50, %s9024_s27 }
 0x869   : > { %3375 = vperm.xlu1 %8762, %v3357_v44   ;;  %3370 = vperm.xlu0 %8761, %v3356_v54   ;;  %v6623_v44 = vld [vmem:[%s11389_s29 + $0x88] sm:$0xff]  ;;  %v6624_v54 = vld [vmem:[%s11389_s29 + $0x90] sm:$0xff] }
 0x86d   : > { %3385 = vperm.xlu1 %8762, %v3359_v53   ;;  %3380 = vperm.xlu0 %8761, %v3358_v55  }
 0x871   : > { %3395 = vperm.xlu1 %8762, %v3361_v52   ;;  %3390 = vperm.xlu0 %8761, %v3360_v58  }
 0x875   : > { %3400 = vperm.xlu0 %8761, %v3362_v59   ;;  %v6625_v59 = vld [vmem:[%s11389_s29 + $0x98] sm:$0xff] }
 0x8ba   : > { %v8805_v60 = vpop.permute.xlu0 %8804 }
 0x8bb   : > { %v8807_v61 = vunpack.i.h.bf16 %v8805_v60  ;;  %v8806_v62 = vunpack.i.l.bf16 %v8805_v60  ;;  %v6626_v60 = vld [vmem:[%s11389_s29 + $0xa0] sm:$0xff] }
 0x8bd   : > { %v8224_v63 = vpack.c.bf16 %v8807_v61, %v8806_v62 }
 0x8bf   : > { %v8810_v2 = vpop.permute.xlu1 %8809  ;;  %8225 = vmatprep.subr.bf16.mxu1 %v8224_v63 }
 0x8c0   : > { %v8812_v3 = vunpack.i.h.bf16 %v8810_v2  ;;  %v8811_v4 = vunpack.i.l.bf16 %v8810_v2  ;;  %8227 = vmatpush3.bf16.msra.mxu1 %v8224_v63  ;;  %v6627_v2 = vld [vmem:[%s11389_s29 + $0xa8] sm:$0xff] }
 0x8c2   : > { %v8228_v5 = vpack.c.bf16 %v8812_v3, %v8811_v4  ;;  %v6628_v3 = vld [vmem:[%s11389_s29 + $0xb0] sm:$0xff] }
 0x8c3   : > { %v8815_v6 = vpop.permute.xlu1 %8814 }
 0x8c4   : > { %v8817_v7 = vunpack.i.h.bf16 %v8815_v6  ;;  %v8816_v8 = vunpack.i.l.bf16 %v8815_v6  ;;  %8229 = vmatprep.subr.bf16.mxu1 %v8228_v5  ;;  %v6638_v6 = vld [vmem:[%s11389_s29 + $0xc0] sm:$0xff] }
 0x8c5   : > { %8231 = vmatpush3.bf16.msra.mxu1 %v8228_v5  ;;  %v6629_v5 = vld [vmem:[%s11389_s29 + $0xb8] sm:$0xff] }
 0x8c6   : > { %v8232_v11 = vpack.c.bf16 %v8817_v7, %v8816_v8  ;;  %v6639_v7 = vld [vmem:[%s11389_s29 + $0xc8] sm:$0xff]  ;;  %v6640_v8 = vld [vmem:[%s11389_s29 + $0xd0] sm:$0xff] }
 0x8c7   : > { %v8820_v12 = vpop.permute.xlu0 %8819  ;;  %v8825_v18 = vpop.permute.xlu1 %8824 }
 0x8c8   : > { %v8822_v13 = vunpack.i.h.bf16 %v8820_v12  ;;  %v8821_v14 = vunpack.i.l.bf16 %v8820_v12  ;;  %8233 = vmatprep.subr.bf16.mxu1 %v8232_v11  ;;  %v8827_v24 = vunpack.i.h.bf16 %v8825_v18  ;;  %v8826_v25 = vunpack.i.l.bf16 %v8825_v18  ;;  %v6642_v12 = vld [vmem:[%s11389_s29 + $0xe0] sm:$0xff] }
 0x8c9   : > { %8235 = vmatpush3.bf16.msra.mxu1 %v8232_v11  ;;  %v6641_v11 = vld [vmem:[%s11389_s29 + $0xd8] sm:$0xff] }
 0x8ca   : > { %v8236_v15 = vpack.c.bf16 %v8822_v13, %v8821_v14  ;;  %v8256_v29 = vpack.c.bf16 %v8827_v24, %v8826_v25  ;;  %v6643_v13 = vld [vmem:[%s11389_s29 + $0xe8] sm:$0xff]  ;;  %v6644_v14 = vld [vmem:[%s11389_s29 + $0xf0] sm:$0xff] }
 0x8cb   : > { %v8830_v26 = vpop.permute.xlu0 %8829  ;;  %v8835_v30 = vpop.permute.xlu1 %8834 }
 0x8cc   : > { %8237 = vmatprep.subr.bf16.mxu1 %v8236_v15  ;;  %v8832_v1 = vunpack.i.h.bf16 %v8830_v26  ;;  %v8831_v28 = vunpack.i.l.bf16 %v8830_v26  ;;  %v8837_v9 = vunpack.i.h.bf16 %v8835_v30  ;;  %v8836_v10 = vunpack.i.l.bf16 %v8835_v30 }
 0x8cd   : > { %8239 = vmatpush3.bf16.msra.mxu1 %v8236_v15  ;;  %v6645_v15 = vld [vmem:[%s11389_s29 + $0xf8] sm:$0xff] }
 0x8ce   : > { %8241 = vmatprep.subr.bf16.mxu1 %v10045_v37  ;;  %v8260_v33 = vpack.c.bf16 %v8832_v1, %v8831_v28  ;;  %v8264_v21 = vpack.c.bf16 %v8837_v9, %v8836_v10 }
 0x8cf   : > { %v8840_v34 = vpop.permute.xlu0 %8839  ;;  %v8845_v38 = vpop.permute.xlu1 %8844 }
 0x8d0   : > { %7423 = vmatmul.mubr.msk.f32.vlgmr.msra.gmra.mrb[22].mxu1 %vm2756_vm9, %v6599_v16  ;;  %v8842_v19 = vunpack.i.h.bf16 %v8840_v34  ;;  %v8847_v41 = vunpack.i.h.bf16 %v8845_v38  ;;  %v8846_v42 = vunpack.i.l.bf16 %v8845_v38 }
 0x8d1   : > { %8243 = vmatpush3.bf16.msra.mxu1 %v10045_v37  ;;  %7425 = vmatprep.mubr.msk.f32.mxu1 %vm2756_vm9, %v6600_v17  ;;  %v8841_v37 = vunpack.i.l.bf16 %v8840_v34 }
 0x8d2   : > { %8245 = vmatprep.subr.bf16.mxu1 %v10048_v40 }
 0x8d3   : > { %v8268_v45 = vpack.c.bf16 %v8842_v19, %v8841_v37  ;;  %v8850_v46 = vpop.permute.xlu0 %8849  ;;  %v8855_v43 = vpop.permute.xlu1 %8854 }
 0x8d4   : > { %7426 = vmatmul.mubr.msk.f32.gmra.mrb[24].mxu1 %vm2756_vm9, %v6601_v56  ;;  %v8852_v49 = vunpack.i.h.bf16 %v8850_v46  ;;  %v8851_v50 = vunpack.i.l.bf16 %v8850_v46  ;;  %v8857_v53 = vunpack.i.h.bf16 %v8855_v43  ;;  %v8856_v55 = vunpack.i.l.bf16 %v8855_v43 }
 0x8d5   : > { %8247 = vmatpush3.bf16.msra.mxu1 %v10048_v40  ;;  %7428 = vmatprep.mubr.msk.f32.mxu1 %vm2756_vm9, %v6602_v57  ;;  %v2713_v40 = vld [vmem:[%s11389_s29 + $0x30] sm:$0xff] }
 0x8d6   : > { %8249 = vmatprep.subr.bf16.mxu1 %v10055_v47  ;;  %v8276_v52 = vpack.c.bf16 %v8852_v49, %v8851_v50  ;;  %v8280_v63 = vpack.c.bf16 %v8857_v53, %v8856_v55 }
 0x8d7   : > { %v8860_v58 = vpop.permute.xlu0 %8859 }
 0x8d8   : > { %7429 = vmatmul.mubr.msk.f32.gmra.mrb[26].mxu1 %vm2756_vm9, %v6603_v22  ;;  %v8862_v61 = vunpack.i.h.bf16 %v8860_v58  ;;  %v8861_v62 = vunpack.i.l.bf16 %v8860_v58 }
 0x8d9   : > { %8251 = vmatpush3.bf16.msra.mxu1 %v10055_v47  ;;  %7431 = vmatprep.mubr.msk.f32.mxu1 %vm2756_vm9, %v6604_v23  ;;  %v2714_v47 = vld [vmem:[%s11389_s29 + $0x38] sm:$0xff] }
 0x8da   : > { %8253 = vmatprep.subr.bf16.mxu1 %v10058_v51  ;;  %v8284_v4 = vpack.c.bf16 %v8862_v61, %v8861_v62 }
 0x8dc   : > { %7432 = vmatmul.mubr.msk.f32.gmra.mrb[28].mxu1 %vm2756_vm9, %v6605_v0 }
 0x8dd   : > { %8255 = vmatpush3.bf16.msra.mxu1 %v10058_v51  ;;  %7450 = vmatprep.mubr.msk.f32.mxu1 %vm2756_vm9, %v2707_v27  ;;  %v8272_v51 = vpack.c.bf16 %v8847_v41, %v8846_v42 }
 0x8de   : > { %8257 = vmatprep.subr.bf16.mxu1 %v8256_v29 }
 0x8e0   : > { %7451 = vmatmul.mubr.msk.f32.vlgmr.msra.gmra.mrb[22].mxu1 %vm2756_vm9, %v2708_v31 }
 0x8e1   : > { %8259 = vmatpush3.bf16.msra.mxu1 %v8256_v29  ;;  %7453 = vmatprep.mubr.msk.f32.mxu1 %vm2756_vm9, %v2709_v32 }
 0x8e2   : > { %8261 = vmatprep.subr.bf16.mxu1 %v8260_v33 }
 0x8e4   : > { %7454 = vmatmul.mubr.msk.f32.gmra.mrb[24].mxu1 %vm2756_vm9, %v2710_v35  ;;  %v3366_v17 = vpop.permute.xlu1 %3365 }
 0x8e5   : > { %8263 = vmatpush3.bf16.msra.mxu1 %v8260_v33  ;;  %7456 = vmatprep.mubr.msk.f32.mxu1 %vm2756_vm9, %v2711_v36 }
 0x8e6   : > { %8265 = vmatprep.subr.bf16.mxu1 %v8264_v21 }
 0x8e8   : > { %7457 = vmatmul.mubr.msk.f32.gmra.mrb[26].mxu1 %vm2756_vm9, %v2712_v39  ;;  %v3371_v16 = vpop.permute.xlu0 %3370  ;;  %v3376_v18 = vpop.permute.xlu1 %3375 }
 0x8e9   : > { %8267 = vmatpush3.bf16.msra.mxu1 %v8264_v21  ;;  %7459 = vmatprep.mubr.msk.f32.mxu1 %vm2756_vm9, %v2713_v40 }
 0x8ea   : > { %8269 = vmatprep.subr.bf16.mxu1 %v8268_v45 }
 0x8ec   : > { %7460 = vmatmul.mubr.msk.f32.gmra.mrb[28].mxu1 %vm2756_vm9, %v2714_v47  ;;  %v3381_v56 = vpop.permute.xlu0 %3380  ;;  %v3386_v30 = vpop.permute.xlu1 %3385 }
 0x8ed   : > { %8271 = vmatpush3.bf16.msra.mxu1 %v8268_v45  ;;  %7478 = vmatprep.mubr.msk.f32.mxu1 %vm2756_vm9, %v6622_v48 }
 0x8ee   : > { %8273 = vmatprep.subr.bf16.mxu1 %v8272_v51 }
 0x8f0   : > { %7479 = vmatmul.mubr.msk.f32.vlgmr.msra.gmra.mrb[22].mxu1 %vm2756_vm9, %v6623_v44  ;;  %v3391_v28 = vpop.permute.xlu0 %3390  ;;  %v3396_v21 = vpop.permute.xlu1 %3395 }
 0x8f1   : > { %8275 = vmatpush3.bf16.msra.mxu1 %v8272_v51  ;;  %7481 = vmatprep.mubr.msk.f32.mxu1 %vm2756_vm9, %v6624_v54 }
 0x8f2   : > { %8277 = vmatprep.subr.bf16.mxu1 %v8276_v52 }
 0x8f4   : > { %7482 = vmatmul.mubr.msk.f32.gmra.mrb[24].mxu1 %vm2756_vm9, %v6625_v59  ;;  %v3401_v36 = vpop.permute.xlu0 %3400 }
 0x8f5   : > { %8279 = vmatpush3.bf16.msra.mxu1 %v8276_v52  ;;  %7484 = vmatprep.mubr.msk.f32.mxu1 %vm2756_vm9, %v6626_v60 }
 0x8f6   : > { %8281 = vmatprep.subr.bf16.mxu1 %v8280_v63 }
 0x8f8   : > { %7485 = vmatmul.mubr.msk.f32.gmra.mrb[26].mxu1 %vm2756_vm9, %v6627_v2 }
 0x8f9   : > { %8283 = vmatpush3.bf16.msra.mxu1 %v8280_v63  ;;  %7487 = vmatprep.mubr.msk.f32.mxu1 %vm2756_vm9, %v6628_v3 }
 0x8fa   : > { %8285 = vmatprep.subr.bf16.mxu1 %v8284_v4 }
 0x8fc   : > { %7488 = vmatmul.mubr.msk.f32.gmra.mrb[28].mxu1 %vm2756_vm9, %v6629_v5 }
 0x8fd   : > { %8287 = vmatpush3.bf16.msra.mxu1 %v8284_v4  ;;  %7506 = vmatprep.mubr.msk.f32.mxu1 %vm2756_vm9, %v6638_v6 }
 0x900   : > { %7507 = vmatmul.mubr.msk.f32.vlgmr.msra.gmra.mrb[22].mxu1 %vm2756_vm9, %v6639_v7 }
 0x901   : > { %7509 = vmatprep.mubr.msk.f32.mxu1 %vm2756_vm9, %v6640_v8 }
 0x904   : > { %7510 = vmatmul.mubr.msk.f32.gmra.mrb[24].mxu1 %vm2756_vm9, %v6641_v11 }
 0x905   : > { %7512 = vmatprep.mubr.msk.f32.mxu1 %vm2756_vm9, %v6642_v12 }
 0x908   : > { %7513 = vmatmul.mubr.msk.f32.gmra.mrb[26].mxu1 %vm2756_vm9, %v6643_v13 }
 0x909   : > { %7515 = vmatprep.mubr.msk.f32.mxu1 %vm2756_vm9, %v6644_v14 }
 0x90c   : > { %7516 = vmatmul.mubr.msk.f32.gmra.mrb[28].mxu1 %vm2756_vm9, %v6645_v15 }
 0x9d3   : > { %v7508_v57 = vpop.f32.mrb[22].mxu1 }
 0x9d4   : > { %v3404_v22 = vadd.f32 %v7508_v57, %v3371_v16  ;;  %v3308_v23 = vpop.f32.mrb[23].mxu1 }
 0x9d5   : > { %v3403_v24 = vadd.f32 %v3366_v17, %v3308_v23 }
 0x9d6   : > { %v3415_v25 = vsel %vm3411_vm10, %v3404_v22, 0.0 }
 0x9d7   : > { %3416 = vadd.xlane.f32.xlu0 %v3415_v25  ;;  %v7511_v26 = vpop.f32.mrb[24].mxu1  ;;  %v3412_v0 = vsel %vm3411_vm10, %v3403_v24, 0.0 }
 0x9d8   : > { %v3406_v27 = vadd.f32 %v7511_v26, %v3381_v56  ;;  %3413 = vadd.xlane.f32.xlu1 %v3412_v0  ;;  %v3318_v1 = vpop.f32.mrb[25].mxu1  ;;  %v3541_v26 = vld [vmem:[%s11337_s10] sm:$0xff]  ;;  %v3542_v0 = vld [vmem:[%s11337_s10 + $0x8] sm:$0xff] }
 0x9d9   : > { %v3405_v29 = vadd.f32 %v3376_v18, %v3318_v1  ;;  %v3543_v1 = vld [vmem:[%s11337_s10 + $0x10] sm:$0xff] }
 0x9da   : > { %v3421_v31 = vsel %vm3411_vm10, %v3406_v27, 0.0 }
 0x9db   : > { %v7514_v32 = vpop.f32.mrb[26].mxu1  ;;  %v3418_v9 = vsel %vm3411_vm10, %v3405_v29, 0.0 }
 0x9dc   : > { %v3408_v10 = vadd.f32 %v7514_v32, %v3391_v28  ;;  %3422 = vadd.xlane.f32.xlu1 %v3421_v31  ;;  %3419 = vadd.xlane.f32.xlu0 %v3418_v9  ;;  %v3328_v33 = vpop.f32.mrb[27].mxu1  ;;  %v3544_v28 = vld [vmem:[%s11337_s10 + $0x18] sm:$0x3f] }
 0x9dd   : > { %v3407_v34 = vadd.f32 %v3386_v30, %v3328_v33 }
 0x9de   : > { %v3427_v35 = vsel %vm3411_vm10, %v3408_v10, 0.0 }
 0x9df   : > { %v7517_v19 = vpop.f32.mrb[28].mxu1  ;;  %v3424_v37 = vsel %vm3411_vm10, %v3407_v34, 0.0 }
 0x9e0   : > { %v3410_v38 = vadd.f32 %v7517_v19, %v3401_v36  ;;  %3428 = vadd.xlane.f32.xlu1 %v3427_v35  ;;  %3425 = vadd.xlane.f32.xlu0 %v3424_v37  ;;  %v3338_v39 = vpop.f32.mrb[29].mxu1 }
 0x9e1   : > { %v3409_v40 = vadd.f32 %v3396_v21, %v3338_v39 }
 0x9e2   : > { %v3433_v41 = vsel %vm3411_vm10, %v3410_v38, 0.0 }
 0x9e3   : > { %v3430_v42 = vsel %vm3411_vm10, %v3409_v40, 0.0 }
 0x9e4   : > { %3434 = vadd.xlane.f32.xlu1 %v3433_v41  ;;  %3431 = vadd.xlane.f32.xlu0 %v3430_v42 }
 0xa64   : > { %v3417_v45 = vpop.xlane.xlu0 %3416 }
 0xa65   : > { %v3438_v46 = vmul.f32 0.033333335, %v3417_v45  ;;  %v3414_v47 = vpop.xlane.xlu1 %3413 }
 0xa66   : > { %v3437_v48 = vmul.f32 0.033333335, %v3414_v47 }
 0xa67   : > { %v10229_v49 = vsub.f32 %v3404_v22, %v3438_v46 }
 0xa68   : > { %v10231_v50 = vsub.f32 %v3403_v24, %v3437_v48 }
 0xa69   : > { %v3423_v51 = vpop.xlane.xlu1 %3422  ;;  %v3420_v43 = vpop.xlane.xlu0 %3419  ;;  %v3454_v44 = vmul.f32 %v10229_v49, %v10229_v49 }
 0xa6a   : > { %v3440_v54 = vmul.f32 0.033333335, %v3423_v51  ;;  %v3439_v53 = vmul.f32 0.033333335, %v3420_v43  ;;  %v3453_v55 = vmul.f32 %v10231_v50, %v10231_v50 }
 0xa6b   : > { %v3464_v52 = vsel %vm3411_vm10, %v3454_v44, 0.0 }
 0xa6c   : > { %v10238_v58 = vsub.f32 %v3406_v27, %v3440_v54  ;;  %v10240_v59 = vsub.f32 %v3405_v29, %v3439_v53  ;;  %3465 = vadd.xlane.f32.xlu1 %v3464_v52  ;;  %v3461_v60 = vsel %vm3411_vm10, %v3453_v55, 0.0  ;;  %v8288_v27 = vpack.c.bf16 %v3542_v0, %v3541_v26 }
 0xa6d   : > { %v3429_v61 = vpop.xlane.xlu1 %3428  ;;  %v3426_v62 = vpop.xlane.xlu0 %3425  ;;  %3462 = vadd.xlane.f32.xlu0 %v3461_v60  ;;  %v8292_v29 = vpack.c.bf16 %v3544_v28, %v3543_v1 }
 0xa6e   : > { %v3442_v63 = vmul.f32 0.033333335, %v3429_v61  ;;  %v3441_v2 = vmul.f32 0.033333335, %v3426_v62  ;;  %v3456_v3 = vmul.f32 %v10238_v58, %v10238_v58  ;;  %v3455_v4 = vmul.f32 %v10240_v59, %v10240_v59  ;;  %8289 = vmatprep.subr.bf16.mxu0 %v8288_v27 }
 0xa6f   : > { %8291 = vmatpush3.bf16.msra.mxu0 %v8288_v27 }
 0xa70   : > { %v10247_v5 = vsub.f32 %v3408_v10, %v3442_v63  ;;  %v10249_v6 = vsub.f32 %v3407_v34, %v3441_v2  ;;  %v3470_v7 = vsel %vm3411_vm10, %v3456_v3, 0.0  ;;  %v3467_v8 = vsel %vm3411_vm10, %v3455_v4, 0.0  ;;  %8294 = vmatprep.subr.msk.bf16.mxu0 %vm8293_vm12, %v8292_v29 }
 0xa71   : > { %3471 = vadd.xlane.f32.xlu1 %v3470_v7  ;;  %v3435_v11 = vpop.xlane.xlu1 %3434  ;;  %3468 = vadd.xlane.f32.xlu0 %v3467_v8  ;;  %v3432_v12 = vpop.xlane.xlu0 %3431 }
 0xa72   : > { %v3444_v13 = vmul.f32 0.033333335, %v3435_v11  ;;  %v3443_v14 = vmul.f32 0.033333335, %v3432_v12  ;;  %v3458_v15 = vmul.f32 %v10247_v5, %v10247_v5  ;;  %v3457_v16 = vmul.f32 %v10249_v6, %v10249_v6 }
 0xa73   : > { %8297 = vmatpush3.bf16.msk.msra.mxu0 %vm8293_vm12, %v8292_v29 }
 0xa74   : > { %v10257_v17 = vsub.f32 %v3410_v38, %v3444_v13  ;;  %v10259_v56 = vsub.f32 %v3409_v40, %v3443_v14  ;;  %v3476_v57 = vsel %vm3411_vm10, %v3458_v15, 0.0  ;;  %v3473_v18 = vsel %vm3411_vm10, %v3457_v16, 0.0 }
 0xa75   : > { %3477 = vadd.xlane.f32.xlu1 %v3476_v57  ;;  %3474 = vadd.xlane.f32.xlu0 %v3473_v18 }
 0xa76   : > { %v3460_v22 = vmul.f32 %v10257_v17, %v10257_v17  ;;  %v3459_v23 = vmul.f32 %v10259_v56, %v10259_v56 }
 0xa78   : > { %v3482_v24 = vsel %vm3411_vm10, %v3460_v22, 0.0  ;;  %v3479_v25 = vsel %vm3411_vm10, %v3459_v23, 0.0 }
 0xa79   : > { %3483 = vadd.xlane.f32.xlu1 %v3482_v24  ;;  %3480 = vadd.xlane.f32.xlu0 %v3479_v25 }
 0xaf9   : > { %v3466_v30 = vpop.xlane.xlu1 %3465 }
 0xafa   : > { %v3486_v31 = vmul.f32 0.033333335, %v3466_v30  ;;  %v3463_v32 = vpop.xlane.xlu0 %3462 }
 0xafb   : > { %v3485_v9 = vmul.f32 0.033333335, %v3463_v32 }
 0xafc   : > { %v3494_v10 = vadd.f32 1e-05, %v3486_v31 }
 0xafd   : > { %v3493_v33 = vadd.f32 1e-05, %v3485_v9 }
 0xafe   : > { %8947 = vrsqrt.f32 %v3494_v10  ;;  %v3472_v34 = vpop.xlane.xlu1 %3471  ;;  %v3469_v35 = vpop.xlane.xlu0 %3468 }
 0xaff   : > { %8949 = vrsqrt.f32 %v3493_v33  ;;  %v3488_v36 = vmul.f32 0.033333335, %v3472_v34  ;;  %v3487_v19 = vmul.f32 0.033333335, %v3469_v35 }
 0xb01   : > { %v3496_v37 = vadd.f32 1e-05, %v3488_v36  ;;  %v3495_v21 = vadd.f32 1e-05, %v3487_v19 }
 0xb02   : > { %v3478_v38 = vpop.xlane.xlu1 %3477  ;;  %v3475_v39 = vpop.xlane.xlu0 %3474 }
 0xb03   : > { %8951 = vrsqrt.f32 %v3496_v37  ;;  %v3490_v40 = vmul.f32 0.033333335, %v3478_v38  ;;  %v3489_v41 = vmul.f32 0.033333335, %v3475_v39  ;;  %v3679_v37 = vld [vmem:[%s11338_s11 + $0x8] sm:$0xff]  ;;  %v3681_v38 = vld [vmem:[%s11338_s11 + $0x18] sm:$0xff] }
 0xb04   : > { %8953 = vrsqrt.f32 %v3495_v21  ;;  %v3680_v21 = vld [vmem:[%s11338_s11 + $0x10] sm:$0xff]  ;;  %v3682_v39 = vld [vmem:[%s11338_s11 + $0x20] sm:$0xff] }
 0xb05   : > { %v3498_v42 = vadd.f32 1e-05, %v3490_v40  ;;  %v3497_v45 = vadd.f32 1e-05, %v3489_v41  ;;  %v3683_v40 = vld [vmem:[%s11338_s11 + $0x28] sm:$0xff]  ;;  %v3684_v41 = vld [vmem:[%s11338_s11 + $0x30] sm:$0xff] }
 0xb06   : > { %v3484_v46 = vpop.xlane.xlu1 %3483  ;;  %v3481_v47 = vpop.xlane.xlu0 %3480 }
 0xb07   : > { %8955 = vrsqrt.f32 %v3498_v42  ;;  %v3492_v48 = vmul.f32 0.033333335, %v3484_v46  ;;  %v3491_v51 = vmul.f32 0.033333335, %v3481_v47  ;;  %v4629_v42 = vld [vmem:[%s11339_s12] sm:$0xff]  ;;  %v4631_v47 = vld [vmem:[%s11339_s12 + $0x10] sm:$0xff] }
 0xb08   : > { %v8948_v43 = vpop.eup %8947  ;;  %8957 = vrsqrt.f32 %v3497_v45  ;;  %v3685_v45 = vld [vmem:[%s11338_s11 + $0x38] sm:$0xff]  ;;  %v3686_v46 = vld [vmem:[%s11338_s11 + $0x40] sm:$0xff] }
 0xb09   : > { %v8950_v44 = vpop.eup %8949  ;;  %v3500_v54 = vadd.f32 1e-05, %v3492_v48  ;;  %v3499_v53 = vadd.f32 1e-05, %v3491_v51  ;;  %v3510_v55 = vmul.f32 %v8948_v43, %v10229_v49  ;;  %v4630_v48 = vld [vmem:[%s11339_s12 + $0x8] sm:$0xff]  ;;  %v3688_v43 = vld [vmem:[%s11338_s11 + $0x50] sm:$0xff] }
 0xb0a   : > { %v3509_v52 = vmul.f32 %v8950_v44, %v10231_v50  ;;  %v3687_v51 = vld [vmem:[%s11338_s11 + $0x48] sm:$0xff]  ;;  %v4633_v44 = vld [vmem:[%s11339_s12 + $0x20] sm:$0xff] }
 0xb0b   : > { %8959 = vrsqrt.f32 %v3500_v54  ;;  %v3526_v60 = vmul.f32 0.01, %v3510_v55  ;;  %vm3518_vm14 = vcmp.ge.f32.partialorder %v3510_v55, 0.0  ;;  %v4632_v54 = vld [vmem:[%s11339_s12 + $0x18] sm:$0xff] }
 0xb0c   : > { %8961 = vrsqrt.f32 %v3499_v53  ;;  %vm3517_vm13 = vcmp.ge.f32.partialorder %v3509_v52, 0.0  ;;  %v3525_v61 = vmul.f32 0.01, %v3509_v52  ;;  %v3689_v53 = vld [vmem:[%s11338_s11 + $0x58] sm:$0xff] }
 0xb0d   : > { %v8952_v62 = vpop.eup %8951  ;;  %v3534_v4 = vsel %vm3518_vm14, %v3510_v55, %v3526_v60  ;;  %v3690_v55 = vld [vmem:[%s11338_s11 + $0x60] sm:$0xff]  ;;  %v4635_v60 = vld [vmem:[%s11339_s12 + $0x30] sm:$0xff] }
 0xb0e   : > { %v8954_v63 = vpop.eup %8953  ;;  %v3533_v2 = vsel %vm3517_vm13, %v3509_v52, %v3525_v61  ;;  %v3512_v3 = vmul.f32 %v8952_v62, %v10238_v58  ;;  %v6663_v52 = vld [vmem:[%s11338_s11 + $0x80] sm:$0xff]  ;;  %v4634_v61 = vld [vmem:[%s11339_s12 + $0x28] sm:$0xff] }
 0xb0f   : > { %7526 = vmatprep.mubr.msk.f32.mxu0 %vm3411_vm10, %v3533_v2  ;;  %v3511_v7 = vmul.f32 %v8954_v63, %v10240_v59  ;;  %7554 = vmatprep.mubr.msk.f32.mxu1 %vm2756_vm9, %v6663_v52  ;;  %v3691_v62 = vld [vmem:[%s11338_s11 + $0x68] sm:$0xff]  ;;  %v3692_v63 = vld [vmem:[%s11338_s11 + $0x70] sm:$0xff]  ;;  %v4637_v2 = vld [vmem:[%s11339_s12 + $0x40] sm:$0xff] }
 0xb10   : > { %7527 = vmatmul.mubr.msk.f32.vlgmr.msra.gmra.mrb[18].mxu0 %vm3411_vm10, %v3534_v4  ;;  %vm3520_vm15 = vcmp.ge.f32.partialorder %v3512_v3, 0.0  ;;  %v3528_v49 = vmul.f32 0.01, %v3512_v3  ;;  %v3693_v4 = vld [vmem:[%s11338_s11 + $0x78] sm:$0xff] }
 0xb11   : > { %v8956_v50 = vpop.eup %8955  ;;  %vm3519_vm0 = vcmp.ge.f32.partialorder %v3511_v7, 0.0  ;;  %v3527_v8 = vmul.f32 0.01, %v3511_v7 }
 0xb12   : > { %v8958_v11 = vpop.eup %8957  ;;  %v3536_v12 = vsel %vm3520_vm15, %v3512_v3, %v3528_v49  ;;  %v3514_v13 = vmul.f32 %v8956_v50, %v10247_v5  ;;  %v4636_v3 = vld [vmem:[%s11339_s12 + $0x38] sm:$0xff]  ;;  %v4639_v49 = vld [vmem:[%s11339_s12 + $0x50] sm:$0xff]  ;;  %v4638_v50 = vld [vmem:[%s11339_s12 + $0x48] sm:$0xff] }
 0xb13   : > { %v3535_v14 = vsel %vm3519_vm0, %v3511_v7, %v3527_v8  ;;  %v3513_v15 = vmul.f32 %v8958_v11, %v10249_v6  ;;  %v6711_v7 = vld [vmem:[%s11338_s11 + $0x100] sm:$0xff]  ;;  %v4640_v11 = vld [vmem:[%s11339_s12 + $0x58] sm:$0xff] }
 0xb14   : > { %7529 = vmatprep.mubr.msk.f32.mxu0 %vm3411_vm10, %v3535_v14  ;;  %vm3522_vm1 = vcmp.ge.f32.partialorder %v3514_v13, 0.0  ;;  %v3530_v58 = vmul.f32 0.01, %v3514_v13  ;;  %v4641_v8 = vld [vmem:[%s11339_s12 + $0x60] sm:$0xff]  ;;  %v4644_v14 = vld [vmem:[%s11339_s12 + $0x78] sm:$0xff] }
 0xb15   : > { %v8960_v16 = vpop.eup %8959  ;;  %7530 = vmatmul.mubr.msk.f32.gmra.mrb[20].mxu0 %vm3411_vm10, %v3536_v12  ;;  %vm3521_vm2 = vcmp.ge.f32.partialorder %v3513_v15, 0.0  ;;  %v3529_v59 = vmul.f32 0.01, %v3513_v15  ;;  %v4643_v12 = vld [vmem:[%s11339_s12 + $0x70] sm:$0xff] }
 0xb16   : > { %v8962_v57 = vpop.eup %8961  ;;  %v3538_v18 = vsel %vm3522_vm1, %v3514_v13, %v3530_v58  ;;  %v3516_v22 = vmul.f32 %v8960_v16, %v10257_v17  ;;  %v3678_v17 = vld [vmem:[%s11338_s11] sm:$0xff]  ;;  %v4642_v13 = vld [vmem:[%s11339_s12 + $0x68] sm:$0xff] }
 0xb17   : > { %v3537_v23 = vsel %vm3521_vm2, %v3513_v15, %v3529_v59  ;;  %v3515_v24 = vmul.f32 %v8962_v57, %v10259_v56 }
 0xb18   : > { %7532 = vmatprep.mubr.msk.f32.mxu0 %vm3411_vm10, %v3537_v23  ;;  %vm3524_vm3 = vcmp.ge.f32.partialorder %v3516_v22, 0.0  ;;  %v3532_v5 = vmul.f32 0.01, %v3516_v22 }
 0xb19   : > { %7533 = vmatmul.mubr.msk.f32.gmra.mrb[22].mxu0 %vm3411_vm10, %v3538_v18  ;;  %vm3523_vm5 = vcmp.ge.f32.partialorder %v3515_v24, 0.0  ;;  %v3531_v6 = vmul.f32 0.01, %v3515_v24 }
 0xb1a   : > { %v3540_v25 = vsel %vm3524_vm3, %v3516_v22, %v3532_v5 }
 0xb1b   : > { %v3539_v26 = vsel %vm3523_vm5, %v3515_v24, %v3531_v6 }
 0xb1c   : > { %7535 = vmatprep.mubr.msk.f32.mxu0 %vm3411_vm10, %v3539_v26 }
 0xb1d   : > { %7536 = vmatmul.mubr.msk.f32.gmra.mrb[24].mxu0 %vm3411_vm10, %v3540_v25 }
 0xb1e   : > { %7594 = vmatprep.mubr.msk.f32.mxu0 %vm2756_vm9, %v3678_v17 }
 0xbe3   : > { %v7528_v56 = vpop.f32.mrb[18].mxu0 }
 0xbe4   : > { %v3639_v0 = vpop.f32.mrb[19].mxu0 }
 0xbe5   : > { %v8863_v27 = vpack.i.bf16 %v7528_v56, %v3639_v0  ;;  %v8314_v1 = vpack.c.bf16 %v7528_v56, %v3639_v0 }
 0xbe7   : > { %8864 = vrot.lane.b32.xlu0 %v8863_v27, %s11391_s0  ;;  %8315 = vmatprep.subr.bf16.mxu0 %v8314_v1 }
 0xbe8   : > { %v7531_v28 = vpop.f32.mrb[20].mxu0  ;;  %8317 = vmatpush3.bf16.msra.mxu0 %v8314_v1 }
 0xbe9   : > { %v3649_v29 = vpop.f32.mrb[21].mxu0 }
 0xbea   : > { %v8898_v30 = vpack.i.bf16 %v7531_v28, %v3649_v29  ;;  %v8318_v31 = vpack.c.bf16 %v7531_v28, %v3649_v29 }
 0xbec   : > { %8869 = vrot.lane.b32.xlu1 %v8898_v30, %s11391_s0  ;;  %v7534_v32 = vpop.f32.mrb[22].mxu0  ;;  %8319 = vmatprep.subr.bf16.mxu0 %v8318_v31 }
 0xbed   : > { %v3659_v9 = vpop.f32.mrb[23].mxu0  ;;  %8321 = vmatpush3.bf16.msra.mxu0 %v8318_v31 }
 0xbee   : > { %v8908_v10 = vpack.i.bf16 %v7534_v32, %v3659_v9  ;;  %v8322_v33 = vpack.c.bf16 %v7534_v32, %v3659_v9 }
 0xbf0   : > { %8874 = vrot.lane.b32.xlu1 %v8908_v10, %s11391_s0  ;;  %v7537_v34 = vpop.f32.mrb[24].mxu0  ;;  %8323 = vmatprep.subr.bf16.mxu0 %v8322_v33 }
 0xbf1   : > { %v3669_v35 = vpop.f32.mrb[25].mxu0  ;;  %8325 = vmatpush3.bf16.msra.mxu0 %v8322_v33 }
 0xbf2   : > { %v8918_v36 = vpack.i.bf16 %v7537_v34, %v3669_v35  ;;  %v8326_v19 = vpack.c.bf16 %v7537_v34, %v3669_v35  ;;  %v6712_v34 = vld [vmem:[%s11338_s11 + $0x108] sm:$0xff] }
 0xbf4   : > { %8884 = vrot.lane.b32.xlu1 %v8863_v27, %s9025_s23  ;;  %8879 = vrot.lane.b32.xlu0 %v8918_v36, %s11391_s0 }
 0xbf5   : > { %8327 = vmatprep.subr.bf16.mxu0 %v8326_v19 }
 0xbf6   : > { %8329 = vmatpush3.bf16.msra.mxu0 %v8326_v19 }
 0xbf8   : > { %8894 = vrot.lane.b32.xlu1 %v8898_v30, %s9025_s23  ;;  %8889 = vrot.lane.b32.xlu0 %v8863_v27, %s9026_s3 }
 0xbf9   : > { %7595 = vmatmul.mubr.msk.f32.vlgmr.msra.gmra.mrb[26].mxu0 %vm2756_vm9, %v3679_v37 }
 0xbfa   : > { %7597 = vmatprep.mubr.msk.f32.mxu0 %vm2756_vm9, %v3680_v21  ;;  %v6713_v21 = vld [vmem:[%s11338_s11 + $0x110] sm:$0xff] }
 0xbfc   : > { %8904 = vrot.lane.b32.xlu1 %v8908_v10, %s9025_s23  ;;  %8899 = vrot.lane.b32.xlu0 %v8898_v30, %s9026_s3 }
 0xbfd   : > { %7598 = vmatmul.mubr.msk.f32.gmra.mrb[28].mxu0 %vm2756_vm9, %v3681_v38 }
 0xbfe   : > { %7600 = vmatprep.mubr.msk.f32.mxu0 %vm2756_vm9, %v3682_v39 }
 0xc00   : > { %8914 = vrot.lane.b32.xlu1 %v8918_v36, %s9025_s23  ;;  %8909 = vrot.lane.b32.xlu0 %v8908_v10, %s9026_s3 }
 0xc01   : > { %7601 = vmatmul.mubr.msk.f32.gmra.mrb[30].mxu0 %vm2756_vm9, %v3683_v40 }
 0xc02   : > { %7603 = vmatprep.mubr.msk.f32.mxu0 %vm2756_vm9, %v3684_v41 }
 0xc04   : > { %4647 = vperm.xlu1 %8762, %v4629_v42   ;;  %8919 = vrot.lane.b32.xlu0 %v8918_v36, %s9026_s3  ;;  %v6714_v42 = vld [vmem:[%s11338_s11 + $0x118] sm:$0xff] }
 0xc05   : > { %7604 = vmatmul.mubr.msk.f32.gmra.mrb[32].mxu0 %vm2756_vm9, %v3685_v45 }
 0xc06   : > { %7606 = vmatprep.mubr.msk.f32.mxu0 %vm2756_vm9, %v3686_v46 }
 0xc08   : > { %4657 = vperm.xlu1 %8762, %v4631_v47   ;;  %4652 = vperm.xlu0 %8761, %v4630_v48  }
 0xc09   : > { %7607 = vmatmul.mubr.msk.f32.gmra.mrb[34].mxu0 %vm2756_vm9, %v3687_v51  ;;  %v6715_v51 = vld [vmem:[%s11338_s11 + $0x120] sm:$0xff] }
 0xc0a   : > { %7609 = vmatprep.mubr.msk.f32.mxu0 %vm2756_vm9, %v3688_v43 }
 0xc0c   : > { %4667 = vperm.xlu1 %8762, %v4633_v44   ;;  %4662 = vperm.xlu0 %8761, %v4632_v54  }
 0xc0d   : > { %7610 = vmatmul.mubr.msk.f32.gmra.mrb[36].mxu0 %vm2756_vm9, %v3689_v53 }
 0xc0e   : > { %7612 = vmatprep.mubr.msk.f32.mxu0 %vm2756_vm9, %v3690_v55  ;;  %v6716_v55 = vld [vmem:[%s11338_s11 + $0x128] sm:$0xff] }
 0xc10   : > { %4677 = vperm.xlu1 %8762, %v4635_v60   ;;  %4672 = vperm.xlu0 %8761, %v4634_v61  }
 0xc11   : > { %7613 = vmatmul.mubr.msk.f32.gmra.mrb[38].mxu0 %vm2756_vm9, %v3691_v62  ;;  %v6717_v62 = vld [vmem:[%s11338_s11 + $0x130] sm:$0xff] }
 0xc12   : > { %7615 = vmatprep.mubr.msk.f32.mxu0 %vm2756_vm9, %v3692_v63 }
 0xc14   : > { %4687 = vperm.xlu1 %8762, %v4637_v2   ;;  %4682 = vperm.xlu0 %8761, %v4636_v3   ;;  %v6718_v3 = vld [vmem:[%s11338_s11 + $0x138] sm:$0xff] }
 0xc15   : > { %7616 = vmatmul.mubr.msk.f32.gmra.mrb[40].mxu0 %vm2756_vm9, %v3693_v4 }
 0xc16   : > { %7634 = vmatprep.mubr.msk.f32.mxu0 %vm2756_vm9, %v6711_v7  ;;  %v6719_v7 = vld [vmem:[%s11338_s11 + $0x140] sm:$0xff] }
 0xc18   : > { %4697 = vperm.xlu1 %8762, %v4639_v49   ;;  %4692 = vperm.xlu0 %8761, %v4638_v50   ;;  %v6664_v49 = vld [vmem:[%s11338_s11 + $0x88] sm:$0xff]  ;;  %v6665_v50 = vld [vmem:[%s11338_s11 + $0x90] sm:$0xff] }
 0xc1c   : > { %4707 = vperm.xlu1 %8762, %v4641_v8   ;;  %4702 = vperm.xlu0 %8761, %v4640_v11   ;;  %v6720_v8 = vld [vmem:[%s11338_s11 + $0x148] sm:$0xff]  ;;  %v6721_v11 = vld [vmem:[%s11338_s11 + $0x150] sm:$0xff] }
 0xc20   : > { %4717 = vperm.xlu1 %8762, %v4643_v12   ;;  %4712 = vperm.xlu0 %8761, %v4642_v13   ;;  %v6666_v12 = vld [vmem:[%s11338_s11 + $0x98] sm:$0xff]  ;;  %v6667_v13 = vld [vmem:[%s11338_s11 + $0xa0] sm:$0xff] }
 0xc24   : > { %4722 = vperm.xlu0 %8761, %v4644_v14   ;;  %v6722_v14 = vld [vmem:[%s11338_s11 + $0x158] sm:$0xff] }
 0xc59   : > { %v8865_v15 = vpop.permute.xlu0 %8864 }
 0xc5a   : > { %v8867_v58 = vunpack.i.h.bf16 %v8865_v15  ;;  %v8866_v16 = vunpack.i.l.bf16 %v8865_v15  ;;  %v6723_v15 = vld [vmem:[%s11338_s11 + $0x160] sm:$0xff] }
 0xc5c   : > { %v8330_v59 = vpack.c.bf16 %v8867_v58, %v8866_v16  ;;  %v6668_v58 = vld [vmem:[%s11338_s11 + $0xa8] sm:$0xff]  ;;  %v6669_v16 = vld [vmem:[%s11338_s11 + $0xb0] sm:$0xff] }
 0xc5e   : > { %v8870_v57 = vpop.permute.xlu1 %8869  ;;  %8331 = vmatprep.subr.bf16.mxu0 %v8330_v59 }
 0xc5f   : > { %v8872_v18 = vunpack.i.h.bf16 %v8870_v57  ;;  %v8871_v22 = vunpack.i.l.bf16 %v8870_v57  ;;  %8333 = vmatpush3.bf16.msra.mxu0 %v8330_v59  ;;  %v6724_v59 = vld [vmem:[%s11338_s11 + $0x168] sm:$0xff]  ;;  %v6725_v57 = vld [vmem:[%s11338_s11 + $0x170] sm:$0xff] }
 0xc61   : > { %v8334_v23 = vpack.c.bf16 %v8872_v18, %v8871_v22  ;;  %v6670_v18 = vld [vmem:[%s11338_s11 + $0xb8] sm:$0xff]  ;;  %v6671_v22 = vld [vmem:[%s11338_s11 + $0xc0] sm:$0xff] }
 0xc62   : > { %v8875_v24 = vpop.permute.xlu1 %8874 }
 0xc63   : > { %v8877_v5 = vunpack.i.h.bf16 %v8875_v24  ;;  %v8876_v6 = vunpack.i.l.bf16 %v8875_v24  ;;  %8335 = vmatprep.subr.bf16.mxu0 %v8334_v23  ;;  %v6743_v24 = vld [vmem:[%s11338_s11 + $0x180] sm:$0xff] }
 0xc64   : > { %8337 = vmatpush3.bf16.msra.mxu0 %v8334_v23  ;;  %v6726_v23 = vld [vmem:[%s11338_s11 + $0x178] sm:$0xff] }
 0xc65   : > { %v8338_v25 = vpack.c.bf16 %v8877_v5, %v8876_v6  ;;  %v6672_v5 = vld [vmem:[%s11338_s11 + $0xc8] sm:$0xff]  ;;  %v6673_v6 = vld [vmem:[%s11338_s11 + $0xd0] sm:$0xff] }
 0xc66   : > { %v8885_v26 = vpop.permute.xlu1 %8884  ;;  %v8880_v17 = vpop.permute.xlu0 %8879 }
 0xc67   : > { %v8887_v56 = vunpack.i.h.bf16 %v8885_v26  ;;  %v8886_v0 = vunpack.i.l.bf16 %v8885_v26  ;;  %v8882_v27 = vunpack.i.h.bf16 %v8880_v17  ;;  %v8881_v1 = vunpack.i.l.bf16 %v8880_v17  ;;  %8339 = vmatprep.subr.bf16.mxu0 %v8338_v25  ;;  %v6745_v26 = vld [vmem:[%s11338_s11 + $0x190] sm:$0xff]  ;;  %v6674_v17 = vld [vmem:[%s11338_s11 + $0xd8] sm:$0xff] }
 0xc68   : > { %8341 = vmatpush3.bf16.msra.mxu0 %v8338_v25  ;;  %v6744_v25 = vld [vmem:[%s11338_s11 + $0x188] sm:$0xff] }
 0xc69   : > { %v8298_v28 = vpack.c.bf16 %v8887_v56, %v8886_v0  ;;  %v8342_v29 = vpack.c.bf16 %v8882_v27, %v8881_v1  ;;  %v6675_v56 = vld [vmem:[%s11338_s11 + $0xe0] sm:$0xff]  ;;  %v6746_v0 = vld [vmem:[%s11338_s11 + $0x198] sm:$0xff]  ;;  %v6676_v1 = vld [vmem:[%s11338_s11 + $0xe8] sm:$0xff] }
 0xc6a   : > { %v8895_v30 = vpop.permute.xlu1 %8894  ;;  %v8890_v31 = vpop.permute.xlu0 %8889  ;;  %v6747_v27 = vld [vmem:[%s11338_s11 + $0x1a0] sm:$0xff] }
 0xc6b   : > { %v8897_v32 = vunpack.i.h.bf16 %v8895_v30  ;;  %v8896_v9 = vunpack.i.l.bf16 %v8895_v30  ;;  %v8892_v10 = vunpack.i.h.bf16 %v8890_v31  ;;  %v8891_v33 = vunpack.i.l.bf16 %v8890_v31  ;;  %8299 = vmatprep.subr.bf16.mxu1 %v8298_v28  ;;  %8343 = vmatprep.subr.bf16.mxu0 %v8342_v29  ;;  %v6749_v30 = vld [vmem:[%s11338_s11 + $0x1b0] sm:$0xff]  ;;  %v6678_v31 = vld [vmem:[%s11338_s11 + $0xf8] sm:$0xff] }
 0xc6c   : > { %8301 = vmatpush3.bf16.msra.mxu1 %v8298_v28  ;;  %8345 = vmatpush3.bf16.msra.mxu0 %v8342_v29  ;;  %v6677_v28 = vld [vmem:[%s11338_s11 + $0xf0] sm:$0xff]  ;;  %v6748_v29 = vld [vmem:[%s11338_s11 + $0x1a8] sm:$0xff] }
 0xc6d   : > { %v8302_v35 = vpack.c.bf16 %v8897_v32, %v8896_v9  ;;  %v8346_v36 = vpack.c.bf16 %v8892_v10, %v8891_v33  ;;  %v6750_v32 = vld [vmem:[%s11338_s11 + $0x1b8] sm:$0xff]  ;;  %v6751_v9 = vld [vmem:[%s11338_s11 + $0x1c0] sm:$0xff]  ;;  %v6752_v10 = vld [vmem:[%s11338_s11 + $0x1c8] sm:$0xff] }
 0xc6e   : > { %v8905_v19 = vpop.permute.xlu1 %8904  ;;  %v8900_v37 = vpop.permute.xlu0 %8899  ;;  %v6753_v33 = vld [vmem:[%s11338_s11 + $0x1d0] sm:$0xff] }
 0xc6f   : > { %v8907_v38 = vunpack.i.h.bf16 %v8905_v19  ;;  %v8906_v39 = vunpack.i.l.bf16 %v8905_v19  ;;  %v8902_v40 = vunpack.i.h.bf16 %v8900_v37  ;;  %v8901_v41 = vunpack.i.l.bf16 %v8900_v37  ;;  %8303 = vmatprep.subr.bf16.mxu1 %v8302_v35  ;;  %7635 = vmatmul.mubr.msk.f32.vlgmr.msra.gmra.mrb[26].mxu0 %vm2756_vm9, %v6712_v34  ;;  %v6754_v34 = vld [vmem:[%s11338_s11 + $0x1d8] sm:$0xff]  ;;  %v6757_v19 = vld [vmem:[%s11338_s11 + $0x1f0] sm:$0xff] }
 0xc70   : > { %8347 = vmatprep.subr.bf16.mxu0 %v8346_v36  ;;  %8305 = vmatpush3.bf16.msra.mxu1 %v8302_v35  ;;  %v6755_v35 = vld [vmem:[%s11338_s11 + $0x1e0] sm:$0xff]  ;;  %v6758_v37 = vld [vmem:[%s11338_s11 + $0x1f8] sm:$0xff] }
 0xc71   : > { %8349 = vmatpush3.bf16.msra.mxu0 %v8346_v36  ;;  %7637 = vmatprep.mubr.msk.f32.mxu0 %vm2756_vm9, %v6713_v21  ;;  %v8306_v45 = vpack.c.bf16 %v8907_v38, %v8906_v39  ;;  %v8350_v46 = vpack.c.bf16 %v8902_v40, %v8901_v41  ;;  %v6756_v36 = vld [vmem:[%s11338_s11 + $0x1e8] sm:$0xff] }
 0xc72   : > { %v8915_v47 = vpop.permute.xlu1 %8914  ;;  %v8910_v48 = vpop.permute.xlu0 %8909 }
 0xc73   : > { %v8917_v43 = vunpack.i.h.bf16 %v8915_v47  ;;  %v8916_v44 = vunpack.i.l.bf16 %v8915_v47  ;;  %v8912_v54 = vunpack.i.h.bf16 %v8910_v48  ;;  %v8911_v53 = vunpack.i.l.bf16 %v8910_v48  ;;  %8307 = vmatprep.subr.bf16.mxu1 %v8306_v45  ;;  %7638 = vmatmul.mubr.msk.f32.gmra.mrb[28].mxu0 %vm2756_vm9, %v6714_v42 }
 0xc74   : > { %8351 = vmatprep.subr.bf16.mxu0 %v8350_v46  ;;  %8309 = vmatpush3.bf16.msra.mxu1 %v8306_v45 }
 0xc75   : > { %8353 = vmatpush3.bf16.msra.mxu0 %v8350_v46  ;;  %7640 = vmatprep.mubr.msk.f32.mxu0 %vm2756_vm9, %v6715_v51  ;;  %v8310_v52 = vpack.c.bf16 %v8917_v43, %v8916_v44  ;;  %v8354_v60 = vpack.c.bf16 %v8912_v54, %v8911_v53 }
 0xc76   : > { %v8920_v61 = vpop.permute.xlu0 %8919 }
 0xc77   : > { %v8922_v63 = vunpack.i.h.bf16 %v8920_v61  ;;  %v8921_v2 = vunpack.i.l.bf16 %v8920_v61  ;;  %8311 = vmatprep.subr.bf16.mxu1 %v8310_v52  ;;  %7641 = vmatmul.mubr.msk.f32.gmra.mrb[30].mxu0 %vm2756_vm9, %v6716_v55 }
 0xc78   : > { %8355 = vmatprep.subr.bf16.mxu0 %v8354_v60  ;;  %8313 = vmatpush3.bf16.msra.mxu1 %v8310_v52 }
 0xc79   : > { %8357 = vmatpush3.bf16.msra.mxu0 %v8354_v60  ;;  %7643 = vmatprep.mubr.msk.f32.mxu0 %vm2756_vm9, %v6717_v62  ;;  %v8358_v4 = vpack.c.bf16 %v8922_v63, %v8921_v2 }
 0xc7b   : > { %7644 = vmatmul.mubr.msk.f32.gmra.mrb[32].mxu0 %vm2756_vm9, %v6718_v3  ;;  %8359 = vmatprep.subr.bf16.mxu0 %v8358_v4 }
 0xc7c   : > { %7646 = vmatprep.mubr.msk.f32.mxu0 %vm2756_vm9, %v6719_v7  ;;  %7555 = vmatmul.mubr.msk.f32.vlgmr.msra.gmra.mrb[30].mxu1 %vm2756_vm9, %v6664_v49 }
 0xc7d   : > { %8361 = vmatpush3.bf16.msra.mxu0 %v8358_v4  ;;  %7557 = vmatprep.mubr.msk.f32.mxu1 %vm2756_vm9, %v6665_v50 }
 0xc7f   : > { %7647 = vmatmul.mubr.msk.f32.gmra.mrb[34].mxu0 %vm2756_vm9, %v6720_v8 }
 0xc80   : > { %7649 = vmatprep.mubr.msk.f32.mxu0 %vm2756_vm9, %v6721_v11  ;;  %7558 = vmatmul.mubr.msk.f32.gmra.mrb[32].mxu1 %vm2756_vm9, %v6666_v12 }
 0xc81   : > { %7560 = vmatprep.mubr.msk.f32.mxu1 %vm2756_vm9, %v6667_v13 }
 0xc83   : > { %7650 = vmatmul.mubr.msk.f32.gmra.mrb[36].mxu0 %vm2756_vm9, %v6722_v14  ;;  %v4648_v41 = vpop.permute.xlu1 %4647 }
 0xc84   : > { %7652 = vmatprep.mubr.msk.f32.mxu0 %vm2756_vm9, %v6723_v15  ;;  %7561 = vmatmul.mubr.msk.f32.gmra.mrb[34].mxu1 %vm2756_vm9, %v6668_v58 }
 0xc85   : > { %7563 = vmatprep.mubr.msk.f32.mxu1 %vm2756_vm9, %v6669_v16 }
 0xc87   : > { %7653 = vmatmul.mubr.msk.f32.gmra.mrb[38].mxu0 %vm2756_vm9, %v6724_v59  ;;  %v4653_v42 = vpop.permute.xlu0 %4652  ;;  %v4658_v47 = vpop.permute.xlu1 %4657 }
 0xc88   : > { %7655 = vmatprep.mubr.msk.f32.mxu0 %vm2756_vm9, %v6725_v57  ;;  %7564 = vmatmul.mubr.msk.f32.gmra.mrb[36].mxu1 %vm2756_vm9, %v6670_v18 }
 0xc89   : > { %7566 = vmatprep.mubr.msk.f32.mxu1 %vm2756_vm9, %v6671_v22 }
 0xc8b   : > { %7656 = vmatmul.mubr.msk.f32.gmra.mrb[40].mxu0 %vm2756_vm9, %v6726_v23  ;;  %v4663_v51 = vpop.permute.xlu0 %4662  ;;  %v4668_v53 = vpop.permute.xlu1 %4667 }
 0xc8c   : > { %7674 = vmatprep.mubr.msk.f32.mxu0 %vm2756_vm9, %v6743_v24  ;;  %7567 = vmatmul.mubr.msk.f32.gmra.mrb[38].mxu1 %vm2756_vm9, %v6672_v5 }
 0xc8d   : > { %7569 = vmatprep.mubr.msk.f32.mxu1 %vm2756_vm9, %v6673_v6 }
 0xc8f   : > { %7675 = vmatmul.mubr.msk.f32.vlgmr.msra.gmra.mrb[26].mxu0 %vm2756_vm9, %v6744_v25  ;;  %v4673_v55 = vpop.permute.xlu0 %4672  ;;  %v4678_v58 = vpop.permute.xlu1 %4677 }
 0xc90   : > { %7677 = vmatprep.mubr.msk.f32.mxu0 %vm2756_vm9, %v6745_v26  ;;  %7570 = vmatmul.mubr.msk.f32.gmra.mrb[40].mxu1 %vm2756_vm9, %v6674_v17 }
 0xc91   : > { %7572 = vmatprep.mubr.msk.f32.mxu1 %vm2756_vm9, %v6675_v56 }
 0xc93   : > { %7678 = vmatmul.mubr.msk.f32.gmra.mrb[28].mxu0 %vm2756_vm9, %v6746_v0  ;;  %v4683_v12 = vpop.permute.xlu0 %4682 }
 0xc94   : > { %7680 = vmatprep.mubr.msk.f32.mxu0 %vm2756_vm9, %v6747_v27  ;;  %7573 = vmatmul.mubr.msk.f32.gmra.mrb[42].mxu1 %vm2756_vm9, %v6676_v1  ;;  %v4688_v27 = vpop.permute.xlu1 %4687 }
 0xc95   : > { %7575 = vmatprep.mubr.msk.f32.mxu1 %vm2756_vm9, %v6677_v28 }
 0xc97   : > { %7681 = vmatmul.mubr.msk.f32.gmra.mrb[30].mxu0 %vm2756_vm9, %v6748_v29  ;;  %v4693_v17 = vpop.permute.xlu0 %4692 }
 0xc98   : > { %7683 = vmatprep.mubr.msk.f32.mxu0 %vm2756_vm9, %v6749_v30  ;;  %7576 = vmatmul.mubr.msk.f32.gmra.mrb[44].mxu1 %vm2756_vm9, %v6678_v31 }
 0xc9b   : > { %7684 = vmatmul.mubr.msk.f32.gmra.mrb[32].mxu0 %vm2756_vm9, %v6750_v32 }
 0xc9c   : > { %7686 = vmatprep.mubr.msk.f32.mxu0 %vm2756_vm9, %v6751_v9 }
 0xc9f   : > { %7687 = vmatmul.mubr.msk.f32.gmra.mrb[34].mxu0 %vm2756_vm9, %v6752_v10 }
 0xca0   : > { %7689 = vmatprep.mubr.msk.f32.mxu0 %vm2756_vm9, %v6753_v33 }
 0xca3   : > { %7690 = vmatmul.mubr.msk.f32.gmra.mrb[36].mxu0 %vm2756_vm9, %v6754_v34 }
 0xca4   : > { %7692 = vmatprep.mubr.msk.f32.mxu0 %vm2756_vm9, %v6755_v35 }
 0xca7   : > { %7693 = vmatmul.mubr.msk.f32.gmra.mrb[38].mxu0 %vm2756_vm9, %v6756_v36  ;;  %v4703_v36 = vpop.permute.xlu0 %4702 }
 0xca8   : > { %7695 = vmatprep.mubr.msk.f32.mxu0 %vm2756_vm9, %v6757_v19 }
 0xcab   : > { %7696 = vmatmul.mubr.msk.f32.gmra.mrb[40].mxu0 %vm2756_vm9, %v6758_v37 }
 0xd4f   : > { %v7556_v21 = vpop.f32.mrb[30].mxu1 }
 0xd50   : > { %v3857_v38 = vpop.f32.mrb[31].mxu1 }
 0xd53   : > { %v7559_v39 = vpop.f32.mrb[32].mxu1 }
 0xd54   : > { %v3867_v40 = vpop.f32.mrb[33].mxu1 }
 0xd57   : > { %v7562_v45 = vpop.f32.mrb[34].mxu1 }
 0xd58   : > { %v3877_v46 = vpop.f32.mrb[35].mxu1 }
 0xd5b   : > { %v7565_v48 = vpop.f32.mrb[36].mxu1 }
 0xd5c   : > { %v3887_v43 = vpop.f32.mrb[37].mxu1 }
 0xd5f   : > { %v7568_v44 = vpop.f32.mrb[38].mxu1 }
 0xd60   : > { %v3897_v54 = vpop.f32.mrb[39].mxu1 }
 0xd62   : > { %v7676_v52 = vpop.f32.mrb[26].mxu0 }
 0xd63   : > { %v8576_v60 = vadd.f32 %v7676_v52, %v7556_v21  ;;  %v4534_v61 = vpop.f32.mrb[27].mxu0  ;;  %v7571_v62 = vpop.f32.mrb[40].mxu1 }
 0xd64   : > { %v8577_v63 = vadd.f32 %v4534_v61, %v3857_v38  ;;  %v3907_v2 = vpop.f32.mrb[41].mxu1  ;;  %v4698_v21 = vpop.permute.xlu1 %4697 }
 0xd65   : > { %v10606_v3 = vadd.f32 %v8576_v60, %v4653_v42 }
 0xd66   : > { %v10608_v4 = vadd.f32 %v8577_v63, %v4648_v41  ;;  %v7679_v7 = vpop.f32.mrb[28].mxu0 }
 0xd67   : > { %v8578_v49 = vadd.f32 %v7679_v7, %v7559_v39  ;;  %v4544_v50 = vpop.f32.mrb[29].mxu0  ;;  %v4745_v8 = vsel %vm4741_vm6, %v10606_v3, 0.0  ;;  %v7574_v11 = vpop.f32.mrb[42].mxu1 }
 0xd68   : > { %v8579_v13 = vadd.f32 %v4544_v50, %v3867_v40  ;;  %4746 = vadd.xlane.f32.xlu0 %v4745_v8  ;;  %v4742_v14 = vsel %vm4741_vm6, %v10608_v4, 0.0  ;;  %v3917_v15 = vpop.f32.mrb[43].mxu1 }
 0xd69   : > { %v10614_v16 = vadd.f32 %v8578_v49, %v4663_v51  ;;  %4743 = vadd.xlane.f32.xlu1 %v4742_v14  ;;  %v4713_v51 = vpop.permute.xlu0 %4712 }
 0xd6a   : > { %v10616_v59 = vadd.f32 %v8579_v13, %v4658_v47  ;;  %v7682_v57 = vpop.f32.mrb[30].mxu0 }
 0xd6b   : > { %v8580_v18 = vadd.f32 %v7682_v57, %v7562_v45  ;;  %v4554_v22 = vpop.f32.mrb[31].mxu0  ;;  %v4751_v23 = vsel %vm4741_vm6, %v10614_v16, 0.0  ;;  %v7577_v24 = vpop.f32.mrb[44].mxu1 }
 0xd6c   : > { %v8581_v5 = vadd.f32 %v4554_v22, %v3877_v46  ;;  %v4748_v6 = vsel %vm4741_vm6, %v10616_v59, 0.0  ;;  %v3927_v25 = vpop.f32.mrb[45].mxu1 }
 0xd6d   : > { %v10622_v26 = vadd.f32 %v8580_v18, %v4673_v55  ;;  %4752 = vadd.xlane.f32.xlu1 %v4751_v23  ;;  %4749 = vadd.xlane.f32.xlu0 %v4748_v6  ;;  %v4723_v8 = vpop.permute.xlu0 %4722 }
 0xd6e   : > { %v10624_v56 = vadd.f32 %v8581_v5, %v4668_v53  ;;  %v7685_v0 = vpop.f32.mrb[32].mxu0 }
 0xd6f   : > { %v8582_v1 = vadd.f32 %v7685_v0, %v7565_v48  ;;  %v4564_v28 = vpop.f32.mrb[33].mxu0  ;;  %v4757_v29 = vsel %vm4741_vm6, %v10622_v26, 0.0 }
 0xd70   : > { %v8583_v30 = vadd.f32 %v4564_v28, %v3887_v43  ;;  %v4754_v31 = vsel %vm4741_vm6, %v10624_v56, 0.0 }
 0xd71   : > { %v10630_v32 = vadd.f32 %v8582_v1, %v4683_v12  ;;  %4758 = vadd.xlane.f32.xlu1 %v4757_v29  ;;  %4755 = vadd.xlane.f32.xlu0 %v4754_v31 }
 0xd72   : > { %v10632_v9 = vadd.f32 %v8583_v30, %v4678_v58  ;;  %v7688_v10 = vpop.f32.mrb[34].mxu0 }
 0xd73   : > { %v8584_v33 = vadd.f32 %v7688_v10, %v7568_v44  ;;  %v4574_v34 = vpop.f32.mrb[35].mxu0  ;;  %v4763_v35 = vsel %vm4741_vm6, %v10630_v32, 0.0 }
 0xd74   : > { %v8585_v19 = vadd.f32 %v4574_v34, %v3897_v54  ;;  %v4760_v37 = vsel %vm4741_vm6, %v10632_v9, 0.0  ;;  %v4708_v54 = vpop.permute.xlu1 %4707 }
 0xd75   : > { %v10638_v38 = vadd.f32 %v8584_v33, %v4693_v17  ;;  %4764 = vadd.xlane.f32.xlu1 %v4763_v35  ;;  %4761 = vadd.xlane.f32.xlu0 %v4760_v37 }
 0xd76   : > { %v10640_v39 = vadd.f32 %v8585_v19, %v4688_v27  ;;  %v7691_v40 = vpop.f32.mrb[36].mxu0 }
 0xd77   : > { %v8586_v41 = vadd.f32 %v7691_v40, %v7571_v62  ;;  %v4584_v42 = vpop.f32.mrb[37].mxu0  ;;  %v4769_v45 = vsel %vm4741_vm6, %v10638_v38, 0.0 }
 0xd78   : > { %v8587_v46 = vadd.f32 %v4584_v42, %v3907_v2  ;;  %v4766_v47 = vsel %vm4741_vm6, %v10640_v39, 0.0  ;;  %v4718_v13 = vpop.permute.xlu1 %4717 }
 0xd79   : > { %v10646_v48 = vadd.f32 %v8586_v41, %v4703_v36  ;;  %4770 = vadd.xlane.f32.xlu1 %v4769_v45  ;;  %4767 = vadd.xlane.f32.xlu0 %v4766_v47 }
 0xd7a   : > { %v10648_v43 = vadd.f32 %v8587_v46, %v4698_v21  ;;  %v7694_v44 = vpop.f32.mrb[38].mxu0 }
 0xd7b   : > { %v8588_v53 = vadd.f32 %v7694_v44, %v7574_v11  ;;  %v4594_v55 = vpop.f32.mrb[39].mxu0  ;;  %v4775_v52 = vsel %vm4741_vm6, %v10646_v48, 0.0 }
 0xd7c   : > { %v8589_v60 = vadd.f32 %v4594_v55, %v3917_v15  ;;  %v4772_v61 = vsel %vm4741_vm6, %v10648_v43, 0.0 }
 0xd7d   : > { %v10654_v62 = vadd.f32 %v8588_v53, %v4713_v51  ;;  %4776 = vadd.xlane.f32.xlu1 %v4775_v52  ;;  %4773 = vadd.xlane.f32.xlu0 %v4772_v61 }
 0xd7e   : > { %v10656_v63 = vadd.f32 %v8589_v60, %v4708_v54  ;;  %v7697_v2 = vpop.f32.mrb[40].mxu0 }
 0xd7f   : > { %v8590_v7 = vadd.f32 %v7697_v2, %v7577_v24  ;;  %v4604_v49 = vpop.f32.mrb[41].mxu0  ;;  %v4781_v50 = vsel %vm4741_vm6, %v10654_v62, 0.0 }
 0xd80   : > { %v8591_v11 = vadd.f32 %v4604_v49, %v3927_v25  ;;  %v4778_v12 = vsel %vm4741_vm6, %v10656_v63, 0.0 }
 0xd81   : > { %v10662_v14 = vadd.f32 %v8590_v7, %v4723_v8  ;;  %4782 = vadd.xlane.f32.xlu1 %v4781_v50  ;;  %4779 = vadd.xlane.f32.xlu0 %v4778_v12 }
 0xd82   : > { %v10664_v15 = vadd.f32 %v8591_v11, %v4718_v13 }
 0xd83   : > { %v4787_v58 = vsel %vm4741_vm6, %v10662_v14, 0.0 }
 0xd84   : > { %v4784_v57 = vsel %vm4741_vm6, %v10664_v15, 0.0 }
 0xd85   : > { %4788 = vadd.xlane.f32.xlu1 %v4787_v58  ;;  %4785 = vadd.xlane.f32.xlu0 %v4784_v57 }
 0xdf5   : > { %v4747_v18 = vpop.xlane.xlu0 %4746 }
 0xdf6   : > { %v4792_v22 = vmul.f32 0.06666667, %v4747_v18  ;;  %v4744_v23 = vpop.xlane.xlu1 %4743 }
 0xdf7   : > { %v4791_v24 = vmul.f32 0.06666667, %v4744_v23 }
 0xdf8   : > { %v10671_v5 = vsub.f32 %v10606_v3, %v4792_v22 }
 0xdf9   : > { %v10674_v6 = vsub.f32 %v10608_v4, %v4791_v24 }
 0xdfa   : > { %v4753_v25 = vpop.xlane.xlu1 %4752  ;;  %v4750_v17 = vpop.xlane.xlu0 %4749  ;;  %v4824_v0 = vmul.f32 %v10671_v5, %v10671_v5 }
 0xdfb   : > { %v4794_v27 = vmul.f32 0.06666667, %v4753_v25  ;;  %v4793_v1 = vmul.f32 0.06666667, %v4750_v17  ;;  %v4823_v28 = vmul.f32 %v10674_v6, %v10674_v6 }
 0xdfc   : > { %v4842_v29 = vsel %vm4741_vm6, %v4824_v0, 0.0 }
 0xdfd   : > { %v10682_v30 = vsub.f32 %v10614_v16, %v4794_v27  ;;  %v10685_v3 = vsub.f32 %v10616_v59, %v4793_v1  ;;  %4843 = vadd.xlane.f32.xlu1 %v4842_v29  ;;  %v4839_v4 = vsel %vm4741_vm6, %v4823_v28, 0.0 }
 0xdfe   : > { %v4759_v31 = vpop.xlane.xlu1 %4758  ;;  %v4756_v10 = vpop.xlane.xlu0 %4755  ;;  %4840 = vadd.xlane.f32.xlu0 %v4839_v4 }
 0xdff   : > { %v4796_v33 = vmul.f32 0.06666667, %v4759_v31  ;;  %v4795_v34 = vmul.f32 0.06666667, %v4756_v10  ;;  %v4826_v35 = vmul.f32 %v10682_v30, %v10682_v30  ;;  %v4825_v36 = vmul.f32 %v10685_v3, %v10685_v3 }
 0xe01   : > { %v10693_v16 = vsub.f32 %v10622_v26, %v4796_v33  ;;  %v10696_v59 = vsub.f32 %v10624_v56, %v4795_v34  ;;  %v4848_v19 = vsel %vm4741_vm6, %v4826_v35, 0.0  ;;  %v4845_v37 = vsel %vm4741_vm6, %v4825_v36, 0.0 }
 0xe02   : > { %v4765_v21 = vpop.xlane.xlu1 %4764  ;;  %v4762_v40 = vpop.xlane.xlu0 %4761  ;;  %4849 = vadd.xlane.f32.xlu1 %v4848_v19  ;;  %4846 = vadd.xlane.f32.xlu0 %v4845_v37  ;;  %v5090_v19 = vld [vmem:[%s11343_s16] sm:$0xff] }
 0xe03   : > { %v4798_v41 = vmul.f32 0.06666667, %v4765_v21  ;;  %v4797_v42 = vmul.f32 0.06666667, %v4762_v40  ;;  %v4828_v45 = vmul.f32 %v10693_v16, %v10693_v16  ;;  %v4827_v26 = vmul.f32 %v10696_v59, %v10696_v59  ;;  %v5001_v37 = vld [vmem:[%s11341_s14] sm:$0xff]  ;;  %v5091_v21 = vld [vmem:[%s11343_s16 + $0x8] sm:$0xff] }
 0xe04   : > { %v4999_v40 = vld [vmem:[%s11340_s13] sm:$0xff] }
 0xe05   : > { %v10705_v46 = vsub.f32 %v10630_v32, %v4798_v41  ;;  %v10708_v56 = vsub.f32 %v10632_v9, %v4797_v42  ;;  %v4854_v47 = vsel %vm4741_vm6, %v4828_v45, 0.0  ;;  %v4851_v51 = vsel %vm4741_vm6, %v4827_v26, 0.0  ;;  %7730 = vmatprep.mubr.f32.mxu1 %v4999_v40 }
 0xe06   : > { %v4771_v44 = vpop.xlane.xlu1 %4770  ;;  %v4768_v54 = vpop.xlane.xlu0 %4767  ;;  %4855 = vadd.xlane.f32.xlu1 %v4854_v47  ;;  %4852 = vadd.xlane.f32.xlu0 %v4851_v51 }
 0xe07   : > { %v4800_v53 = vmul.f32 0.06666667, %v4771_v44  ;;  %v4799_v55 = vmul.f32 0.06666667, %v4768_v54  ;;  %v4830_v52 = vmul.f32 %v10705_v46, %v10705_v46  ;;  %v4829_v32 = vmul.f32 %v10708_v56, %v10708_v56 }
 0xe09   : > { %v10717_v60 = vsub.f32 %v10638_v38, %v4800_v53  ;;  %v10720_v9 = vsub.f32 %v10640_v39, %v4799_v55  ;;  %v4860_v61 = vsel %vm4741_vm6, %v4830_v52, 0.0  ;;  %v4857_v2 = vsel %vm4741_vm6, %v4829_v32, 0.0 }
 0xe0a   : > { %v4777_v7 = vpop.xlane.xlu1 %4776  ;;  %v4774_v49 = vpop.xlane.xlu0 %4773  ;;  %4861 = vadd.xlane.f32.xlu1 %v4860_v61  ;;  %4858 = vadd.xlane.f32.xlu0 %v4857_v2 }
 0xe0b   : > { %v4802_v50 = vmul.f32 0.06666667, %v4777_v7  ;;  %v4801_v8 = vmul.f32 0.06666667, %v4774_v49  ;;  %v4832_v11 = vmul.f32 %v10717_v60, %v10717_v60  ;;  %v4831_v38 = vmul.f32 %v10720_v9, %v10720_v9 }
 0xe0d   : > { %v10729_v12 = vsub.f32 %v10646_v48, %v4802_v50  ;;  %v10732_v39 = vsub.f32 %v10648_v43, %v4801_v8  ;;  %v4866_v13 = vsel %vm4741_vm6, %v4832_v11, 0.0  ;;  %v4863_v58 = vsel %vm4741_vm6, %v4831_v38, 0.0 }
 0xe0e   : > { %v4783_v57 = vpop.xlane.xlu1 %4782  ;;  %v4780_v18 = vpop.xlane.xlu0 %4779  ;;  %4867 = vadd.xlane.f32.xlu1 %v4866_v13  ;;  %4864 = vadd.xlane.f32.xlu0 %v4863_v58 }
 0xe0f   : > { %v4804_v22 = vmul.f32 0.06666667, %v4783_v57  ;;  %v4803_v23 = vmul.f32 0.06666667, %v4780_v18  ;;  %v4834_v24 = vmul.f32 %v10729_v12, %v10729_v12  ;;  %v4833_v48 = vmul.f32 %v10732_v39, %v10732_v39 }
 0xe11   : > { %v10741_v25 = vsub.f32 %v10654_v62, %v4804_v22  ;;  %v10744_v43 = vsub.f32 %v10656_v63, %v4803_v23  ;;  %v4872_v17 = vsel %vm4741_vm6, %v4834_v24, 0.0  ;;  %v4869_v0 = vsel %vm4741_vm6, %v4833_v48, 0.0 }
 0xe12   : > { %4873 = vadd.xlane.f32.xlu1 %v4872_v17  ;;  %v4789_v27 = vpop.xlane.xlu1 %4788  ;;  %4870 = vadd.xlane.f32.xlu0 %v4869_v0  ;;  %v4786_v1 = vpop.xlane.xlu0 %4785 }
 0xe13   : > { %v4806_v28 = vmul.f32 0.06666667, %v4789_v27  ;;  %v4805_v29 = vmul.f32 0.06666667, %v4786_v1  ;;  %v4836_v4 = vmul.f32 %v10741_v25, %v10741_v25  ;;  %v4835_v62 = vmul.f32 %v10744_v43, %v10744_v43 }
 0xe15   : > { %v10753_v31 = vsub.f32 %v10662_v14, %v4806_v28  ;;  %v10756_v63 = vsub.f32 %v10664_v15, %v4805_v29  ;;  %v4878_v10 = vsel %vm4741_vm6, %v4836_v4, 0.0  ;;  %v4875_v33 = vsel %vm4741_vm6, %v4835_v62, 0.0  ;;  %v5002_v15 = vld [vmem:[%s11341_s14 + $0x8] sm:$0xff] }
 0xe16   : > { %4879 = vadd.xlane.f32.xlu1 %v4878_v10  ;;  %4876 = vadd.xlane.f32.xlu0 %v4875_v33 }
 0xe17   : > { %v4838_v34 = vmul.f32 %v10753_v31, %v10753_v31  ;;  %v4837_v35 = vmul.f32 %v10756_v63, %v10756_v63 }
 0xe19   : > { %v4884_v36 = vsel %vm4741_vm6, %v4838_v34, 0.0  ;;  %v4881_v14 = vsel %vm4741_vm6, %v4837_v35, 0.0 }
 0xe1a   : > { %4885 = vadd.xlane.f32.xlu1 %v4884_v36  ;;  %4882 = vadd.xlane.f32.xlu0 %v4881_v14 }
 0xe2b   : > { %5010 = vperm.xlu1 %8762, %v5002_v15  }
 0xe2f   : > { %5094 = vperm.xlu1 %8762, %v5090_v19  }
 0xe30   : > { %5005 = vperm.xlu0 %8761, %v5001_v37  }
 0xe34   : > { %5099 = vperm.xlu0 %8761, %v5091_v21  }
 0xe8a   : > { %v4844_v41 = vpop.xlane.xlu1 %4843 }
 0xe8b   : > { %v4888_v42 = vmul.f32 0.06666667, %v4844_v41  ;;  %v4841_v45 = vpop.xlane.xlu0 %4840 }
 0xe8c   : > { %v4887_v26 = vmul.f32 0.06666667, %v4841_v45 }
 0xe8d   : > { %v4904_v47 = vadd.f32 1e-05, %v4888_v42 }
 0xe8e   : > { %v4903_v51 = vadd.f32 1e-05, %v4887_v26 }
 0xe8f   : > { %8963 = vrsqrt.f32 %v4904_v47  ;;  %v4850_v44 = vpop.xlane.xlu1 %4849  ;;  %v4847_v54 = vpop.xlane.xlu0 %4846 }
 0xe90   : > { %8965 = vrsqrt.f32 %v4903_v51  ;;  %v4890_v53 = vmul.f32 0.06666667, %v4850_v44  ;;  %v4889_v55 = vmul.f32 0.06666667, %v4847_v54 }
 0xe92   : > { %v4906_v52 = vadd.f32 1e-05, %v4890_v53  ;;  %v4905_v32 = vadd.f32 1e-05, %v4889_v55 }
 0xe93   : > { %v4856_v61 = vpop.xlane.xlu1 %4855  ;;  %v4853_v2 = vpop.xlane.xlu0 %4852 }
 0xe94   : > { %8967 = vrsqrt.f32 %v4906_v52  ;;  %v4892_v7 = vmul.f32 0.06666667, %v4856_v61  ;;  %v4891_v49 = vmul.f32 0.06666667, %v4853_v2 }
 0xe95   : > { %8969 = vrsqrt.f32 %v4905_v32 }
 0xe96   : > { %v4908_v50 = vadd.f32 1e-05, %v4892_v7  ;;  %v4907_v8 = vadd.f32 1e-05, %v4891_v49 }
 0xe97   : > { %v4862_v11 = vpop.xlane.xlu1 %4861  ;;  %v4859_v38 = vpop.xlane.xlu0 %4858 }
 0xe98   : > { %8971 = vrsqrt.f32 %v4908_v50  ;;  %v4894_v13 = vmul.f32 0.06666667, %v4862_v11  ;;  %v4893_v58 = vmul.f32 0.06666667, %v4859_v38 }
 0xe99   : > { %v8964_v57 = vpop.eup %8963  ;;  %8973 = vrsqrt.f32 %v4907_v8 }
 0xe9a   : > { %v8966_v18 = vpop.eup %8965  ;;  %v4936_v22 = vmul.f32 %v8964_v57, %v10671_v5  ;;  %v4910_v23 = vadd.f32 1e-05, %v4894_v13  ;;  %v4909_v24 = vadd.f32 1e-05, %v4893_v58 }
 0xe9b   : > { %v4935_v48 = vmul.f32 %v8966_v18, %v10674_v6  ;;  %v4868_v17 = vpop.xlane.xlu1 %4867  ;;  %v4865_v0 = vpop.xlane.xlu0 %4864 }
 0xe9c   : > { %vm4952_vm7 = vcmp.ge.f32.partialorder %v4936_v22, 0.0  ;;  %v4968_v27 = vmul.f32 0.01, %v4936_v22  ;;  %8975 = vrsqrt.f32 %v4910_v23  ;;  %v4896_v1 = vmul.f32 0.06666667, %v4868_v17 }
 0xe9d   : > { %vm4951_vm8 = vcmp.ge.f32.partialorder %v4935_v48, 0.0  ;;  %v4967_v28 = vmul.f32 0.01, %v4935_v48  ;;  %8977 = vrsqrt.f32 %v4909_v24  ;;  %v4895_v29 = vmul.f32 0.06666667, %v4865_v0 }
 0xe9e   : > { %v8968_v4 = vpop.eup %8967  ;;  %v10783_v62 = vsel %vm4952_vm7, %v4936_v22, %v4968_v27  ;;  %v4912_v10 = vadd.f32 1e-05, %v4896_v1 }
 0xe9f   : > { %v8970_v33 = vpop.eup %8969  ;;  %v10785_v5 = vsel %vm4951_vm8, %v4935_v48, %v4967_v28  ;;  %v4938_v34 = vmul.f32 %v8968_v4, %v10682_v30  ;;  %v4911_v6 = vadd.f32 1e-05, %v4895_v29  ;;  %v4874_v35 = vpop.xlane.xlu1 %4873 }
 0xea0   : > { %v4871_v36 = vpop.xlane.xlu0 %4870  ;;  %v4937_v14 = vmul.f32 %v8970_v33, %v10685_v3  ;;  %8979 = vrsqrt.f32 %v4912_v10  ;;  %v4898_v15 = vmul.f32 0.06666667, %v4874_v35  ;;  %v10791_v21 = vpack.c.bf16 %v10783_v62, %v10785_v5 }
 0xea1   : > { %v4897_v19 = vmul.f32 0.06666667, %v4871_v36  ;;  %vm4954_vm10 = vcmp.ge.f32.partialorder %v4938_v34, 0.0  ;;  %v4970_v37 = vmul.f32 0.01, %v4938_v34  ;;  %8981 = vrsqrt.f32 %v4911_v6 }
 0xea2   : > { %v8972_v40 = vpop.eup %8971  ;;  %vm4953_vm11 = vcmp.ge.f32.partialorder %v4937_v14, 0.0  ;;  %v4969_v41 = vmul.f32 0.01, %v4937_v14  ;;  %v4914_v42 = vadd.f32 1e-05, %v4898_v15  ;;  %8363 = vmatprep.subr.bf16.mxu1 %v10791_v21 }
 0xea3   : > { %v8974_v30 = vpop.eup %8973  ;;  %v10793_v45 = vsel %vm4954_vm10, %v4938_v34, %v4970_v37  ;;  %v4940_v26 = vmul.f32 %v8972_v40, %v10693_v16  ;;  %v4913_v3 = vadd.f32 1e-05, %v4897_v19  ;;  %v4880_v47 = vpop.xlane.xlu1 %4879  ;;  %8365 = vmatpush3.bf16.msra.mxu1 %v10791_v21 }
 0xea4   : > { %v4877_v51 = vpop.xlane.xlu0 %4876  ;;  %v10797_v44 = vsel %vm4953_vm11, %v4937_v14, %v4969_v41  ;;  %v4939_v54 = vmul.f32 %v8974_v30, %v10696_v59  ;;  %8983 = vrsqrt.f32 %v4914_v42  ;;  %v4900_v53 = vmul.f32 0.06666667, %v4880_v47 }
 0xea5   : > { %vm4956_vm12 = vcmp.ge.f32.partialorder %v4940_v26, 0.0  ;;  %v4972_v55 = vmul.f32 0.01, %v4940_v26  ;;  %8985 = vrsqrt.f32 %v4913_v3  ;;  %v4899_v52 = vmul.f32 0.06666667, %v4877_v51 }
 0xea6   : > { %v8976_v32 = vpop.eup %8975  ;;  %vm4955_vm13 = vcmp.ge.f32.partialorder %v4939_v54, 0.0  ;;  %v4971_v16 = vmul.f32 0.01, %v4939_v54  ;;  %v4916_v61 = vadd.f32 1e-05, %v4900_v53  ;;  %v10803_v2 = vpack.c.bf16 %v10793_v45, %v10797_v44 }
 0xea7   : > { %v8978_v7 = vpop.eup %8977  ;;  %v10805_v49 = vsel %vm4956_vm12, %v4940_v26, %v4972_v55  ;;  %v4942_v59 = vmul.f32 %v8976_v32, %v10705_v46  ;;  %v4915_v50 = vadd.f32 1e-05, %v4899_v52  ;;  %v4886_v8 = vpop.xlane.xlu1 %4885  ;;  %vm5550_vm11 = vcmask 120832  }
 0xea8   : > { %v4883_v11 = vpop.xlane.xlu0 %4882  ;;  %v10808_v38 = vsel %vm4955_vm13, %v4939_v54, %v4971_v16  ;;  %v4941_v13 = vmul.f32 %v8978_v7, %v10708_v56  ;;  %8987 = vrsqrt.f32 %v4916_v61  ;;  %8367 = vmatprep.subr.bf16.mxu1 %v10803_v2  ;;  %v4902_v58 = vmul.f32 0.06666667, %v4886_v8  ;;  %v5088_v16 = vld [vmem:[%s11342_s15] sm:$0xff]  ;;  %v5089_v61 = vld [vmem:[%s11342_s15 + $0x8] sm:$0xff] }
 0xea9   : > { %vm4958_vm14 = vcmp.ge.f32.partialorder %v4942_v59, 0.0  ;;  %v4974_v57 = vmul.f32 0.01, %v4942_v59  ;;  %8989 = vrsqrt.f32 %v4915_v50  ;;  %8369 = vmatpush3.bf16.msra.mxu1 %v10803_v2  ;;  %v4901_v18 = vmul.f32 0.06666667, %v4883_v11  ;;  %v5177_v7 = vld [vmem:[%s11344_s17] sm:$0xff] }
 0xeaa   : > { %v8980_v22 = vpop.eup %8979  ;;  %vm4957_vm15 = vcmp.ge.f32.partialorder %v4941_v13, 0.0  ;;  %v4973_v46 = vmul.f32 0.01, %v4941_v13  ;;  %v4918_v23 = vadd.f32 1e-05, %v4902_v58  ;;  %v10815_v24 = vpack.c.bf16 %v10805_v49, %v10808_v38  ;;  %v5181_v50 = vld [vmem:[%s11344_s17 + $0x20] sm:$0xff] }
 0xeab   : > { %v8982_v48 = vpop.eup %8981  ;;  %v10817_v56 = vsel %vm4958_vm14, %v4942_v59, %v4974_v57  ;;  %v4944_v17 = vmul.f32 %v8980_v22, %v10717_v60  ;;  %v4917_v0 = vadd.f32 1e-05, %v4901_v18  ;;  %v5180_v59 = vld [vmem:[%s11344_s17 + $0x18] sm:$0xff]  ;;  %v5182_v8 = vld [vmem:[%s11344_s17 + $0x28] sm:$0xff]  ;;  %v5183_v11 = vld [vmem:[%s11344_s17 + $0x30] sm:$0xff]  ;;  %vm5819_vm12 = vcmask 39936  }
 0xeac   : > { %v10820_v27 = vsel %vm4957_vm15, %v4941_v13, %v4973_v46  ;;  %v4943_v1 = vmul.f32 %v8982_v48, %v10720_v9  ;;  %8991 = vrsqrt.f32 %v4918_v23  ;;  %8371 = vmatprep.subr.bf16.mxu1 %v10815_v24  ;;  %v5184_v13 = vld [vmem:[%s11344_s17 + $0x38] sm:$0xff]  ;;  %v5185_v58 = vld [vmem:[%s11344_s17 + $0x40] sm:$0xff]  ;;  %v5186_v57 = vld [vmem:[%s11344_s17 + $0x48] sm:$0xff]  ;;  %vm6160_vm13 = vcmask 121936  }
 0xead   : > { %vm4960_vm0 = vcmp.ge.f32.partialorder %v4944_v17, 0.0  ;;  %v4976_v28 = vmul.f32 0.01, %v4944_v17  ;;  %8993 = vrsqrt.f32 %v4917_v0  ;;  %8373 = vmatpush3.bf16.msra.mxu1 %v10815_v24  ;;  %v10827_v29 = vpack.c.bf16 %v10817_v56, %v10820_v27  ;;  %v5187_v18 = vld [vmem:[%s11344_s17 + $0x50] sm:$0xff]  ;;  %v5188_v22 = vld [vmem:[%s11344_s17 + $0x58] sm:$0xff]  ;;  %v5189_v46 = vld [vmem:[%s11344_s17 + $0x60] sm:$0xff] }
 0xeae   : > { %v8984_v4 = vpop.eup %8983  ;;  %vm4959_vm1 = vcmp.ge.f32.partialorder %v4943_v1, 0.0  ;;  %v4975_v60 = vmul.f32 0.01, %v4943_v1  ;;  %v5190_v23 = vld [vmem:[%s11344_s17 + $0x68] sm:$0xff]  ;;  %v5192_v48 = vld [vmem:[%s11344_s17 + $0x78] sm:$0xff]  ;;  %vm9028_vm14 = vmmov 0  }
 0xeaf   : > { %v8986_v10 = vpop.eup %8985  ;;  %v10829_v33 = vsel %vm4960_vm0, %v4944_v17, %v4976_v28  ;;  %v4946_v9 = vmul.f32 %v8984_v4, %v10729_v12  ;;  %8375 = vmatprep.subr.bf16.mxu1 %v10827_v29  ;;  %v5006_v0 = vpop.permute.xlu0 %5005 }
 0xeb0   : > { %v10833_v34 = vsel %vm4959_vm1, %v4943_v1, %v4975_v60  ;;  %v4945_v6 = vmul.f32 %v8986_v10, %v10732_v39 }
 0xeb1   : > { %vm4962_vm2 = vcmp.ge.f32.partialorder %v4946_v9, 0.0  ;;  %v4978_v35 = vmul.f32 0.01, %v4946_v9  ;;  %8377 = vmatpush3.bf16.msra.mxu1 %v10827_v29  ;;  %v10839_v36 = vpack.c.bf16 %v10829_v33, %v10833_v34 }
 0xeb2   : > { %v8988_v14 = vpop.eup %8987  ;;  %vm4961_vm3 = vcmp.ge.f32.partialorder %v4945_v6, 0.0  ;;  %v4977_v15 = vmul.f32 0.01, %v4945_v6 }
 0xeb3   : > { %v8990_v19 = vpop.eup %8989  ;;  %v10841_v37 = vsel %vm4962_vm2, %v4946_v9, %v4978_v35  ;;  %v4948_v12 = vmul.f32 %v8988_v14, %v10741_v25  ;;  %8379 = vmatprep.subr.bf16.mxu1 %v10839_v36  ;;  %v5100_v60 = vpop.permute.xlu0 %5099  ;;  %v5193_v14 = vld [vmem:[%s11345_s18] sm:$0xff] }
 0xeb4   : > { %v10845_v40 = vsel %vm4961_vm3, %v4945_v6, %v4977_v15  ;;  %v4947_v39 = vmul.f32 %v8990_v19, %v10744_v43  ;;  %v5197_v19 = vld [vmem:[%s11345_s18 + $0x20] sm:$0xff] }
 0xeb5   : > { %vm4964_vm5 = vcmp.ge.f32.partialorder %v4948_v12, 0.0  ;;  %v4980_v41 = vmul.f32 0.01, %v4948_v12  ;;  %8381 = vmatpush3.bf16.msra.mxu1 %v10839_v36  ;;  %v8382_v42 = vpack.c.bf16 %v10841_v37, %v10845_v40 }
 0xeb6   : > { %v8992_v30 = vpop.eup %8991  ;;  %vm4963_vm7 = vcmp.ge.f32.partialorder %v4947_v39, 0.0  ;;  %v4979_v26 = vmul.f32 0.01, %v4947_v39 }
 0xeb7   : > { %v8994_v3 = vpop.eup %8993  ;;  %v10851_v47 = vsel %vm4964_vm5, %v4948_v12, %v4980_v41  ;;  %v4950_v25 = vmul.f32 %v8992_v30, %v10753_v31  ;;  %8383 = vmatprep.subr.bf16.mxu1 %v8382_v42  ;;  %v5199_v12 = vld [vmem:[%s11345_s18 + $0x30] sm:$0xff] }
 0xeb8   : > { %v10854_v51 = vsel %vm4963_vm7, %v4947_v39, %v4979_v26  ;;  %v4949_v43 = vmul.f32 %v8994_v3, %v10756_v63  ;;  %v5000_v63 = vld [vmem:[%s11340_s13 + $0x8] sm:$0xff]  ;;  %v5201_v39 = vld [vmem:[%s11345_s18 + $0x40] sm:$0xff]  ;;  %v5203_v41 = vld [vmem:[%s11345_s18 + $0x50] sm:$0xff] }
 0xeb9   : > { %vm4966_vm8 = vcmp.ge.f32.partialorder %v4950_v25, 0.0  ;;  %v4982_v54 = vmul.f32 0.01, %v4950_v25  ;;  %8385 = vmatpush3.bf16.msra.mxu1 %v8382_v42  ;;  %v8386_v53 = vpack.c.bf16 %v10851_v47, %v10854_v51  ;;  %v5207_v30 = vld [vmem:[%s11345_s18 + $0x70] sm:$0xff]  ;;  %v6795_v26 = vld [vmem:[#allocation2] ss:$0 sm:$0xff] }
 0xeba   : > { %vm4965_vm10 = vcmp.ge.f32.partialorder %v4949_v43, 0.0  ;;  %v4981_v55 = vmul.f32 0.01, %v4949_v43 }
 0xebb   : > { %v10859_v52 = vsel %vm4966_vm8, %v4950_v25, %v4982_v54  ;;  %8387 = vmatprep.subr.bf16.mxu1 %v8386_v53 }
 0xebc   : > { %v10861_v32 = vsel %vm4965_vm10, %v4949_v43, %v4981_v55  ;;  %vm6436_vm10 = vcmask 0  }
 0xebd   : > { %8389 = vmatpush3.bf16.msra.mxu1 %v8386_v53  ;;  %v8390_v31 = vpack.c.bf16 %v10859_v52, %v10861_v32 }
 0xebf   : > { %8391 = vmatprep.subr.bf16.mxu1 %v8390_v31 }
 0xec1   : > { %8393 = vmatpush3.bf16.msra.mxu1 %v8390_v31 }
 0xec2   : > { %8395 = vmatprep.subr.bf16.mxu1 %v10791_v21 }
 0xec4   : > { %7731 = vmatmul.mubr.f32.vlgmr.msra.gmra.mrb[46].mxu1 %v5000_v63 }
 0xec5   : > { %8397 = vmatpush3.bf16.msra.mxu1 %v10791_v21  ;;  %7765 = vmatprep.mubr.f32.mxu1 %v5088_v16 }
 0xec6   : > { %8399 = vmatprep.subr.bf16.mxu1 %v10803_v2 }
 0xec9   : > { %8401 = vmatpush3.bf16.msra.mxu1 %v10803_v2 }
 0xeca   : > { %8403 = vmatprep.subr.bf16.mxu1 %v10815_v24 }
 0xecd   : > { %8405 = vmatpush3.bf16.msra.mxu1 %v10815_v24 }
 0xece   : > { %8407 = vmatprep.subr.bf16.mxu1 %v10827_v29 }
 0xed1   : > { %8409 = vmatpush3.bf16.msra.mxu1 %v10827_v29 }
 0xed2   : > { %8411 = vmatprep.subr.bf16.mxu1 %v10839_v36 }
 0xed5   : > { %8413 = vmatpush3.bf16.msra.mxu1 %v10839_v36 }
 0xed6   : > { %8415 = vmatprep.subr.bf16.mxu1 %v8382_v42 }
 0xed9   : > { %8417 = vmatpush3.bf16.msra.mxu1 %v8382_v42 }
 0xeda   : > { %8419 = vmatprep.subr.bf16.mxu1 %v8386_v53 }
 0xedd   : > { %8421 = vmatpush3.bf16.msra.mxu1 %v8386_v53 }
 0xede   : > { %8423 = vmatprep.subr.bf16.mxu1 %v8390_v31 }
 0xee1   : > { %8425 = vmatpush3.bf16.msra.mxu1 %v8390_v31 }
 0xee2   : > { %8427 = vmatprep.subr.bf16.mxu1 %v10791_v21 }
 0xee4   : > { %7766 = vmatmul.mubr.f32.vlgmr.msra.gmra.mrb[48].mxu1 %v5089_v61 }
 0xee5   : > { %8429 = vmatpush3.bf16.msra.mxu1 %v10791_v21  ;;  %7800 = vmatprep.mubr.f32.mxu1 %v5177_v7  ;;  %v5178_v21 = vld [vmem:[%s11344_s17 + $0x8] sm:$0xff] }
 0xee6   : > { %8431 = vmatprep.subr.bf16.mxu1 %v10803_v2 }
 0xee9   : > { %8433 = vmatpush3.bf16.msra.mxu1 %v10803_v2  ;;  %v5179_v2 = vld [vmem:[%s11344_s17 + $0x10] sm:$0xff] }
 0xeea   : > { %8435 = vmatprep.subr.bf16.mxu1 %v10815_v24 }
 0xeed   : > { %8437 = vmatpush3.bf16.msra.mxu1 %v10815_v24  ;;  %v5191_v24 = vld [vmem:[%s11344_s17 + $0x70] sm:$0xff] }
 0xeee   : > { %8439 = vmatprep.subr.bf16.mxu1 %v10827_v29 }
 0xef1   : > { %8441 = vmatpush3.bf16.msra.mxu1 %v10827_v29  ;;  %v5011_v29 = vpop.permute.xlu1 %5010 }
 0xef2   : > { %8443 = vmatprep.subr.bf16.mxu1 %v10839_v36 }
 0xef5   : > { %8445 = vmatpush3.bf16.msra.mxu1 %v10839_v36  ;;  %v5095_v9 = vpop.permute.xlu1 %5094 }
 0xef6   : > { %8447 = vmatprep.subr.bf16.mxu1 %v8382_v42 }
 0xef9   : > { %8449 = vmatpush3.bf16.msra.mxu1 %v8382_v42  ;;  %v5205_v42 = vld [vmem:[%s11345_s18 + $0x60] sm:$0xff] }
 0xefa   : > { %8451 = vmatprep.subr.bf16.mxu1 %v8386_v53 }
 0xefd   : > { %8453 = vmatpush3.bf16.msra.mxu1 %v8386_v53 }
 0xefe   : > { %8455 = vmatprep.subr.bf16.mxu1 %v8390_v31 }
 0xf01   : > { %8457 = vmatpush3.bf16.msra.mxu1 %v8390_v31 }
 0xf04   : > { %7801 = vmatmul.mubr.f32.vlgmr.msra.gmra.mrb[50].mxu1 %v5178_v21 }
 0xf05   : > { %7803 = vmatprep.mubr.f32.mxu1 %v5179_v2 }
 0xf08   : > { %7804 = vmatmul.mubr.f32.gmra.mrb[52].mxu1 %v5180_v59 }
 0xf09   : > { %7806 = vmatprep.mubr.f32.mxu1 %v5181_v50 }
 0xf0c   : > { %7807 = vmatmul.mubr.f32.gmra.mrb[54].mxu1 %v5182_v8 }
 0xf0d   : > { %7809 = vmatprep.mubr.f32.mxu1 %v5183_v11 }
 0xf10   : > { %7810 = vmatmul.mubr.f32.gmra.mrb[56].mxu1 %v5184_v13 }
 0xf11   : > { %7812 = vmatprep.mubr.f32.mxu1 %v5185_v58 }
 0xf14   : > { %7813 = vmatmul.mubr.f32.gmra.mrb[58].mxu1 %v5186_v57 }
 0xf15   : > { %7815 = vmatprep.mubr.f32.mxu1 %v5187_v18 }
 0xf18   : > { %7816 = vmatmul.mubr.f32.gmra.mrb[60].mxu1 %v5188_v22 }
 0xf19   : > { %7818 = vmatprep.mubr.f32.mxu1 %v5189_v46 }
 0xf1c   : > { %7819 = vmatmul.mubr.f32.gmra.mrb[62].mxu1 %v5190_v23 }
 0xf1d   : > { %7821 = vmatprep.mubr.f32.mxu1 %v5191_v24  ;;  %v5194_v24 = vld [vmem:[%s11345_s18 + $0x8] sm:$0xff] }
 0xf20   : > { %7822 = vmatmul.mubr.f32.gmra.mrb[64].mxu1 %v5192_v48 }
 0xf97   : > { %v7732_v17 = vpop.f32.mrb[46].mxu1 }
 0xf98   : > { %v5079_v1 = vpop.f32.mrb[47].mxu1  ;;  %v5085_v4 = vadd.f32 %v7732_v17, %v5011_v29 }
 0xf99   : > { %v5080_v28 = vadd.f32 %v5079_v1, %v5006_v0 }
 0xf9b   : > { %5434 = vxpose.xlu1.b32.start [1/2] (short) (narrow) %v5080_v28, 16 }
 0xf9f   : > { %5435 = vxpose.xlu1.b32.end [2/2] (short) (narrow) %v5085_v4, 16 }
 0xfb7   : > { %v7767_v10 = vpop.f32.mrb[48].mxu1 }
 0xfb8   : > { %v5174_v6 = vadd.f32 %v7767_v10, %v5100_v60  ;;  %v5168_v35 = vpop.f32.mrb[49].mxu1 }
 0xfb9   : > { %v5169_v36 = vadd.f32 %v5168_v35, %v5095_v9  ;;  %v5196_v35 = vld [vmem:[%s11345_s18 + $0x18] sm:$0xff] }
 0xfbb   : > { %v8458_v15 = vpack.c.bf16 %v5174_v6, %v5169_v36  ;;  %v5195_v6 = vld [vmem:[%s11345_s18 + $0x10] sm:$0xff]  ;;  %v5198_v36 = vld [vmem:[%s11345_s18 + $0x28] sm:$0xff] }
 0xfbd   : > { %5211 = vperm.xlu1 %8762, %v5193_v14   ;;  %8459 = vmatprep.subr.bf16.mxu1 %v8458_v15  ;;  %v5200_v14 = vld [vmem:[%s11345_s18 + $0x38] sm:$0xff] }
 0xfbe   : > { %8461 = vmatpush3.bf16.msra.mxu1 %v8458_v15  ;;  %v5202_v15 = vld [vmem:[%s11345_s18 + $0x48] sm:$0xff] }
 0xfc1   : > { %5231 = vperm.xlu1 %8762, %v5197_v19   ;;  %v5204_v19 = vld [vmem:[%s11345_s18 + $0x58] sm:$0xff] }
 0xfc5   : > { %5241 = vperm.xlu1 %8762, %v5199_v12   ;;  %v5206_v12 = vld [vmem:[%s11345_s18 + $0x68] sm:$0xff] }
 0xfc9   : > { %5251 = vperm.xlu1 %8762, %v5201_v39   ;;  %v5208_v39 = vld [vmem:[%s11345_s18 + $0x78] sm:$0xff] }
 0xfcd   : > { %5261 = vperm.xlu1 %8762, %v5203_v41  }
 0xfd1   : > { %5271 = vperm.xlu1 %8762, %v5205_v42  }
 0xfd5   : > { %5281 = vperm.xlu1 %8762, %v5207_v30  }
 0xfd7   : > { %v10963_v3 = vpop.f32.mrb[50].mxu1 }
 0xfd8   : > { %v5355_v25 = vpop.f32.mrb[51].mxu1 }
 0xfd9   : > { %5776 = vperm.xlu1 %8762, %v6795_v26  }
 0xfdb   : > { %v10965_v43 = vpop.f32.mrb[52].mxu1 }
 0xfdc   : > { %v10967_v54 = vpop.f32.mrb[53].mxu1 }
 0xfdf   : > { %v10969_v53 = vpop.f32.mrb[54].mxu1 }
 0xfe0   : > { %v10971_v55 = vpop.f32.mrb[55].mxu1 }
 0xfe3   : > { %v10973_v31 = vpop.f32.mrb[56].mxu1 }
 0xfe4   : > { %v10975_v63 = vpop.f32.mrb[57].mxu1 }
 0xfe7   : > { %v10977_v16 = vpop.f32.mrb[58].mxu1 }
 0xfe8   : > { %v10979_v61 = vpop.f32.mrb[59].mxu1 }
 0xfeb   : > { %v10981_v7 = vpop.f32.mrb[60].mxu1 }
 0xfec   : > { %v10983_v21 = vpop.f32.mrb[61].mxu1 }
 0xfef   : > { %v10985_v2 = vpop.f32.mrb[62].mxu1 }
 0xff0   : > { %v10987_v59 = vpop.f32.mrb[63].mxu1 }
 0xff3   : > { %v10989_v50 = vpop.f32.mrb[64].mxu1 }
 0xff4   : > { %v10991_v8 = vpop.f32.mrb[65].mxu1 }
0x101b   : > { %v5450_v11 = vpop.trf.xlu1 }
0x101c   : > { %7828 = vmatprep.mubr.msk.f32.mxu1 %vm1293_vm4, %v5450_v11 }
0x101f   : > { %v5451_v13 = vpop.trf.xlu1 }
0x1020   : > { %7829 = vmatmul.mubr.msk.f32.vlgmr.msra.gmra.mrb[66].mxu1 %vm1293_vm4, %v5451_v13  ;;  %vm8463_vm4 = vmpackc.low %vm4741_vm6, %vm4741_vm6 }
0x103c   : > { %v5212_v58 = vpop.permute.xlu1 %5211 }
0x103d   : > { %v5356_v57 = vadd.f32 %v5355_v25, %v5212_v58 }
0x103f   : > { %7835 = vmatprep.mubr.msk.f32.mxu1 %vm4741_vm6, %v5356_v57 }
0x10f3   : > { %v7830_v18 = vpop.f32.mrb[66].mxu1 }
0x10f4   : > { %v5538_v22 = vpop.f32.mrb[67].mxu1  ;;  %v5551_v23 = vsel %vm5550_vm11, %v7830_v18, -inf }
0x10f5   : > { %v5547_v46 = vsel %vm4741_vm6, %v5538_v22, -inf }
0x10f6   : > { %5548 = vmax.xlane.f32.xlu0 %v5547_v46 }
0x10fa   : > { %5552 = vmax.xlane.f32.xlu0 %v5551_v23 }
0x1110   : > { %5216 = vperm.xlu0 %8761, %v5194_v24  }
0x1183   : > { %v5549_v48 = vpop.xlane.xlu0 %5548 }
0x1184   : > { %v5554_v17 = vsub.f32 %v5538_v22, %v5549_v48 }
0x1186   : > { %v5556_v28 = vmul.f32 1.442695, %v5554_v17 }
0x1187   : > { %v5553_v0 = vpop.xlane.xlu0 %5552 }
0x1188   : > { %v5555_v1 = vsub.f32 %v7830_v18, %v5553_v0  ;;  %v5232_v18 = vpop.permute.xlu1 %5231 }
0x118a   : > { %v5558_v29 = vmul.f32 1.442695, %v5555_v1 }
0x118c   : > { %8995 = vpow2.f32 %v5558_v29  ;;  %v5242_v23 = vpop.permute.xlu1 %5241 }
0x118d   : > { %8997 = vpow2.f32 %v5556_v28  ;;  %v5376_v28 = vadd.f32 %v10971_v55, %v5232_v18 }
0x118f   : > { %v5217_v41 = vpop.permute.xlu0 %5216 }
0x1190   : > { %v5361_v24 = vadd.f32 %v10963_v3, %v5217_v41  ;;  %v5252_v0 = vpop.permute.xlu1 %5251  ;;  %v5386_v3 = vadd.f32 %v10975_v63, %v5242_v23 }
0x1196   : > { %v8996_v4 = vpop.eup %8995 }
0x1197   : > { %v5563_v60 = vsel %vm5550_vm11, %v8996_v4, 0.0  ;;  %v8998_v10 = vpop.eup %8997 }
0x1198   : > { %5564 = vadd.xlane.f32.xlu0 %v5563_v60  ;;  %v5560_v9 = vsel %vm4741_vm6, %v8998_v10, 0.0 }
0x119c   : > { %5561 = vadd.xlane.f32.xlu0 %v5560_v9 }
0x11b2   : > { %5221 = vperm.xlu0 %8761, %v5195_v6  }
0x11b6   : > { %5226 = vperm.xlu0 %8761, %v5196_v35  }
0x11ba   : > { %5236 = vperm.xlu0 %8761, %v5198_v36  }
0x11be   : > { %5246 = vperm.xlu0 %8761, %v5200_v14  }
0x11c2   : > { %5256 = vperm.xlu0 %8761, %v5202_v15  }
0x11c6   : > { %5266 = vperm.xlu0 %8761, %v5204_v19  }
0x11ca   : > { %5276 = vperm.xlu0 %8761, %v5206_v12  }
0x11ce   : > { %5286 = vperm.xlu0 %8761, %v5208_v39  }
0x1225   : > { %v5565_v42 = vpop.xlane.xlu0 %5564 }
0x1226   : > { %8999 = vrcp.f32 %v5565_v42 }
0x1229   : > { %v5562_v30 = vpop.xlane.xlu0 %5561 }
0x122a   : > { %9001 = vrcp.f32 %v5562_v30 }
0x1230   : > { %v9000_v25 = vpop.eup %8999 }
0x1231   : > { %v5222_v26 = vpop.permute.xlu0 %5221  ;;  %v5569_v57 = vmul.f32 %v9000_v25, %v8996_v4 }
0x1232   : > { %v5366_v48 = vadd.f32 %v10967_v54, %v5222_v26  ;;  %v5262_v54 = vpop.permute.xlu1 %5261 }
0x1234   : > { %v9002_v11 = vpop.eup %9001 }
0x1235   : > { %v5227_v13 = vpop.permute.xlu0 %5226  ;;  %v5568_v58 = vmul.f32 %v9002_v11, %v8998_v10 }
0x1236   : > { %v5371_v1 = vadd.f32 %v10965_v43, %v5227_v13  ;;  %v5396_v43 = vadd.f32 %v10979_v61, %v5252_v0  ;;  %v5272_v55 = vpop.permute.xlu1 %5271 }
0x1237   : > { %v8462_v22 = vpack.c.bf16 %v5569_v57, %v5568_v58 }
0x1239   : > { %8464 = vmatprep.subr.msk.bf16.mxu1 %vm8463_vm4, %v8462_v22  ;;  %v5237_v46 = vpop.permute.xlu0 %5236 }
0x123a   : > { %8467 = vmatpush3.bf16.xpose.msk.msra.mxu1 %vm8463_vm4, %v8462_v22  ;;  %v5381_v4 = vadd.f32 %v10969_v53, %v5237_v46  ;;  %v5406_v53 = vadd.f32 %v10983_v21, %v5262_v54  ;;  %v5282_v61 = vpop.permute.xlu1 %5281 }
0x123d   : > { %v5247_v17 = vpop.permute.xlu0 %5246 }
0x123e   : > { %v5391_v60 = vadd.f32 %v10973_v31, %v5247_v17  ;;  %v5416_v31 = vadd.f32 %v10987_v59, %v5272_v55 }
0x1241   : > { %7836 = vmatmul.mubr.msk.f32.vlgmr.msra.gmra.mrb[68].mxu1 %vm4741_vm6, %v5361_v24  ;;  %v5257_v29 = vpop.permute.xlu0 %5256 }
0x1242   : > { %7838 = vmatprep.mubr.msk.f32.mxu1 %vm4741_vm6, %v5366_v48  ;;  %v5401_v9 = vadd.f32 %v10977_v16, %v5257_v29  ;;  %v5426_v16 = vadd.f32 %v10991_v8, %v5282_v61 }
0x1245   : > { %7839 = vmatmul.mubr.msk.f32.gmra.mrb[70].mxu1 %vm4741_vm6, %v5371_v1  ;;  %v5267_v10 = vpop.permute.xlu0 %5266 }
0x1246   : > { %7841 = vmatprep.mubr.msk.f32.mxu1 %vm4741_vm6, %v5376_v28  ;;  %v5411_v6 = vadd.f32 %v10981_v7, %v5267_v10  ;;  %v11057_v7 = vpop.permute.xlu1 %5776 }
0x1249   : > { %7842 = vmatmul.mubr.msk.f32.gmra.mrb[72].mxu1 %vm4741_vm6, %v5381_v4  ;;  %v5277_v63 = vpop.permute.xlu0 %5276 }
0x124a   : > { %7844 = vmatprep.mubr.msk.f32.mxu1 %vm4741_vm6, %v5386_v3  ;;  %v5421_v35 = vadd.f32 %v10985_v2, %v5277_v63 }
0x124d   : > { %7845 = vmatmul.mubr.msk.f32.gmra.mrb[74].mxu1 %vm4741_vm6, %v5391_v60  ;;  %v5287_v36 = vpop.permute.xlu0 %5286 }
0x124e   : > { %7847 = vmatprep.mubr.msk.f32.mxu1 %vm4741_vm6, %v5396_v43  ;;  %v5431_v21 = vadd.f32 %v10989_v50, %v5287_v36 }
0x1251   : > { %7848 = vmatmul.mubr.msk.f32.gmra.mrb[76].mxu1 %vm4741_vm6, %v5401_v9 }
0x1252   : > { %7850 = vmatprep.mubr.msk.f32.mxu1 %vm4741_vm6, %v5406_v53 }
0x1255   : > { %7851 = vmatmul.mubr.msk.f32.gmra.mrb[78].mxu1 %vm4741_vm6, %v5411_v6 }
0x1256   : > { %7853 = vmatprep.mubr.msk.f32.mxu1 %vm4741_vm6, %v5416_v31 }
0x1259   : > { %7854 = vmatmul.mubr.msk.f32.gmra.mrb[80].mxu1 %vm4741_vm6, %v5421_v35 }
0x125a   : > { %7856 = vmatprep.mubr.msk.f32.mxu1 %vm4741_vm6, %v5426_v16 }
0x125d   : > { %7857 = vmatmul.mubr.msk.f32.gmra.mrb[82].mxu1 %vm4741_vm6, %v5431_v21  ;;  %vm5989_vm6 = vcmask 80936  }
0x125e   : > { %8007 = vmatprep.mubr.msk.f32.mxu1 %vm9028_vm14, %v9019_v20  ;;  %v5813_v20 = vld [vmem:[%s11348_s21 + $0x10] sm:$0xff] }
0x1314   : > { %v7837_v59 = vpop.f32.mrb[68].mxu1 }
0x1315   : > { %v5780_v14 = vmul.f32 %v7837_v59, %v11057_v7  ;;  %v5690_v15 = vpop.f32.mrb[69].mxu1 }
0x1316   : > { %v5779_v19 = vmul.f32 %v11057_v7, %v5690_v15 }
0x1317   : > { %v11062_v2 = vadd.f32 %v5780_v14, %v10783_v62 }
0x1318   : > { %v11065_v8 = vadd.f32 %v5779_v19, %v10785_v5  ;;  %v7840_v12 = vpop.f32.mrb[70].mxu1 }
0x1319   : > { %v5782_v50 = vmul.f32 %v7840_v12, %v11057_v7  ;;  %v5700_v39 = vpop.f32.mrb[71].mxu1  ;;  %v5823_v41 = vsel %vm5819_vm12, %v11062_v2, -inf }
0x131a   : > { %v5781_v42 = vmul.f32 %v11057_v7, %v5700_v39  ;;  %5824 = vmax.xlane.f32.xlu1 %v5823_v41  ;;  %v5820_v30 = vsel %vm5819_vm12, %v11065_v8, -inf  ;;  %v5990_v19 = vsel %vm5989_vm6, %v11065_v8, -inf }
0x131b   : > { %v11074_v26 = vadd.f32 %v5782_v50, %v10793_v45  ;;  %5821 = vmax.xlane.f32.xlu0 %v5820_v30 }
0x131c   : > { %v7843_v62 = vpop.f32.mrb[72].mxu1  ;;  %v11080_v13 = vadd.f32 %v5781_v42, %v10797_v44 }
0x131d   : > { %v5784_v5 = vmul.f32 %v7843_v62, %v11057_v7  ;;  %v5710_v25 = vpop.f32.mrb[73].mxu1  ;;  %v5829_v11 = vsel %vm5819_vm12, %v11074_v26, -inf  ;;  %v5999_v12 = vsel %vm5989_vm6, %v11074_v26, -inf  ;;  %v5868_v62 = vld [vmem:[%s11347_s20] sm:$0xff] }
0x131e   : > { %v5783_v58 = vmul.f32 %v11057_v7, %v5710_v25  ;;  %v5826_v24 = vsel %vm5819_vm12, %v11080_v13, -inf  ;;  %7891 = vmatprep.mubr.f32.mxu0 %v5868_v62  ;;  %v5874_v62 = vld [vmem:[%s11347_s20 + $0x30] sm:$0xff] }
0x131f   : > { %5830 = vmax.xlane.f32.xlu0 %v5829_v11  ;;  %v11087_v45 = vadd.f32 %v5784_v5, %v10805_v49 }
0x1320   : > { %v11084_v57 = vadd.f32 %v5783_v58, %v10808_v38  ;;  %v7846_v18 = vpop.f32.mrb[74].mxu1 }
0x1321   : > { %v5720_v22 = vpop.f32.mrb[75].mxu1  ;;  %v5786_v46 = vmul.f32 %v7846_v18, %v11057_v7  ;;  %v5835_v49 = vsel %vm5819_vm12, %v11087_v45, -inf  ;;  %v6005_v39 = vsel %vm5989_vm6, %v11087_v45, -inf }
0x1322   : > { %v5785_v23 = vmul.f32 %v11057_v7, %v5720_v22  ;;  %v5832_v44 = vsel %vm5819_vm12, %v11084_v57, -inf  ;;  %v6002_v50 = vsel %vm5989_vm6, %v11084_v57, -inf }
0x1323   : > { %5827 = vmax.xlane.f32.xlu0 %v5826_v24  ;;  %5833 = vmax.xlane.f32.xlu1 %v5832_v44  ;;  %v11101_v0 = vadd.f32 %v5786_v46, %v10817_v56  ;;  %v6164_v24 = vsel %vm6160_vm13, %v11062_v2, -inf  ;;  %v6167_v44 = vsel %vm6160_vm13, %v11080_v13, -inf }
0x1324   : > { %v11096_v38 = vadd.f32 %v5785_v23, %v10820_v27  ;;  %v7849_v48 = vpop.f32.mrb[76].mxu1  ;;  %v6161_v23 = vsel %vm6160_vm13, %v11065_v8, -inf  ;;  %v6176_v8 = vsel %vm6160_vm13, %v11087_v45, -inf }
0x1325   : > { %v5730_v17 = vpop.f32.mrb[77].mxu1  ;;  %v5788_v1 = vmul.f32 %v7849_v48, %v11057_v7  ;;  %v5841_v43 = vsel %vm5819_vm12, %v11101_v0, -inf  ;;  %v6011_v42 = vsel %vm5989_vm6, %v11101_v0, -inf  ;;  %v6170_v48 = vsel %vm6160_vm13, %v11074_v26, -inf }
0x1326   : > { %v5787_v28 = vmul.f32 %v11057_v7, %v5730_v17  ;;  %v5838_v29 = vsel %vm5819_vm12, %v11096_v38, -inf  ;;  %v6008_v41 = vsel %vm5989_vm6, %v11096_v38, -inf  ;;  %v6173_v17 = vsel %vm6160_vm13, %v11084_v57, -inf }
0x1327   : > { %5836 = vmax.xlane.f32.xlu0 %v5835_v49  ;;  %5839 = vmax.xlane.f32.xlu1 %v5838_v29  ;;  %v11112_v60 = vadd.f32 %v5788_v1, %v10829_v33  ;;  %v6179_v49 = vsel %vm6160_vm13, %v11096_v38, -inf }
0x1328   : > { %v11108_v27 = vadd.f32 %v5787_v28, %v10833_v34  ;;  %v7852_v4 = vpop.f32.mrb[78].mxu1 }
0x1329   : > { %v5790_v3 = vmul.f32 %v7852_v4, %v11057_v7  ;;  %v5740_v54 = vpop.f32.mrb[79].mxu1  ;;  %v5847_v6 = vsel %vm5819_vm12, %v11112_v60, -inf  ;;  %v6017_v5 = vsel %vm5989_vm6, %v11112_v60, -inf  ;;  %v6188_v26 = vsel %vm6160_vm13, %v11112_v60, -inf }
0x132a   : > { %v5789_v56 = vmul.f32 %v11057_v7, %v5740_v54  ;;  %v5844_v10 = vsel %vm5819_vm12, %v11108_v27, -inf  ;;  %v6014_v30 = vsel %vm5989_vm6, %v11108_v27, -inf }
0x132b   : > { %5842 = vmax.xlane.f32.xlu0 %v5841_v43  ;;  %5845 = vmax.xlane.f32.xlu1 %v5844_v10  ;;  %v11123_v9 = vadd.f32 %v5790_v3, %v10841_v37 }
0x132c   : > { %v11120_v34 = vadd.f32 %v5789_v56, %v10845_v40  ;;  %v7855_v55 = vpop.f32.mrb[80].mxu1 }
0x132d   : > { %v5750_v53 = vpop.f32.mrb[81].mxu1  ;;  %v5792_v33 = vmul.f32 %v7855_v55, %v11057_v7  ;;  %v5853_v37 = vsel %vm5819_vm12, %v11123_v9, -inf  ;;  %v6023_v11 = vsel %vm5989_vm6, %v11123_v9, -inf  ;;  %v6194_v45 = vsel %vm6160_vm13, %v11123_v9, -inf }
0x132e   : > { %v5791_v63 = vmul.f32 %v11057_v7, %v5750_v53  ;;  %v5850_v31 = vsel %vm5819_vm12, %v11120_v34, -inf  ;;  %v6020_v25 = vsel %vm5989_vm6, %v11120_v34, -inf  ;;  %v6191_v57 = vsel %vm6160_vm13, %v11120_v34, -inf }
0x132f   : > { %5848 = vmax.xlane.f32.xlu0 %v5847_v6  ;;  %5851 = vmax.xlane.f32.xlu1 %v5850_v31  ;;  %v11137_v16 = vadd.f32 %v5792_v33, %v10851_v47 }
0x1330   : > { %v11132_v40 = vadd.f32 %v5791_v63, %v10854_v51  ;;  %v7858_v61 = vpop.f32.mrb[82].mxu1 }
0x1331   : > { %v5760_v35 = vpop.f32.mrb[83].mxu1  ;;  %v5794_v36 = vmul.f32 %v7858_v61, %v11057_v7  ;;  %v5859_v15 = vsel %vm5819_vm12, %v11137_v16, -inf  ;;  %v6029_v18 = vsel %vm5989_vm6, %v11137_v16, -inf }
0x1332   : > { %v5793_v21 = vmul.f32 %v11057_v7, %v5760_v35  ;;  %v5856_v59 = vsel %vm5819_vm12, %v11132_v40, -inf  ;;  %v6026_v58 = vsel %vm5989_vm6, %v11132_v40, -inf  ;;  %v6197_v38 = vsel %vm6160_vm13, %v11132_v40, -inf }
0x1333   : > { %5854 = vmax.xlane.f32.xlu0 %v5853_v37  ;;  %5857 = vmax.xlane.f32.xlu1 %v5856_v59  ;;  %v11147_v14 = vadd.f32 %v5794_v36, %v10859_v52  ;;  %v5993_v52 = vsel %vm5989_vm6, %v11062_v2, -inf  ;;  %v6182_v2 = vsel %vm6160_vm13, %v11101_v0, -inf  ;;  %v6200_v0 = vsel %vm6160_vm13, %v11137_v16, -inf }
0x1334   : > { %v11144_v51 = vadd.f32 %v5793_v21, %v10861_v32  ;;  %v5996_v32 = vsel %vm5989_vm6, %v11080_v13, -inf  ;;  %v6185_v13 = vsel %vm6160_vm13, %v11108_v27, -inf }
0x1335   : > { %v5865_v7 = vsel %vm5819_vm12, %v11147_v14, -inf  ;;  %v6035_v46 = vsel %vm5989_vm6, %v11147_v14, -inf  ;;  %v6206_v28 = vsel %vm6160_vm13, %v11147_v14, -inf }
0x1336   : > { %v5862_v47 = vsel %vm5819_vm12, %v11144_v51, -inf  ;;  %v6032_v22 = vsel %vm5989_vm6, %v11144_v51, -inf  ;;  %v6203_v1 = vsel %vm6160_vm13, %v11144_v51, -inf }
0x1337   : > { %5860 = vmax.xlane.f32.xlu0 %v5859_v15  ;;  %5863 = vmax.xlane.f32.xlu1 %v5862_v47  ;;  %v5869_v15 = vld [vmem:[%s11347_s20 + $0x8] sm:$0xff] }
0x133b   : > { %5866 = vmax.xlane.f32.xlu0 %v5865_v7  ;;  %5991 = vmax.xlane.f32.xlu1 %v5990_v19  ;;  %v5870_v7 = vld [vmem:[%s11347_s20 + $0x10] sm:$0xff] }
0x133f   : > { %5994 = vmax.xlane.f32.xlu0 %v5993_v52  ;;  %5997 = vmax.xlane.f32.xlu1 %v5996_v32  ;;  %v5871_v32 = vld [vmem:[%s11347_s20 + $0x18] sm:$0xff] }
0x1343   : > { %6000 = vmax.xlane.f32.xlu0 %v5999_v12  ;;  %6003 = vmax.xlane.f32.xlu1 %v6002_v50  ;;  %v5872_v50 = vld [vmem:[%s11347_s20 + $0x20] sm:$0xff] }
0x1347   : > { %6006 = vmax.xlane.f32.xlu0 %v6005_v39  ;;  %6009 = vmax.xlane.f32.xlu1 %v6008_v41 }
0x134b   : > { %6012 = vmax.xlane.f32.xlu0 %v6011_v42  ;;  %6015 = vmax.xlane.f32.xlu1 %v6014_v30  ;;  %v5873_v42 = vld [vmem:[%s11347_s20 + $0x28] sm:$0xff] }
0x134f   : > { %6018 = vmax.xlane.f32.xlu0 %v6017_v5  ;;  %6021 = vmax.xlane.f32.xlu1 %v6020_v25 }
0x1353   : > { %6024 = vmax.xlane.f32.xlu0 %v6023_v11  ;;  %6027 = vmax.xlane.f32.xlu1 %v6026_v58  ;;  %v5875_v11 = vld [vmem:[%s11347_s20 + $0x38] sm:$0xff] }
0x1357   : > { %6030 = vmax.xlane.f32.xlu0 %v6029_v18  ;;  %6033 = vmax.xlane.f32.xlu1 %v6032_v22  ;;  %v6796_v18 = vld [vmem:[%s11347_s20 + $0x40] sm:$0xff] }
0x135b   : > { %6036 = vmax.xlane.f32.xlu0 %v6035_v46  ;;  %6162 = vmax.xlane.f32.xlu1 %v6161_v23 }
0x135f   : > { %6165 = vmax.xlane.f32.xlu0 %v6164_v24  ;;  %6168 = vmax.xlane.f32.xlu1 %v6167_v44 }
0x1363   : > { %6171 = vmax.xlane.f32.xlu0 %v6170_v48  ;;  %6174 = vmax.xlane.f32.xlu1 %v6173_v17 }
0x1367   : > { %6177 = vmax.xlane.f32.xlu0 %v6176_v8  ;;  %6180 = vmax.xlane.f32.xlu1 %v6179_v49 }
0x136b   : > { %6183 = vmax.xlane.f32.xlu0 %v6182_v2  ;;  %6186 = vmax.xlane.f32.xlu1 %v6185_v13 }
0x136f   : > { %6189 = vmax.xlane.f32.xlu0 %v6188_v26  ;;  %6192 = vmax.xlane.f32.xlu1 %v6191_v57 }
0x1373   : > { %6195 = vmax.xlane.f32.xlu0 %v6194_v45  ;;  %6198 = vmax.xlane.f32.xlu1 %v6197_v38  ;;  %v6797_v38 = vld [vmem:[%s11347_s20 + $0x48] sm:$0xff] }
0x1377   : > { %6201 = vmax.xlane.f32.xlu0 %v6200_v0  ;;  %6204 = vmax.xlane.f32.xlu1 %v6203_v1  ;;  %v6798_v1 = vld [vmem:[%s11347_s20 + $0x50] sm:$0xff] }
0x137b   : > { %6207 = vmax.xlane.f32.xlu0 %v6206_v28 }
0x13a7   : > { %v5825_v29 = vpop.xlane.xlu1 %5824 }
0x13a8   : > { %v5822_v27 = vpop.xlane.xlu0 %5821 }
0x13a9   : > { %v8468_v4 = vpack.c.bf16 %v5825_v29, %v5822_v27  ;;  %v6799_v27 = vld [vmem:[%s11347_s20 + $0x58] sm:$0xff] }
0x13ab   : > { %8469 = vmatprep.subr.bf16.mxu0 %v8468_v4 }
0x13ac   : > { %8471 = vmatpush3.bf16.msra.mxu0 %v8468_v4  ;;  %v5831_v3 = vpop.xlane.xlu0 %5830 }
0x13b0   : > { %v5834_v54 = vpop.xlane.xlu1 %5833  ;;  %v5828_v60 = vpop.xlane.xlu0 %5827 }
0x13b1   : > { %v8472_v56 = vpack.c.bf16 %v5831_v3, %v5828_v60  ;;  %v6800_v3 = vld [vmem:[%s11347_s20 + $0x60] sm:$0xff] }
0x13b3   : > { %8473 = vmatprep.subr.bf16.mxu0 %v8472_v56 }
0x13b4   : > { %v5840_v43 = vpop.xlane.xlu1 %5839  ;;  %8475 = vmatpush3.bf16.msra.mxu0 %v8472_v56  ;;  %v5837_v10 = vpop.xlane.xlu0 %5836  ;;  %v6801_v56 = vld [vmem:[%s11347_s20 + $0x68] sm:$0xff] }
0x13b5   : > { %v8476_v34 = vpack.c.bf16 %v5837_v10, %v5834_v54  ;;  %v6802_v10 = vld [vmem:[%s11347_s20 + $0x70] sm:$0xff] }
0x13b7   : > { %8477 = vmatprep.subr.bf16.mxu0 %v8476_v34 }
0x13b8   : > { %v5846_v55 = vpop.xlane.xlu1 %5845  ;;  %8479 = vmatpush3.bf16.msra.mxu0 %v8476_v34  ;;  %v5843_v9 = vpop.xlane.xlu0 %5842 }
0x13b9   : > { %v8480_v53 = vpack.c.bf16 %v5843_v9, %v5840_v43  ;;  %v6803_v9 = vld [vmem:[%s11347_s20 + $0x78] sm:$0xff] }
0x13bb   : > { %8481 = vmatprep.subr.bf16.mxu0 %v8480_v53 }
0x13bc   : > { %v5852_v33 = vpop.xlane.xlu1 %5851  ;;  %8483 = vmatpush3.bf16.msra.mxu0 %v8480_v53  ;;  %v5849_v63 = vpop.xlane.xlu0 %5848 }
0x13bd   : > { %v8484_v6 = vpack.c.bf16 %v5849_v63, %v5846_v55 }
0x13bf   : > { %8485 = vmatprep.subr.bf16.mxu0 %v8484_v6 }
0x13c0   : > { %v5858_v31 = vpop.xlane.xlu1 %5857  ;;  %8487 = vmatpush3.bf16.msra.mxu0 %v8484_v6  ;;  %v5855_v40 = vpop.xlane.xlu0 %5854 }
0x13c1   : > { %v8488_v61 = vpack.c.bf16 %v5855_v40, %v5852_v33  ;;  %v6804_v33 = vld [vmem:[%s11347_s20 + $0x80] sm:$0xff] }
0x13c3   : > { %8489 = vmatprep.subr.bf16.mxu0 %v8488_v61 }
0x13c4   : > { %v5864_v35 = vpop.xlane.xlu1 %5863  ;;  %8491 = vmatpush3.bf16.msra.mxu0 %v8488_v61  ;;  %v5861_v37 = vpop.xlane.xlu0 %5860 }
0x13c5   : > { %v8492_v16 = vpack.c.bf16 %v5861_v37, %v5858_v31 }
0x13c7   : > { %8493 = vmatprep.subr.bf16.mxu0 %v8492_v16 }
0x13c8   : > { %v5992_v36 = vpop.xlane.xlu1 %5991  ;;  %8495 = vmatpush3.bf16.msra.mxu0 %v8492_v16  ;;  %v5867_v21 = vpop.xlane.xlu0 %5866 }
0x13c9   : > { %v8496_v59 = vpack.c.bf16 %v5867_v21, %v5864_v35 }
0x13cb   : > { %8497 = vmatprep.subr.bf16.mxu0 %v8496_v59 }
0x13cc   : > { %v5998_v51 = vpop.xlane.xlu1 %5997  ;;  %8499 = vmatpush3.bf16.msra.mxu0 %v8496_v59  ;;  %v5995_v14 = vpop.xlane.xlu0 %5994 }
0x13cd   : > { %v8500_v47 = vpack.c.bf16 %v5995_v14, %v5992_v36  ;;  %v6806_v14 = vld [vmem:[%s11347_s20 + $0x90] sm:$0xff] }
0x13cf   : > { %8501 = vmatprep.subr.bf16.mxu0 %v8500_v47  ;;  %7892 = vmatmul.mubr.f32.vlgmr.msra.gmra.mrb[42].mxu0 %v5869_v15  ;;  %v6807_v15 = vld [vmem:[%s11347_s20 + $0x98] sm:$0xff] }
0x13d0   : > { %v6004_v19 = vpop.xlane.xlu1 %6003  ;;  %8503 = vmatpush3.bf16.msra.mxu0 %v8500_v47  ;;  %v6001_v52 = vpop.xlane.xlu0 %6000  ;;  %7894 = vmatprep.mubr.f32.mxu0 %v5870_v7  ;;  %v6808_v47 = vld [vmem:[%s11347_s20 + $0xa0] sm:$0xff]  ;;  %v6809_v7 = vld [vmem:[%s11347_s20 + $0xa8] sm:$0xff] }
0x13d1   : > { %v8504_v12 = vpack.c.bf16 %v6001_v52, %v5998_v51  ;;  %v6805_v51 = vld [vmem:[%s11347_s20 + $0x88] sm:$0xff]  ;;  %v6811_v52 = vld [vmem:[%s11347_s20 + $0xb8] sm:$0xff] }
0x13d3   : > { %8505 = vmatprep.subr.bf16.mxu0 %v8504_v12  ;;  %7895 = vmatmul.mubr.f32.gmra.mrb[44].mxu0 %v5871_v32  ;;  %v9027_v32 = vmov 0.0|0.0  }
0x13d4   : > { %v6010_v39 = vpop.xlane.xlu1 %6009  ;;  %8507 = vmatpush3.bf16.msra.mxu0 %v8504_v12  ;;  %v6007_v41 = vpop.xlane.xlu0 %6006  ;;  %7897 = vmatprep.mubr.f32.mxu0 %v5872_v50  ;;  %v5812_v12 = vld [vmem:[%s11348_s21 + $0x8] sm:$0xff]  ;;  %v5811_v50 = vld [vmem:[%s11348_s21] sm:$0xff] }
0x13d5   : > { %v8508_v30 = vpack.c.bf16 %v6007_v41, %v6004_v19  ;;  %v6810_v19 = vld [vmem:[%s11347_s20 + $0xb0] sm:$0xff]  ;;  %8564 = vmatprep.subr.bf16.mxu1 %v9027_v32 }
0x13d7   : > { %8509 = vmatprep.subr.bf16.mxu0 %v8508_v30  ;;  %7898 = vmatmul.mubr.f32.gmra.mrb[46].mxu0 %v5873_v42 }
0x13d8   : > { %v6016_v5 = vpop.xlane.xlu1 %6015  ;;  %8511 = vmatpush3.bf16.msra.mxu0 %v8508_v30  ;;  %v6013_v25 = vpop.xlane.xlu0 %6012  ;;  %7900 = vmatprep.mubr.f32.mxu0 %v5874_v62  ;;  %v5814_v62 = vld [vmem:[%s11348_s21 + $0x18] sm:$0xff] }
0x13d9   : > { %v8512_v58 = vpack.c.bf16 %v6013_v25, %v6010_v39 }
0x13db   : > { %8513 = vmatprep.subr.bf16.mxu0 %v8512_v58  ;;  %7901 = vmatmul.mubr.f32.gmra.mrb[48].mxu0 %v5875_v11 }
0x13dc   : > { %v6022_v22 = vpop.xlane.xlu1 %6021  ;;  %8515 = vmatpush3.bf16.msra.mxu0 %v8512_v58  ;;  %v6019_v46 = vpop.xlane.xlu0 %6018  ;;  %7935 = vmatprep.mubr.f32.mxu0 %v6796_v18 }
0x13dd   : > { %v8516_v23 = vpack.c.bf16 %v6019_v46, %v6016_v5 }
0x13df   : > { %8517 = vmatprep.subr.bf16.mxu0 %v8516_v23 }
0x13e0   : > { %v6028_v24 = vpop.xlane.xlu1 %6027  ;;  %8519 = vmatpush3.bf16.msra.mxu0 %v8516_v23  ;;  %v6025_v44 = vpop.xlane.xlu0 %6024 }
0x13e1   : > { %v8520_v48 = vpack.c.bf16 %v6025_v44, %v6022_v22 }
0x13e3   : > { %8521 = vmatprep.subr.bf16.mxu0 %v8520_v48 }
0x13e4   : > { %v6034_v17 = vpop.xlane.xlu1 %6033  ;;  %8523 = vmatpush3.bf16.msra.mxu0 %v8520_v48  ;;  %v6031_v8 = vpop.xlane.xlu0 %6030 }
0x13e5   : > { %v8524_v49 = vpack.c.bf16 %v6031_v8, %v6028_v24  ;;  %v5816_v24 = vld [vmem:[%s11348_s21 + $0x28] sm:$0xff] }
0x13e7   : > { %8525 = vmatprep.subr.bf16.mxu0 %v8524_v49 }
0x13e8   : > { %v6163_v2 = vpop.xlane.xlu1 %6162  ;;  %8527 = vmatpush3.bf16.msra.mxu0 %v8524_v49  ;;  %v6037_v13 = vpop.xlane.xlu0 %6036 }
0x13e9   : > { %v8528_v26 = vpack.c.bf16 %v6037_v13, %v6034_v17  ;;  %v5815_v17 = vld [vmem:[%s11348_s21 + $0x20] sm:$0xff] }
0x13eb   : > { %8529 = vmatprep.subr.bf16.mxu0 %v8528_v26 }
0x13ec   : > { %v6169_v57 = vpop.xlane.xlu1 %6168  ;;  %8531 = vmatpush3.bf16.msra.mxu0 %v8528_v26  ;;  %v6166_v45 = vpop.xlane.xlu0 %6165 }
0x13ed   : > { %v8532_v0 = vpack.c.bf16 %v6166_v45, %v6163_v2 }
0x13ef   : > { %8533 = vmatprep.subr.bf16.mxu0 %v8532_v0  ;;  %7936 = vmatmul.mubr.f32.vlgmr.msra.gmra.mrb[42].mxu0 %v6797_v38  ;;  %v5818_v38 = vld [vmem:[%s11348_s21 + $0x38] sm:$0xff] }
0x13f0   : > { %v6175_v28 = vpop.xlane.xlu1 %6174  ;;  %8535 = vmatpush3.bf16.msra.mxu0 %v8532_v0  ;;  %v6172_v29 = vpop.xlane.xlu0 %6171  ;;  %7938 = vmatprep.mubr.f32.mxu0 %v6798_v1 }
0x13f1   : > { %v8536_v4 = vpack.c.bf16 %v6172_v29, %v6169_v57 }
0x13f3   : > { %8537 = vmatprep.subr.bf16.mxu0 %v8536_v4  ;;  %7939 = vmatmul.mubr.f32.gmra.mrb[44].mxu0 %v6799_v27 }
0x13f4   : > { %v6181_v54 = vpop.xlane.xlu1 %6180  ;;  %8539 = vmatpush3.bf16.msra.mxu0 %v8536_v4  ;;  %v6178_v60 = vpop.xlane.xlu0 %6177  ;;  %7941 = vmatprep.mubr.f32.mxu0 %v6800_v3 }
0x13f5   : > { %v8540_v43 = vpack.c.bf16 %v6178_v60, %v6175_v28  ;;  %v5817_v28 = vld [vmem:[%s11348_s21 + $0x30] sm:$0xff] }
0x13f7   : > { %8541 = vmatprep.subr.bf16.mxu0 %v8540_v43  ;;  %7942 = vmatmul.mubr.f32.gmra.mrb[46].mxu0 %v6801_v56 }
0x13f8   : > { %v6187_v34 = vpop.xlane.xlu1 %6186  ;;  %8543 = vmatpush3.bf16.msra.mxu0 %v8540_v43  ;;  %v6184_v55 = vpop.xlane.xlu0 %6183  ;;  %7944 = vmatprep.mubr.f32.mxu0 %v6802_v10 }
0x13f9   : > { %v8544_v53 = vpack.c.bf16 %v6184_v55, %v6181_v54 }
0x13fb   : > { %8545 = vmatprep.subr.bf16.mxu0 %v8544_v53  ;;  %7945 = vmatmul.mubr.f32.gmra.mrb[48].mxu0 %v6803_v9 }
0x13fc   : > { %v6193_v63 = vpop.xlane.xlu1 %6192  ;;  %8547 = vmatpush3.bf16.msra.mxu0 %v8544_v53  ;;  %v6190_v6 = vpop.xlane.xlu0 %6189  ;;  %7979 = vmatprep.mubr.f32.mxu0 %v6804_v33  ;;  %v6355_v33 = vld [vmem:[%s11349_s22] sm:$0x1] }
0x13fd   : > { %v8548_v31 = vpack.c.bf16 %v6190_v6, %v6187_v34 }
0x13ff   : > { %8549 = vmatprep.subr.bf16.mxu0 %v8548_v31 }
0x1400   : > { %8551 = vmatpush3.bf16.msra.mxu0 %v8548_v31  ;;  %v6196_v40 = vpop.xlane.xlu0 %6195  ;;  %v6199_v35 = vpop.xlane.xlu1 %6198 }
0x1401   : > { %v8552_v61 = vpack.c.bf16 %v6196_v40, %v6193_v63  ;;  %v6356_v63 = vld [vmem:[#allocation3] sm:$0x1] }
0x1403   : > { %8553 = vmatprep.subr.bf16.mxu0 %v8552_v61 }
0x1404   : > { %8555 = vmatpush3.bf16.msra.mxu0 %v8552_v61  ;;  %v6202_v37 = vpop.xlane.xlu0 %6201  ;;  %v6205_v36 = vpop.xlane.xlu1 %6204 }
0x1405   : > { %v8556_v16 = vpack.c.bf16 %v6202_v37, %v6199_v35 }
0x1407   : > { %8557 = vmatprep.subr.bf16.mxu0 %v8556_v16 }
0x1408   : > { %8559 = vmatpush3.bf16.msra.mxu0 %v8556_v16  ;;  %v6208_v21 = vpop.xlane.xlu0 %6207 }
0x1409   : > { %v8560_v59 = vpack.c.bf16 %v6208_v21, %v6205_v36 }
0x140b   : > { %8561 = vmatprep.subr.bf16.mxu0 %v8560_v59 }
0x140c   : > { %8563 = vmatpush3.bf16.msra.mxu0 %v8560_v59 }
0x140f   : > { %7980 = vmatmul.mubr.f32.vlgmr.msra.gmra.mrb[42].mxu0 %v6805_v51 }
0x1410   : > { %7982 = vmatprep.mubr.f32.mxu0 %v6806_v14 }
0x1413   : > { %7983 = vmatmul.mubr.f32.gmra.mrb[44].mxu0 %v6807_v15 }
0x1414   : > { %7985 = vmatprep.mubr.f32.mxu0 %v6808_v47 }
0x1417   : > { %7986 = vmatmul.mubr.f32.gmra.mrb[46].mxu0 %v6809_v7 }
0x1418   : > { %7988 = vmatprep.mubr.f32.mxu0 %v6810_v19 }
0x141b   : > { %7989 = vmatmul.mubr.f32.gmra.mrb[48].mxu0 %v6811_v52 }
0x14e2   : > { %v7981_v39 = vpop.f32.mrb[42].mxu0 }
0x14e3   : > { %v8592_v41 = vadd.f32 %v7981_v39, %v5812_v12  ;;  %v6284_v42 = vpop.f32.mrb[43].mxu0 }
0x14e4   : > { %v8593_v30 = vadd.f32 %v6284_v42, %v5811_v50 }
0x14e5   : > { %vm6332_vm15 = vcmp.ge.f32.partialorder %v8592_v41, 0.0  ;;  %v6340_v5 = vmul.f32 0.01, %v8592_v41 }
0x14e6   : > { %vm6331_vm0 = vcmp.ge.f32.partialorder %v8593_v30, 0.0  ;;  %v6339_v25 = vmul.f32 0.01, %v8593_v30  ;;  %v7984_v11 = vpop.f32.mrb[44].mxu0 }
0x14e7   : > { %v6348_v58 = vsel %vm6332_vm15, %v8592_v41, %v6340_v5  ;;  %v8594_v18 = vadd.f32 %v7984_v11, %v5814_v62  ;;  %v6294_v22 = vpop.f32.mrb[45].mxu0 }
0x14e8   : > { %v6347_v46 = vsel %vm6331_vm0, %v8593_v30, %v6339_v25  ;;  %v8595_v23 = vadd.f32 %v6294_v22, %v5813_v20 }
0x14e9   : > { %v8565_v44 = vpack.c.bf16 %v6348_v58, %v6347_v46  ;;  %vm6334_vm1 = vcmp.ge.f32.partialorder %v8594_v18, 0.0  ;;  %v6342_v48 = vmul.f32 0.01, %v8594_v18 }
0x14ea   : > { %vm6333_vm2 = vcmp.ge.f32.partialorder %v8595_v23, 0.0  ;;  %v6341_v8 = vmul.f32 0.01, %v8595_v23  ;;  %v7987_v49 = vpop.f32.mrb[46].mxu0 }
0x14eb   : > { %v6350_v2 = vsel %vm6334_vm1, %v8594_v18, %v6342_v48  ;;  %v8596_v13 = vadd.f32 %v7987_v49, %v5816_v24  ;;  %v6304_v26 = vpop.f32.mrb[47].mxu0  ;;  %8566 = vmatpush3.bf16.msra.mxu1 %v8565_v44 }
0x14ec   : > { %v6349_v57 = vsel %vm6333_vm2, %v8595_v23, %v6341_v8  ;;  %v8597_v45 = vadd.f32 %v6304_v26, %v5815_v17  ;;  %8567 = vmatprep.subr.bf16.mxu1 %v9027_v32 }
0x14ed   : > { %v8568_v0 = vpack.c.bf16 %v6350_v2, %v6349_v57  ;;  %vm6336_vm3 = vcmp.ge.f32.partialorder %v8596_v13, 0.0  ;;  %v6344_v1 = vmul.f32 0.01, %v8596_v13 }
0x14ee   : > { %vm6335_vm5 = vcmp.ge.f32.partialorder %v8597_v45, 0.0  ;;  %v6343_v29 = vmul.f32 0.01, %v8597_v45  ;;  %v7990_v27 = vpop.f32.mrb[48].mxu0 }
0x14ef   : > { %v6352_v4 = vsel %vm6336_vm3, %v8596_v13, %v6344_v1  ;;  %v8598_v3 = vadd.f32 %v7990_v27, %v5818_v38  ;;  %v6314_v54 = vpop.f32.mrb[49].mxu0  ;;  %8569 = vmatpush3.bf16.msra.mxu1 %v8568_v0 }
0x14f0   : > { %v6351_v60 = vsel %vm6335_vm5, %v8597_v45, %v6343_v29  ;;  %v8599_v56 = vadd.f32 %v6314_v54, %v5817_v28  ;;  %8570 = vmatprep.subr.bf16.mxu1 %v9027_v32 }
0x14f1   : > { %v8571_v43 = vpack.c.bf16 %v6352_v4, %v6351_v60  ;;  %vm6338_vm7 = vcmp.ge.f32.partialorder %v8598_v3, 0.0  ;;  %v6346_v10 = vmul.f32 0.01, %v8598_v3 }
0x14f2   : > { %vm6337_vm8 = vcmp.ge.f32.partialorder %v8599_v56, 0.0  ;;  %v6345_v34 = vmul.f32 0.01, %v8599_v56 }
0x14f3   : > { %v6354_v55 = vsel %vm6338_vm7, %v8598_v3, %v6346_v10  ;;  %8572 = vmatpush3.bf16.msra.mxu1 %v8571_v43 }
0x14f4   : > { %v6353_v9 = vsel %vm6337_vm8, %v8599_v56, %v6345_v34  ;;  %8573 = vmatprep.subr.bf16.mxu1 %v9027_v32 }
0x14f5   : > { %v8574_v53 = vpack.c.bf16 %v6354_v55, %v6353_v9 }
0x14f7   : > { %8575 = vmatpush3.bf16.msra.mxu1 %v8574_v53 }
0x14fa   : > { %8008 = vmatmul.mubr.msk.f32.vlgmr.msra.gmra.mrb[84].mxu1 %vm2756_vm9, %v6355_v33 }
0x15cd   : > { %v6426_v6 = vpop.f32.mrb[84].mxu1 }
0x15ce   : > { %v6427_v31 = vadd.f32 %v6426_v6, %v6356_v63  ;;  %v8009_v40 = vpop.f32.mrb[85].mxu1 }
0x15d0   : > { %v6430_v61 = vsub.f32 0.0, %v6427_v31 }
0x15d2   : > { %v6431_v35 = vmul.f32 1.442695, %v6430_v61 }
0x15d4   : > { %9003 = vpow2.f32 %v6431_v35 }
0x15de   : > { %v9004_v37 = vpop.eup %9003 }
0x15df   : > { %v6433_v16 = vadd.f32 1.0, %v9004_v37 }
0x15e1   : > { %9005 = vrcp.f32 %v6433_v16 }
0x15eb   : > { %v9006_v36 = vpop.eup %9005 }
0x15ec   : > { %6437 = vst.msk [vmem:[%s737_s4] sm:$0x1] %vm6436_vm10, %v9006_v36 }
0x15ed PF: > { %s38_s6 = sadd.s32 1, %s9013_s6  }
0x15ee   : > { %p35_p4 = scmp.ge.s32.totalorder %s38_s6, 4  }
0x15f0   :  { %37 = sbr.rel (!%p35_p4) target bundleno = 10 (0xa), region = 160 }

</bundles_post_ra>
